<compile_context>
chip_gen: v7x
topology: tpu7x:2x2x1
jax: 0.10.0
libtpu: 0.0.40
codegen_flags: <defaults>
</compile_context>

<pallas_src>
import functools

import numpy as np

import jax
import jax.numpy as jnp
from jax.experimental import pallas as pl
from jax.experimental.pallas import tpu as pltpu


# ---------------------------------------------------------------------------
# Model constants (fixed by the PyTorch module)
# ---------------------------------------------------------------------------
_IMG = 14                       # input spatial size
_C1_OUT, _C2_OUT = 24, 49       # conv channel counts
_CONV1_BLOCK = 896              # pooled conv1 block: 6*6*24 = 864, padded to 7*128
_CONV2_BLOCK = 256              # pooled conv2 block: 2*2*49 = 196, padded to 2*128
_FC1_IN, _FC1_OUT = 196, 128
_FC2_OUT = 10
_LANE = 128

# Packed fc-weight buffer row layout (all boundaries multiples of 16 → clean bf16 sublanes)
_WF1_R = (0, 256)               # fc1  (196->256 rows, 128 cols)
_WF2_R = (256, 384)             # fc2  (128 rows, 10->128 cols)
_W3A_R = (384, 512)             # fc3[:10]  padded to (128, 128)
_W3B_R = (512, 640)             # fc3[10:]  padded to (128, 128)
_WC_R = (640, 768)              # classifier padded to (128, 128)
_WFC_ROWS = 768

# Packed bias buffer lane layout (all boundaries multiples of 128)
_B1_L = (0, 896)
_B2_L = (896, 1152)
_BF1_L = (1152, 1280)
_BF2_L = (1280, 1408)
_B3_L = (1408, 1536)
_BC_L = (1536, 1664)
_BIAS_LANES = 1664


# ---------------------------------------------------------------------------
# The single fused Pallas kernel
# ---------------------------------------------------------------------------
def _siamese_fused_kernel(x_ref, w1_ref, w2_ref, wfc_ref, b_ref,
                          aux_ref, out_ref, *, n_pad):
    """Whole SiameseCNN forward for a row-stacked batch.

    x_ref  : (2*n_pad, 196) f32   rows [0:n_pad) = image 0, [n_pad:2*n_pad) = image 1
    w1_ref : (196, 3584)  bf16    4 conv1 pool-corner matrices stacked along lanes
    w2_ref : (896, 1024)  bf16    4 conv2 pool-corner matrices stacked along lanes
    wfc_ref: (768, 128)   bf16    fc1 / fc2 / fc3a / fc3b / classifier stacked along rows
    b_ref  : (1, 1664)    f32     all biases packed along lanes
    aux_ref: (2*n_pad, 128) f32   fc2(relu) outputs, lane-padded (cols 10.. are zero)
    out_ref: (n_pad, 128) f32     sigmoid(classifier), lane-padded (only col 0 is real)
    """

    def conv_pool_relu(inp_bf16, w_ref, bias, block):
        # One wide weight-stationary matmul over the 4 stacked pool corners, then an
        # elementwise max over the 128-lane-aligned corner slices, then a single
        # bias + ReLU (bias identical per corner; ReLU is monotone, so
        # max_i relu(c_i + b) == relu(max_i(c_i) + b)).
        c = jnp.dot(inp_bf16, w_ref[...], preferred_element_type=jnp.float32)
        p = jnp.maximum(jnp.maximum(c[:, 0 * block:1 * block], c[:, 1 * block:2 * block]),
                        jnp.maximum(c[:, 2 * block:3 * block], c[:, 3 * block:4 * block]))
        return jnp.maximum(p + bias, 0.0).astype(jnp.bfloat16)

    x = x_ref[...].astype(jnp.bfloat16)                                          # (2P, 196)
    h1 = conv_pool_relu(x, w1_ref, b_ref[0:1, _B1_L[0]:_B1_L[1]], _CONV1_BLOCK)  # (2P, 896)
    h2 = conv_pool_relu(h1, w2_ref, b_ref[0:1, _B2_L[0]:_B2_L[1]], _CONV2_BLOCK)  # (2P, 256)

    # fc1 + ReLU
    # TODO(synk): nn.Dropout(0.2) after fc1 treated as identity (inference mode).
    h = jnp.dot(h2, wfc_ref[_WF1_R[0]:_WF1_R[1], :], preferred_element_type=jnp.float32)
    h = jnp.maximum(h + b_ref[0:1, _BF1_L[0]:_BF1_L[1]], 0.0).astype(jnp.bfloat16)

    # fc2 + ReLU (lane-padded: output columns 10..127 are exactly zero by construction)
    y = jnp.dot(h, wfc_ref[_WF2_R[0]:_WF2_R[1], :], preferred_element_type=jnp.float32)
    y = jnp.maximum(y + b_ref[0:1, _BF2_L[0]:_BF2_L[1]], 0.0)                    # (2P, 128)
    aux_ref[...] = y                                                             # lane-dense store

    # Head: cat([y1, y2], dim=1) @ fc3  ==  y1 @ fc3[:10] + y2 @ fc3[10:]
    # TODO(synk): nn.Dropout(0.2) before fc3 treated as identity (inference mode).
    yb = y.astype(jnp.bfloat16)
    y1 = yb[:n_pad, :]
    y2 = yb[n_pad:, :]
    h3 = (jnp.dot(y1, wfc_ref[_W3A_R[0]:_W3A_R[1], :], preferred_element_type=jnp.float32)
          + jnp.dot(y2, wfc_ref[_W3B_R[0]:_W3B_R[1], :], preferred_element_type=jnp.float32)
          + b_ref[0:1, _B3_L[0]:_B3_L[1]])
    h3 = jnp.maximum(h3, 0.0).astype(jnp.bfloat16)                               # (P, 128)

    # Classifier folded into a 128-lane-padded matmul + exact sigmoid.
    logit = (jnp.dot(h3, wfc_ref[_WC_R[0]:_WC_R[1], :], preferred_element_type=jnp.float32)
             + b_ref[0:1, _BC_L[0]:_BC_L[1]])
    out_ref[...] = 1.0 / (1.0 + jnp.exp(-logit))


def _full_spec(shape):
    shape = tuple(int(s) for s in shape)
    return pl.BlockSpec(shape, lambda *_: (0,) * len(shape))


def _fused_forward(kparams, x_rows, n_pad):
    w1, w2, wfc, biases = kparams
    inputs = (x_rows, w1, w2, wfc, biases)
    aux, out = pl.pallas_call(
        functools.partial(_siamese_fused_kernel, n_pad=n_pad),
        out_shape=(jax.ShapeDtypeStruct((2 * n_pad, _LANE), jnp.float32),
                   jax.ShapeDtypeStruct((n_pad, _LANE), jnp.float32)),
        grid=(1,),
        in_specs=[_full_spec(a.shape) for a in inputs],
        out_specs=(_full_spec((2 * n_pad, _LANE)), _full_spec((n_pad, _LANE))),
        compiler_params=pltpu.CompilerParams(
            dimension_semantics=("arbitrary",),
            vmem_limit_bytes=32 * 1024 * 1024),
    )(*inputs)
    return aux, out


# ---------------------------------------------------------------------------
# One-time host-side lowering of the parameters into packed kernel operands
# ---------------------------------------------------------------------------
def _lower_conv_pool(w, b, h_in, w_in, in_rows_pad, out_cols_pad):
    """Lower valid 3x3 conv (+bias+ReLU+MaxPool2d(2,2)) into 4 dense per-corner matmuls.

    Input flattening : q = (i * w_in + j) * cin + ci           (spatial-major, channel-minor)
    Output flattening: m = (io * (w_out//2) + jo) * cout + c   per pool corner (di, dj),
                       where the conv output pixel is (2*io + di, 2*jo + dj).
    Padded rows/cols are zero.
    """
    w_np = np.asarray(w, np.float32)
    b_np = np.asarray(b, np.float32)
    kh, kw, cin, cout = w_np.shape
    h_out, w_out = h_in - kh + 1, w_in - kw + 1
    ho, wo = h_out // 2, w_out // 2
    corners = []
    for di in range(2):
        for dj in range(2):
            m = np.zeros((in_rows_pad, out_cols_pad), np.float32)
            for ki in range(kh):
                for kj in range(kw):
                    for io in range(ho):
                        for jo in range(wo):
                            i_in = 2 * io + di + ki
                            j_in = 2 * jo + dj + kj
                            row0 = (i_in * w_in + j_in) * cin
                            col0 = (io * wo + jo) * cout
                            m[row0:row0 + cin, col0:col0 + cout] = w_np[ki, kj]
            corners.append(m)
    bias = np.zeros((out_cols_pad,), np.float32)
    bias[:ho * wo * cout] = np.tile(b_np, ho * wo)
    return corners, bias


def _lower_fc1(fc1_w, in_rows_pad):
    """Fold torch.flatten's NCHW order into fc1: kernel pooled layout is
    r = (h2*2 + w2)*49 + c, torch flatten index is t = c*4 + h2*2 + w2."""
    w_np = np.asarray(fc1_w, np.float32)                  # (196, 128), rows in torch order t
    out = np.zeros((in_rows_pad, w_np.shape[1]), np.float32)
    for r in range(_FC1_IN):
        s, c = r // _C2_OUT, r % _C2_OUT
        out[r] = w_np[c * 4 + s]
    return out


def _pad2d(a, rows, cols):
    a = np.asarray(a, np.float32)
    out = np.zeros((rows, cols), np.float32)
    out[:a.shape[0], :a.shape[1]] = a
    return out


def _pad_vec(v, lanes):
    v = np.asarray(v, np.float32).reshape(-1)
    out = np.zeros((lanes,), np.float32)
    out[:v.shape[0]] = v
    return out


def prepare_kernel_params(params):
    """One-time host-side lowering of the PyTorch-style parameters into 4 packed buffers."""
    w1c, b1 = _lower_conv_pool(params["conv1_w"], params["conv1_b"], _IMG, _IMG,
                               in_rows_pad=_IMG * _IMG, out_cols_pad=_CONV1_BLOCK)
    w2c, b2 = _lower_conv_pool(params["conv2_w"], params["conv2_b"], 6, 6,
                               in_rows_pad=_CONV1_BLOCK, out_cols_pad=_CONV2_BLOCK)
    w1 = np.concatenate(w1c, axis=1)                                    # (196, 3584)
    w2 = np.concatenate(w2c, axis=1)                                    # (896, 1024)

    fc3_w = np.asarray(params["fc3_w"], np.float32)
    wfc = np.concatenate([
        _lower_fc1(params["fc1_w"], in_rows_pad=_CONV2_BLOCK),          # (256, 128)
        _pad2d(params["fc2_w"], _LANE, _LANE),                          # (128, 128)
        _pad2d(fc3_w[:10], _LANE, _LANE),                               # (128, 128)
        _pad2d(fc3_w[10:], _LANE, _LANE),                               # (128, 128)
        _pad2d(params["cls_w"], _LANE, _LANE),                          # (128, 128)
    ], axis=0)
    assert wfc.shape == (_WFC_ROWS, _LANE)

    biases = np.concatenate([
        b1,                                                             # 896
        b2,                                                             # 256
        _pad_vec(params["fc1_b"], _LANE),
        _pad_vec(params["fc2_b"], _LANE),
        _pad_vec(params["fc3_b"], _LANE),
        _pad_vec(params["cls_b"], _LANE),
    ]).reshape(1, _BIAS_LANES)

    # bf16 weight storage (halves the dominant weight DMA); biases stay f32 (tiny).
    return (jnp.asarray(w1, jnp.bfloat16),
            jnp.asarray(w2, jnp.bfloat16),
            jnp.asarray(wfc, jnp.bfloat16),
            jnp.asarray(biases, jnp.float32))


# ---------------------------------------------------------------------------
# Forward pass (host glue is only tiny input packing / output unpacking)
# ---------------------------------------------------------------------------
def forward(kparams, x):
    """x: (N, 2, 14, 14) -> (out (N,), aux (N, 2, 10)); matches SiameseCNN.forward."""
    n = x.shape[0]
    n_pad = ((n + 7) // 8) * 8                      # sublane-align each image group
    flat = _IMG * _IMG
    x1 = x[:, 0].reshape(n, flat).astype(jnp.float32)
    x2 = x[:, 1].reshape(n, flat).astype(jnp.float32)
    x_rows = jnp.zeros((2 * n_pad, flat), jnp.float32)
    x_rows = x_rows.at[:n].set(x1).at[n_pad:n_pad + n].set(x2)

    aux_raw, out_raw = _fused_forward(kparams, x_rows, n_pad)

    aux = jnp.stack([aux_raw[:n, :_FC2_OUT],
                     aux_raw[n_pad:n_pad + n, :_FC2_OUT]], axis=1)      # (N, 2, 10)
    out = jnp.squeeze(out_raw[:n, :1])                                  # (N,)
    return out, aux


def init_params(key):
    """Deterministic PyTorch-style uniform(-1/sqrt(fan_in), 1/sqrt(fan_in)) init."""
    def layer(k, fan_in, wshape):
        wk, bk = jax.random.split(k)
        bound = 1.0 / float(fan_in) ** 0.5
        w = jax.random.uniform(wk, wshape, jnp.float32, -bound, bound)
        b = jax.random.uniform(bk, (wshape[-1],), jnp.float32, -bound, bound)
        return w, b

    keys = jax.random.split(key, 6)
    p = {}
    p["conv1_w"], p["conv1_b"] = layer(keys[0], 1 * 3 * 3, (3, 3, 1, _C1_OUT))
    p["conv2_w"], p["conv2_b"] = layer(keys[1], _C1_OUT * 3 * 3, (3, 3, _C1_OUT, _C2_OUT))
    p["fc1_w"], p["fc1_b"] = layer(keys[2], _FC1_IN, (_FC1_IN, _FC1_OUT))
    p["fc2_w"], p["fc2_b"] = layer(keys[3], _FC1_OUT, (_FC1_OUT, _FC2_OUT))
    p["fc3_w"], p["fc3_b"] = layer(keys[4], 20, (20, 10))
    p["cls_w"], p["cls_b"] = layer(keys[5], 10, (10, 1))
    return p


# ---------------------------------------------------------------------------
# Pure-JAX reference (no Pallas) for a numerical cross-check
# ---------------------------------------------------------------------------
def reference_forward(params, x):
    hp = jax.lax.Precision.HIGHEST

    def conv2d_relu(img, w, b):                       # img (N,H,W,Cin), w (kh,kw,cin,cout)
        kh, kw, cin, cout = w.shape
        n, h, ww, _ = img.shape
        ho, wo = h - kh + 1, ww - kw + 1
        cols = [img[:, ki:ki + ho, kj:kj + wo, :] for ki in range(kh) for kj in range(kw)]
        patches = jnp.concatenate(cols, axis=-1).reshape(n * ho * wo, kh * kw * cin)
        y = jnp.dot(patches, w.reshape(kh * kw * cin, cout), precision=hp) + b
        return jnp.maximum(y, 0.0).reshape(n, ho, wo, cout)

    def pool2x2(t):
        n, h, ww, c = t.shape
        return t.reshape(n, h // 2, 2, ww // 2, 2, c).max(axis=(2, 4))

    def block(img):
        t = img[:, :, :, None]
        t = pool2x2(conv2d_relu(t, params["conv1_w"], params["conv1_b"]))
        t = pool2x2(conv2d_relu(t, params["conv2_w"], params["conv2_b"]))
        n = t.shape[0]
        t = jnp.transpose(t, (0, 3, 1, 2)).reshape(n, _FC1_IN)         # NCHW flatten order
        t = jnp.maximum(jnp.dot(t, params["fc1_w"], precision=hp) + params["fc1_b"], 0.0)
        t = jnp.maximum(jnp.dot(t, params["fc2_w"], precision=hp) + params["fc2_b"], 0.0)
        return t

    y1, y2 = block(x[:, 0]), block(x[:, 1])
    aux = jnp.stack([y1, y2], axis=1)
    cat = jnp.concatenate([y1, y2], axis=1)
    h = jnp.maximum(jnp.dot(cat, params["fc3_w"], precision=hp) + params["fc3_b"], 0.0)
    out = jax.nn.sigmoid(jnp.dot(h, params["cls_w"], precision=hp) + params["cls_b"])
    return jnp.squeeze(out), aux


if __name__ == "__main__":
    key = jax.random.PRNGKey(0)
    pkey, xkey = jax.random.split(key)

    params = init_params(pkey)
    kparams = prepare_kernel_params(params)       # one-time host-side weight lowering

    N = 2
    x = jax.random.normal(xkey, (N, 2, _IMG, _IMG), dtype=jnp.float32)

    fwd = jax.jit(forward)
    out, aux = fwd(kparams, x)
    out, aux = jax.block_until_ready((out, aux))

    assert out.shape == (N,), out.shape
    assert aux.shape == (N, 2, _FC2_OUT), aux.shape
    assert bool(jnp.all((out >= 0.0) & (out <= 1.0)))
    assert bool(jnp.all(jnp.isfinite(aux)))

    # Cross-check against the pure-JAX reference (loose tolerance: bf16-stored weights /
    # bf16 activation casts on the MXU vs HIGHEST-precision f32 XLA reference).
    ref_out, ref_aux = jax.jit(reference_forward)(params, x)
    ref_out, ref_aux = jax.block_until_ready((ref_out, ref_aux))
    assert float(jnp.max(jnp.abs(aux - ref_aux))) < 5e-2, "aux mismatch vs reference"
    assert float(jnp.max(jnp.abs(out - ref_out))) < 5e-2, "out mismatch vs reference"

    print("KERNEL_OK")
</pallas_src>

<mosaic_0001>
module attributes {stable_mosaic.version = 11 : i64} {
  func.func @_siamese_fused_kernel(%arg0: i32, %arg1: memref<16x196xf32, #tpu.memory_space<vmem>>, %arg2: memref<196x3584xbf16, #tpu.memory_space<vmem>>, %arg3: memref<896x1024xbf16, #tpu.memory_space<vmem>>, %arg4: memref<768x128xbf16, #tpu.memory_space<vmem>>, %arg5: memref<1x1664xf32, #tpu.memory_space<vmem>>, %arg6: memref<16x128xf32, #tpu.memory_space<vmem>>, %arg7: memref<8x128xf32, #tpu.memory_space<vmem>>) attributes {dimension_semantics = [#tpu.dimension_semantics<arbitrary>], iteration_bounds = array<i64: 1>, scalar_prefetch = 0 : i64, scratch_operands = 0 : i64, tpu.core_type = #tpu.core_type<tc>, window_params = [{pipeline_mode = #tpu.pipeline_mode<synchronous>, transform_indices = @transform_0, window_bounds = array<i64: 16, 196>}, {pipeline_mode = #tpu.pipeline_mode<synchronous>, transform_indices = @transform_1, window_bounds = array<i64: 196, 3584>}, {pipeline_mode = #tpu.pipeline_mode<synchronous>, transform_indices = @transform_2, window_bounds = array<i64: 896, 1024>}, {pipeline_mode = #tpu.pipeline_mode<synchronous>, transform_indices = @transform_3, window_bounds = array<i64: 768, 128>}, {pipeline_mode = #tpu.pipeline_mode<synchronous>, transform_indices = @transform_4, window_bounds = array<i64: 1, 1664>}, {pipeline_mode = #tpu.pipeline_mode<synchronous>, transform_indices = @transform_5, window_bounds = array<i64: 16, 128>}, {pipeline_mode = #tpu.pipeline_mode<synchronous>, transform_indices = @transform_6, window_bounds = array<i64: 8, 128>}]} {
    %c0 = arith.constant 0 : index
    %c0_0 = arith.constant 0 : index
    %0 = vector.load %arg1[%c0, %c0_0] : memref<16x196xf32, #tpu.memory_space<vmem>>, vector<16x196xf32>
    %1 = arith.truncf %0 : vector<16x196xf32> to vector<16x196xbf16>
    %c0_1 = arith.constant 0 : index
    %c0_2 = arith.constant 0 : index
    %2 = vector.load %arg5[%c0_1, %c0_2] : memref<1x1664xf32, #tpu.memory_space<vmem>>, vector<1x896xf32>
    %c0_3 = arith.constant 0 : index
    %c0_4 = arith.constant 0 : index
    %3 = vector.load %arg2[%c0_3, %c0_4] : memref<196x3584xbf16, #tpu.memory_space<vmem>>, vector<196x3584xbf16>
    %cst = arith.constant dense<0.000000e+00> : vector<16x3584xf32>
    %4 = tpu.matmul %1, %3, %cst {dimension_numbers = #tpu.dot_dimension_numbers<[1], [0], [0], [1], [0, 0, 1, 1], [], []>} : vector<16x196xbf16>, vector<196x3584xbf16>, vector<16x3584xf32> -> vector<16x3584xf32>
    %5 = vector.extract_strided_slice %4 {offsets = [0, 0], sizes = [16, 896], strides = [1, 1]} : vector<16x3584xf32> to vector<16x896xf32>
    %6 = vector.extract_strided_slice %4 {offsets = [0, 896], sizes = [16, 896], strides = [1, 1]} : vector<16x3584xf32> to vector<16x896xf32>
    %7 = arith.maximumf %5, %6 : vector<16x896xf32>
    %8 = vector.extract_strided_slice %4 {offsets = [0, 1792], sizes = [16, 896], strides = [1, 1]} : vector<16x3584xf32> to vector<16x896xf32>
    %9 = vector.extract_strided_slice %4 {offsets = [0, 2688], sizes = [16, 896], strides = [1, 1]} : vector<16x3584xf32> to vector<16x896xf32>
    %10 = arith.maximumf %8, %9 : vector<16x896xf32>
    %11 = arith.maximumf %7, %10 : vector<16x896xf32>
    %12 = vector.broadcast %2 : vector<1x896xf32> to vector<16x896xf32>
    %13 = arith.addf %11, %12 : vector<16x896xf32>
    %cst_5 = arith.constant 0.000000e+00 : f32
    %14 = vector.broadcast %cst_5 : f32 to vector<16x896xf32>
    %15 = arith.maximumf %13, %14 : vector<16x896xf32>
    %16 = arith.truncf %15 : vector<16x896xf32> to vector<16x896xbf16>
    %c0_6 = arith.constant 0 : index
    %c896 = arith.constant 896 : index
    %17 = vector.load %arg5[%c0_6, %c896] : memref<1x1664xf32, #tpu.memory_space<vmem>>, vector<1x256xf32>
    %c0_7 = arith.constant 0 : index
    %c0_8 = arith.constant 0 : index
    %18 = vector.load %arg3[%c0_7, %c0_8] : memref<896x1024xbf16, #tpu.memory_space<vmem>>, vector<896x1024xbf16>
    %cst_9 = arith.constant dense<0.000000e+00> : vector<16x1024xf32>
    %19 = tpu.matmul %16, %18, %cst_9 {dimension_numbers = #tpu.dot_dimension_numbers<[1], [0], [0], [1], [0, 0, 1, 1], [], []>} : vector<16x896xbf16>, vector<896x1024xbf16>, vector<16x1024xf32> -> vector<16x1024xf32>
    %20 = vector.extract_strided_slice %19 {offsets = [0, 0], sizes = [16, 256], strides = [1, 1]} : vector<16x1024xf32> to vector<16x256xf32>
    %21 = vector.extract_strided_slice %19 {offsets = [0, 256], sizes = [16, 256], strides = [1, 1]} : vector<16x1024xf32> to vector<16x256xf32>
    %22 = arith.maximumf %20, %21 : vector<16x256xf32>
    %23 = vector.extract_strided_slice %19 {offsets = [0, 512], sizes = [16, 256], strides = [1, 1]} : vector<16x1024xf32> to vector<16x256xf32>
    %24 = vector.extract_strided_slice %19 {offsets = [0, 768], sizes = [16, 256], strides = [1, 1]} : vector<16x1024xf32> to vector<16x256xf32>
    %25 = arith.maximumf %23, %24 : vector<16x256xf32>
    %26 = arith.maximumf %22, %25 : vector<16x256xf32>
    %27 = vector.broadcast %17 : vector<1x256xf32> to vector<16x256xf32>
    %28 = arith.addf %26, %27 : vector<16x256xf32>
    %cst_10 = arith.constant 0.000000e+00 : f32
    %29 = vector.broadcast %cst_10 : f32 to vector<16x256xf32>
    %30 = arith.maximumf %28, %29 : vector<16x256xf32>
    %31 = arith.truncf %30 : vector<16x256xf32> to vector<16x256xbf16>
    %c0_11 = arith.constant 0 : index
    %c0_12 = arith.constant 0 : index
    %32 = vector.load %arg4[%c0_11, %c0_12] : memref<768x128xbf16, #tpu.memory_space<vmem>>, vector<256x128xbf16>
    %cst_13 = arith.constant dense<0.000000e+00> : vector<16x128xf32>
    %33 = tpu.matmul %31, %32, %cst_13 {dimension_numbers = #tpu.dot_dimension_numbers<[1], [0], [0], [1], [0, 0, 1, 1], [], []>} : vector<16x256xbf16>, vector<256x128xbf16>, vector<16x128xf32> -> vector<16x128xf32>
    %c0_14 = arith.constant 0 : index
    %c1152 = arith.constant 1152 : index
    %34 = vector.load %arg5[%c0_14, %c1152] : memref<1x1664xf32, #tpu.memory_space<vmem>>, vector<1x128xf32>
    %35 = vector.broadcast %34 : vector<1x128xf32> to vector<16x128xf32>
    %36 = arith.addf %33, %35 : vector<16x128xf32>
    %cst_15 = arith.constant 0.000000e+00 : f32
    %37 = vector.broadcast %cst_15 : f32 to vector<16x128xf32>
    %38 = arith.maximumf %36, %37 : vector<16x128xf32>
    %39 = arith.truncf %38 : vector<16x128xf32> to vector<16x128xbf16>
    %c256 = arith.constant 256 : index
    %c0_16 = arith.constant 0 : index
    %40 = vector.load %arg4[%c256, %c0_16] : memref<768x128xbf16, #tpu.memory_space<vmem>>, vector<128x128xbf16>
    %cst_17 = arith.constant dense<0.000000e+00> : vector<16x128xf32>
    %41 = tpu.matmul %39, %40, %cst_17 {dimension_numbers = #tpu.dot_dimension_numbers<[1], [0], [0], [1], [0, 0, 1, 1], [], []>} : vector<16x128xbf16>, vector<128x128xbf16>, vector<16x128xf32> -> vector<16x128xf32>
    %c0_18 = arith.constant 0 : index
    %c1280 = arith.constant 1280 : index
    %42 = vector.load %arg5[%c0_18, %c1280] : memref<1x1664xf32, #tpu.memory_space<vmem>>, vector<1x128xf32>
    %43 = vector.broadcast %42 : vector<1x128xf32> to vector<16x128xf32>
    %44 = arith.addf %41, %43 : vector<16x128xf32>
    %cst_19 = arith.constant 0.000000e+00 : f32
    %45 = vector.broadcast %cst_19 : f32 to vector<16x128xf32>
    %46 = arith.maximumf %44, %45 : vector<16x128xf32>
    %c0_20 = arith.constant 0 : index
    %c0_21 = arith.constant 0 : index
    %47 = vector.load %arg6[%c0_20, %c0_21] : memref<16x128xf32, #tpu.memory_space<vmem>>, vector<16x128xf32>
    tpu.vector_store %arg6[%c0_20, %c0_21], %46 {strides = array<i32>} : memref<16x128xf32, #tpu.memory_space<vmem>>, vector<16x128xf32>,
    %48 = arith.truncf %46 : vector<16x128xf32> to vector<16x128xbf16>
    %49 = vector.extract_strided_slice %48 {offsets = [0, 0], sizes = [8, 128], strides = [1, 1]} : vector<16x128xbf16> to vector<8x128xbf16>
    %50 = vector.extract_strided_slice %48 {offsets = [8, 0], sizes = [8, 128], strides = [1, 1]} : vector<16x128xbf16> to vector<8x128xbf16>
    %c384 = arith.constant 384 : index
    %c0_22 = arith.constant 0 : index
    %51 = vector.load %arg4[%c384, %c0_22] : memref<768x128xbf16, #tpu.memory_space<vmem>>, vector<128x128xbf16>
    %cst_23 = arith.constant dense<0.000000e+00> : vector<8x128xf32>
    %52 = tpu.matmul %49, %51, %cst_23 {dimension_numbers = #tpu.dot_dimension_numbers<[1], [0], [0], [1], [0, 0, 1, 1], [], []>} : vector<8x128xbf16>, vector<128x128xbf16>, vector<8x128xf32> -> vector<8x128xf32>
    %c512 = arith.constant 512 : index
    %c0_24 = arith.constant 0 : index
    %53 = vector.load %arg4[%c512, %c0_24] : memref<768x128xbf16, #tpu.memory_space<vmem>>, vector<128x128xbf16>
    %cst_25 = arith.constant dense<0.000000e+00> : vector<8x128xf32>
    %54 = tpu.matmul %50, %53, %cst_25 {dimension_numbers = #tpu.dot_dimension_numbers<[1], [0], [0], [1], [0, 0, 1, 1], [], []>} : vector<8x128xbf16>, vector<128x128xbf16>, vector<8x128xf32> -> vector<8x128xf32>
    %55 = arith.addf %52, %54 : vector<8x128xf32>
    %c0_26 = arith.constant 0 : index
    %c1408 = arith.constant 1408 : index
    %56 = vector.load %arg5[%c0_26, %c1408] : memref<1x1664xf32, #tpu.memory_space<vmem>>, vector<1x128xf32>
    %57 = vector.broadcast %56 : vector<1x128xf32> to vector<8x128xf32>
    %58 = arith.addf %55, %57 : vector<8x128xf32>
    %cst_27 = arith.constant 0.000000e+00 : f32
    %59 = vector.broadcast %cst_27 : f32 to vector<8x128xf32>
    %60 = arith.maximumf %58, %59 : vector<8x128xf32>
    %61 = arith.truncf %60 : vector<8x128xf32> to vector<8x128xbf16>
    %c640 = arith.constant 640 : index
    %c0_28 = arith.constant 0 : index
    %62 = vector.load %arg4[%c640, %c0_28] : memref<768x128xbf16, #tpu.memory_space<vmem>>, vector<128x128xbf16>
    %cst_29 = arith.constant dense<0.000000e+00> : vector<8x128xf32>
    %63 = tpu.matmul %61, %62, %cst_29 {dimension_numbers = #tpu.dot_dimension_numbers<[1], [0], [0], [1], [0, 0, 1, 1], [], []>} : vector<8x128xbf16>, vector<128x128xbf16>, vector<8x128xf32> -> vector<8x128xf32>
    %c0_30 = arith.constant 0 : index
    %c1536 = arith.constant 1536 : index
    %64 = vector.load %arg5[%c0_30, %c1536] : memref<1x1664xf32, #tpu.memory_space<vmem>>, vector<1x128xf32>
    %65 = vector.broadcast %64 : vector<1x128xf32> to vector<8x128xf32>
    %66 = arith.addf %63, %65 : vector<8x128xf32>
    %cst_31 = arith.constant 0.000000e+00 : f32
    %67 = vector.broadcast %cst_31 : f32 to vector<8x128xf32>
    %68 = arith.subf %67, %66 : vector<8x128xf32>
    %69 = math.exp %68 : vector<8x128xf32>
    %cst_32 = arith.constant 1.000000e+00 : f32
    %70 = vector.broadcast %cst_32 : f32 to vector<8x128xf32>
    %71 = arith.addf %70, %69 : vector<8x128xf32>
    %cst_33 = arith.constant 1.000000e+00 : f32
    %72 = vector.broadcast %cst_33 : f32 to vector<8x128xf32>
    %73 = arith.divf %72, %71 : vector<8x128xf32>
    %c0_34 = arith.constant 0 : index
    %c0_35 = arith.constant 0 : index
    %74 = vector.load %arg7[%c0_34, %c0_35] : memref<8x128xf32, #tpu.memory_space<vmem>>, vector<8x128xf32>
    tpu.vector_store %arg7[%c0_34, %c0_35], %73 {strides = array<i32>} : memref<8x128xf32, #tpu.memory_space<vmem>>, vector<8x128xf32>,
    return
  }
  func.func @transform_0(%arg0: i32) -> (i32, i32) {
    %c0_i32 = arith.constant 0 : i32
    %c0_i32_0 = arith.constant 0 : i32
    %c0_i32_1 = arith.constant 0 : i32
    return %c0_i32, %c0_i32_0 : i32, i32
  }
  func.func @transform_1(%arg0: i32) -> (i32, i32) {
    %c0_i32 = arith.constant 0 : i32
    %c0_i32_0 = arith.constant 0 : i32
    %c0_i32_1 = arith.constant 0 : i32
    return %c0_i32, %c0_i32_0 : i32, i32
  }
  func.func @transform_2(%arg0: i32) -> (i32, i32) {
    %c0_i32 = arith.constant 0 : i32
    %c0_i32_0 = arith.constant 0 : i32
    %c0_i32_1 = arith.constant 0 : i32
    return %c0_i32, %c0_i32_0 : i32, i32
  }
  func.func @transform_3(%arg0: i32) -> (i32, i32) {
    %c0_i32 = arith.constant 0 : i32
    %c0_i32_0 = arith.constant 0 : i32
    %c0_i32_1 = arith.constant 0 : i32
    return %c0_i32, %c0_i32_0 : i32, i32
  }
  func.func @transform_4(%arg0: i32) -> (i32, i32) {
    %c0_i32 = arith.constant 0 : i32
    %c0_i32_0 = arith.constant 0 : i32
    %c0_i32_1 = arith.constant 0 : i32
    return %c0_i32, %c0_i32_0 : i32, i32
  }
  func.func @transform_5(%arg0: i32) -> (i32, i32) {
    %c0_i32 = arith.constant 0 : i32
    %c0_i32_0 = arith.constant 0 : i32
    %c0_i32_1 = arith.constant 0 : i32
    return %c0_i32, %c0_i32_0 : i32, i32
  }
  func.func @transform_6(%arg0: i32) -> (i32, i32) {
    %c0_i32 = arith.constant 0 : i32
    %c0_i32_0 = arith.constant 0 : i32
    %c0_i32_1 = arith.constant 0 : i32
    return %c0_i32, %c0_i32_0 : i32, i32
  }
}

</mosaic_0001>

<bundles_post_ra>
// kernel: forward.1
= control target key start
LH: loop header
LB: loop body
LE: loop exit
PB: predicated region body
PF: predicated region fallthrough
CT: control target
= control target key end

     0   :  { %12 = vsyncpa [#allocation3], 0  ;;  %s9359_s0 = inlined_call_operand.vmem [shape: f32[16,196], index: 0, kind: input, shape index: {}]   ;;  %s9360_s1 = inlined_call_operand.hbm [shape: bf16[196,3584], index: 1, kind: input, shape index: {}]   ;;  %s9361_s2 = inlined_call_operand.hbm [shape: bf16[896,1024], index: 2, kind: input, shape index: {}]   ;;  %s9362_s3 = inlined_call_operand.hbm [shape: bf16[768,128], index: 3, kind: input, shape index: {}]   ;;  %s9363_s4 = inlined_call_operand.hbm [shape: f32[1,1664], index: 4, kind: input, shape index: {}]   ;;  %s9364_s5 = inlined_call_operand.vmem [shape: f32[16,128], index: 5, kind: output, shape index: {0}]   ;;  %s9365_s6 = inlined_call_operand.vmem [shape: f32[8,128], index: 6, kind: output, shape index: {1}]  }
   0x1   :  { %13 = vsyncpa [#allocation5], 0 }
   0x2   :  { %14 = vsyncpa [#allocation8], 0  ;;  %s8812_s21 = smov [#allocation4]   ;;  %s8718_s25 = scalar_lea.hbm %s9361_s2, 57344 }
   0x3   :  { %s34_s22 = sshll.u32 %s8812_s21, 4  ;;  %p8719_p0 = scmp.ne.s32.totalorder %s9361_s2, %s8718_s25  ;;  %s35_s22 = int_to_ptr.vmem [resolvable:$true] %s34_s22 }
   0x4   :  { %p8722_p1 = scmp.lt.u32.totalorder %s8718_s25, %s9361_s2 }
   0x6   :  { %p8724_p2 = pnand %p8722_p1, %p8719_p0 }
   0x8   :  { %8727 = shalt.err (!%p8724_p2)
}
   0x9   :  { %s8728_s30 = scalar_lea.vmem %s35_s22, 57344  ;;  %p8733_p4 = scmp.lt.s32.totalorder %s35_s22, %s35_s22 }
   0xa   :  { %p8729_p3 = scmp.ne.s32.totalorder %s35_s22, %s8728_s30  ;;  %p8734_p5 = scmp.lt.s32.totalorder %s8728_s30, %s8728_s30 }
   0xc   :  { %p8735_p6 = por %p8734_p5, %p8733_p4 }
   0xe   :  { %p8736_p7 = pnand %p8735_p6, %p8729_p3 }
  0x10   :  { %8739 = shalt.err (!%p8736_p7)
}
  0x11   :  { %s8813_s7 = smov 512   ;;  %s8814_s8 = smov 32  }
  0x12   :  { %40 = dma.hbm_to_vmem [thread:$0]  %s9361_s2, 57344, %s35_s22, [#allocation5], %s8813_s7, %s8813_s7, %s8814_s8  }
  0x13   :  { %s8815_s11 = smov [#allocation2]   ;;  %s8740_s15 = scalar_lea.hbm %s9360_s1, 44800 }
  0x14   :  { %s22_s12 = sshll.u32 %s8815_s11, 4  ;;  %p8741_p8 = scmp.ne.s32.totalorder %s9360_s1, %s8740_s15  ;;  %s23_s12 = int_to_ptr.vmem [resolvable:$true] %s22_s12 }
  0x15   :  { %p8744_p9 = scmp.lt.u32.totalorder %s8740_s15, %s9360_s1 }
  0x17   :  { %p8746_p10 = pnand %p8744_p9, %p8741_p8 }
  0x19   :  { %8749 = shalt.err (!%p8746_p10)
}
  0x1a   :  { %s8750_s20 = scalar_lea.vmem %s23_s12, 44800  ;;  %p8755_p12 = scmp.lt.s32.totalorder %s23_s12, %s23_s12 }
  0x1b   :  { %p8751_p11 = scmp.ne.s32.totalorder %s23_s12, %s8750_s20  ;;  %p8756_p13 = scmp.lt.s32.totalorder %s8750_s20, %s8750_s20 }
  0x1d   :  { %p8757_p0 = por %p8756_p13, %p8755_p12 }
  0x1f   :  { %p8758_p1 = pnand %p8757_p0, %p8751_p11 }
  0x21   :  { %8761 = shalt.err (!%p8758_p1)
}
  0x22   :  { %s8816_s2 = smov 1792   ;;  %s8817_s21 = smov 112  }
  0x23   :  { %28 = dma.hbm_to_vmem [thread:$0]  %s9360_s1, 44800, %s23_s12, [#allocation3], %s8816_s2, %s8816_s2, %s8817_s21  }
  0x24   :  { %s8818_s24 = smov [#allocation6]   ;;  %s8762_s28 = scalar_lea.hbm %s9362_s3, 6144 }
  0x25   :  { %s46_s25 = sshll.u32 %s8818_s24, 4  ;;  %p8763_p2 = scmp.ne.s32.totalorder %s9362_s3, %s8762_s28  ;;  %s47_s25 = int_to_ptr.vmem [resolvable:$true] %s46_s25 }
  0x26   :  { %p8766_p3 = scmp.lt.u32.totalorder %s8762_s28, %s9362_s3 }
  0x28   :  { %p8768_p4 = pnand %p8766_p3, %p8763_p2 }
  0x2a   :  { %8771 = shalt.err (!%p8768_p4)
}
  0x2b   :  { %s8772_s9 = scalar_lea.vmem %s47_s25, 6144  ;;  %p8777_p6 = scmp.lt.s32.totalorder %s47_s25, %s47_s25 }
  0x2c   :  { %p8773_p5 = scmp.ne.s32.totalorder %s47_s25, %s8772_s9  ;;  %p8778_p7 = scmp.lt.s32.totalorder %s8772_s9, %s8772_s9 }
  0x2e   :  { %p8779_p8 = por %p8778_p7, %p8777_p6 }
  0x30   :  { %p8780_p9 = pnand %p8779_p8, %p8773_p5 }
  0x32   :  { %8783 = shalt.err (!%p8780_p9)
}
  0x33   :  { %s8819_s1 = smov 64   ;;  %s8820_s10 = smov 4  }
  0x34   :  { %52 = dma.hbm_to_vmem [thread:$0]  %s9362_s3, 6144, %s47_s25, [#allocation5], %s8819_s1, %s8819_s1, %s8820_s10  }
  0x35   :  { %s8821_s13 = smov [#allocation7]   ;;  %s8784_s17 = scalar_lea.hbm %s9363_s4, 208 }
  0x36   :  { %s59_s14 = sshll.u32 %s8821_s13, 4  ;;  %p8785_p10 = scmp.ne.s32.totalorder %s9363_s4, %s8784_s17  ;;  %s60_s14 = int_to_ptr.vmem [resolvable:$true] %s59_s14 }
  0x37   :  { %p8788_p11 = scmp.lt.u32.totalorder %s8784_s17, %s9363_s4 }
  0x39   :  { %p8790_p12 = pnand %p8788_p11, %p8785_p10 }
  0x3b   :  { %8793 = shalt.err (!%p8790_p12)
}
  0x3c   :  { %s8794_s21 = scalar_lea.vmem %s60_s14, 208  ;;  %s8798_s3 = scalar_lea.vmem %s60_s14, 224 }
  0x3d   :  { %p8795_p13 = scmp.ne.s32.totalorder %s60_s14, %s8794_s21  ;;  %p8799_p0 = scmp.lt.s32.totalorder %s60_s14, %s60_s14 }
  0x3e   :  { %p8800_p1 = scmp.lt.s32.totalorder %s8798_s3, %s8794_s21 }
  0x40   :  { %p8801_p2 = por %p8800_p1, %p8799_p0 }
  0x42   :  { %p8802_p3 = pnand %p8801_p2, %p8795_p13 }
  0x44   :  { %8805 = shalt.err (!%p8802_p3)
}
  0x45   :  { %62 = dma.hbm_to_vmem [thread:$0]  %s9363_s4, 208, %s60_s14, [#allocation8]  }
  0x46   :  { %8806 = dma.done.wait [#allocation3], 44800  }
  0x47   :  { %8807 = vsyncadd [#allocation3], 4294922496 }
  0x48   :  { %8808 = dma.done.wait [#allocation5], 63488  }
  0x49   :  { %8809 = vsyncadd [#allocation5], 4294903808 }
  0x4a   :  { %8810 = dma.done.wait [#allocation8], 208  }
  0x4b   :  { %8811 = vsyncadd [#allocation8], 4294967088  ;;  %v8134_v0 = vld [vmem:[#allocation2 + $0x4] ss:$112 sps:$4 sm:$0xff]   ;;  %v8136_v1 = vld [vmem:[#allocation2 + $0xc] ss:$112 sps:$4 sm:$0xff]  }
  0x4c   :  { %2272 = vmatprep.subr.bf16.mxu0 %v8134_v0  ;;  %v8138_v2 = vld [vmem:[#allocation2] ss:$112 sps:$4 sm:$0xff]   ;;  %v8139_v3 = vld [vmem:[#allocation2 + $0x8] ss:$112 sps:$4 sm:$0xff]   ;;  %2315 = vmatprep.subr.bf16.mxu1 %v8136_v1  ;;  %v8140_v4 = vld [vmem:[#allocation2 + $0xe4] ss:$112 sps:$4 sm:$0xff]  }
  0x4d   :  { %2273 = vmatpush1.bf16.msra.mxu0 %v8138_v2  ;;  %2316 = vmatpush1.bf16.msra.mxu1 %v8139_v3  ;;  %v8142_v5 = vld [vmem:[#allocation2 + $0xec] ss:$112 sps:$4 sm:$0xff]   ;;  %v8144_v6 = vld [vmem:[#allocation2 + $0xe0] ss:$112 sps:$4 sm:$0xff]   ;;  %v8145_v7 = vld [vmem:[#allocation2 + $0xe8] ss:$112 sps:$4 sm:$0xff]  }
  0x4e   :  { %2274 = vmatprep.subr.bf16.mxu0 %v8140_v4  ;;  %2317 = vmatprep.subr.bf16.mxu1 %v8142_v5  ;;  %v8146_v8 = vld [vmem:[#allocation2 + $0x1c4] ss:$112 sps:$4 sm:$0xff]   ;;  %v8148_v9 = vld [vmem:[#allocation2 + $0x1cc] ss:$112 sps:$4 sm:$0xff]   ;;  %v8150_v10 = vld [vmem:[#allocation2 + $0x1c0] ss:$112 sps:$4 sm:$0xff]  }
  0x4f   :  { %v8151_v11 = vld [vmem:[#allocation2 + $0x1c8] ss:$112 sps:$4 sm:$0xff]   ;;  %v8152_v12 = vld [vmem:[#allocation2 + $0x2a4] ss:$112 sps:$4 sm:$0xff]   ;;  %v8154_v13 = vld [vmem:[#allocation2 + $0x2ac] ss:$112 sps:$4 sm:$0xff]  }
  0x50   :  { %v8156_v14 = vld [vmem:[#allocation2 + $0x2a0] ss:$112 sps:$4 sm:$0xff]   ;;  %v8157_v15 = vld [vmem:[#allocation2 + $0x2a8] ss:$112 sps:$4 sm:$0xff]   ;;  %v8158_v16 = vld [vmem:[#allocation2 + $0x384] ss:$112 sps:$4 sm:$0xff]  }
  0x51   :  { %2275 = vmatpush1.bf16.msra.mxu0 %v8144_v6  ;;  %2318 = vmatpush1.bf16.msra.mxu1 %v8145_v7  ;;  %v8160_v17 = vld [vmem:[#allocation2 + $0x38c] ss:$112 sps:$4 sm:$0xff]   ;;  %v8162_v18 = vld [vmem:[#allocation2 + $0x380] ss:$112 sps:$4 sm:$0xff]   ;;  %v8163_v19 = vld [vmem:[#allocation2 + $0x388] ss:$112 sps:$4 sm:$0xff]  }
  0x52   :  { %2276 = vmatprep.subr.bf16.mxu0 %v8146_v8  ;;  %2319 = vmatprep.subr.bf16.mxu1 %v8148_v9  ;;  %v8164_v20 = vld [vmem:[#allocation2 + $0x464] ss:$112 sps:$4 sm:$0xff]   ;;  %v8166_v21 = vld [vmem:[#allocation2 + $0x46c] ss:$112 sps:$4 sm:$0xff]   ;;  %v8168_v22 = vld [vmem:[#allocation2 + $0x460] ss:$112 sps:$4 sm:$0xff]  }
  0x53   :  { %v8169_v23 = vld [vmem:[#allocation2 + $0x468] ss:$112 sps:$4 sm:$0xff]   ;;  %v8170_v24 = vld [vmem:[#allocation2 + $0x544] ss:$112 sps:$4 sm:$0xff]   ;;  %v8172_v25 = vld [vmem:[#allocation2 + $0x54c] ss:$112 sps:$4 sm:$0xff]  }
  0x54   :  { %v8174_v26 = vld [vmem:[#allocation2 + $0x540] ss:$112 sps:$4 sm:$0xff]   ;;  %v8175_v27 = vld [vmem:[#allocation2 + $0x548] ss:$112 sps:$4 sm:$0xff]   ;;  %v8176_v28 = vld [vmem:[#allocation2 + $0x624] ss:$112 sps:$4 sm:$0xff]  }
  0x55   :  { %2277 = vmatpush1.bf16.msra.mxu0 %v8150_v10  ;;  %2320 = vmatpush1.bf16.msra.mxu1 %v8151_v11  ;;  %v8178_v29 = vld [vmem:[#allocation2 + $0x62c] ss:$112 sps:$4 sm:$0xff]   ;;  %v8180_v30 = vld [vmem:[#allocation2 + $0x620] ss:$112 sps:$4 sm:$0xff]   ;;  %v8181_v31 = vld [vmem:[#allocation2 + $0x628] ss:$112 sps:$4 sm:$0xff]  }
  0x56   :  { %2278 = vmatprep.subr.bf16.mxu0 %v8152_v12  ;;  %2321 = vmatprep.subr.bf16.mxu1 %v8154_v13  ;;  %v8182_v32 = vld [vmem:[#allocation2 + $0x704] ss:$112 sps:$4 sm:$0xff]   ;;  %v8184_v33 = vld [vmem:[#allocation2 + $0x70c] ss:$112 sps:$4 sm:$0xff]   ;;  %v8186_v34 = vld [vmem:[#allocation2 + $0x700] ss:$112 sps:$4 sm:$0xff]  }
  0x57   :  { %v8187_v35 = vld [vmem:[#allocation2 + $0x708] ss:$112 sps:$4 sm:$0xff]   ;;  %v8188_v37 = vld [vmem:[#allocation2 + $0x7e4] ss:$112 sps:$4 sm:$0xff]   ;;  %v8190_v38 = vld [vmem:[#allocation2 + $0x7ec] ss:$112 sps:$4 sm:$0xff]  }
  0x58   :  { %v77_v36 = vld [vmem:[%s9359_s0 + $0x8] sm:$0xff]  ;;  %v79_v39 = vld [vmem:[%s9359_s0 + $0x18] sm:$0xff]  ;;  %vm2183_vm0 = vcmask 556032   ;;  %v8192_v41 = vld [vmem:[#allocation2 + $0x7e0] ss:$112 sps:$4 sm:$0xff]   ;;  %vm2187_vm1 = vcmask 1041408  }
  0x59   :  { %2279 = vmatpush1.bf16.msra.mxu0 %v8156_v14  ;;  %2322 = vmatpush1.bf16.msra.mxu1 %v8157_v15  ;;  %v8914_v40 = vpack.c.bf16 %v79_v39, %v77_v36  ;;  %v8193_v42 = vld [vmem:[#allocation2 + $0x7e8] ss:$112 sps:$4 sm:$0xff]   ;;  %v8194_v43 = vld [vmem:[#allocation2 + $0x8c4] ss:$112 sps:$4 sm:$0xff]   ;;  %v8196_v44 = vld [vmem:[#allocation2 + $0x8cc] ss:$112 sps:$4 sm:$0xff]  }
  0x5a   :  { %2280 = vmatprep.subr.bf16.mxu0 %v8158_v16  ;;  %2323 = vmatprep.subr.bf16.mxu1 %v8160_v17  ;;  %v8198_v45 = vld [vmem:[#allocation2 + $0x8c0] ss:$112 sps:$4 sm:$0xff]   ;;  %v8199_v46 = vld [vmem:[#allocation2 + $0x8c8] ss:$112 sps:$4 sm:$0xff]   ;;  %v8200_v47 = vld [vmem:[#allocation2 + $0x9a4] ss:$112 sps:$4 sm:$0xff]  }
  0x5b   :  { %7408 = vmatprep.mubr.msk.bf16.mxu0 %vm2183_vm0, %v8914_v40  ;;  %7410 = vmatprep.mubr.msk.bf16.mxu1 %vm2183_vm0, %v8914_v40  ;;  %v8202_v48 = vld [vmem:[#allocation2 + $0x9ac] ss:$112 sps:$4 sm:$0xff]   ;;  %v419_v49 = vld [vmem:[#allocation2 + $0xa80] sm:$0x33]  ;;  %v8205_v52 = vld [vmem:[#allocation2 + $0x9a8] ss:$112 sps:$4 sm:$0xff]  }
  0x5c   :  { %v420_v50 = vld [vmem:[#allocation2 + $0xa88] sm:$0x33]  ;;  %v8204_v51 = vld [vmem:[#allocation2 + $0x9a0] ss:$112 sps:$4 sm:$0xff]   ;;  %v7379_v53 = vcombine.low %v419_v49, %v419_v49  ;;  %v7380_v54 = vcombine.high %v419_v49, %v419_v49  ;;  %v8212_v61 = vld [vmem:[#allocation2 + $0x14] ss:$112 sps:$4 sm:$0xff]  }
  0x5d   :  { %2281 = vmatpush1.bf16.msra.mxu0 %v8162_v18  ;;  %2324 = vmatpush1.bf16.msra.mxu1 %v8163_v19  ;;  %v7382_v55 = vcombine.high %v420_v50, %v420_v50  ;;  %v7381_v56 = vcombine.low %v420_v50, %v420_v50  ;;  %v76_v58 = vld [vmem:[%s9359_s0] sm:$0xff]  ;;  %v78_v59 = vld [vmem:[%s9359_s0 + $0x10] sm:$0xff]  ;;  %v8215_v62 = vld [vmem:[#allocation2 + $0x1c] ss:$112 sps:$4 sm:$0xff]   ;;  %vm8824_vm2 = vmmov 0  }
  0x5e   :  { %2282 = vmatprep.subr.bf16.mxu0 %v8164_v20  ;;  %2325 = vmatprep.subr.bf16.mxu1 %v8166_v21  ;;  %v2189_v57 = vsel %vm2187_vm1, %v7379_v53, 0  ;;  %v8930_v63 = vpack.c.bf16 %v78_v59, %v76_v58  ;;  %v8210_v0 = vld [vmem:[#allocation2 + $0x10] ss:$112 sps:$4 sm:$0xff]   ;;  %v8213_v1 = vld [vmem:[#allocation2 + $0x18] ss:$112 sps:$4 sm:$0xff]  }
  0x5f   :  { %v2195_v60 = vsel %vm2187_vm1, %v7381_v56, 0  ;;  %v8218_v2 = vld [vmem:[#allocation2 + $0xf4] ss:$112 sps:$4 sm:$0xff]   ;;  %v8221_v3 = vld [vmem:[#allocation2 + $0xfc] ss:$112 sps:$4 sm:$0xff]  }
  0x60   :  { %v8216_v4 = vld [vmem:[#allocation2 + $0xf0] ss:$112 sps:$4 sm:$0xff]   ;;  %v8219_v5 = vld [vmem:[#allocation2 + $0xf8] ss:$112 sps:$4 sm:$0xff]   ;;  %v8224_v6 = vld [vmem:[#allocation2 + $0x1d4] ss:$112 sps:$4 sm:$0xff]  }
  0x61   :  { %2283 = vmatpush1.bf16.msra.mxu0 %v8168_v22  ;;  %2326 = vmatpush1.bf16.msra.mxu1 %v8169_v23  ;;  %v8227_v7 = vld [vmem:[#allocation2 + $0x1dc] ss:$112 sps:$4 sm:$0xff]   ;;  %v8222_v8 = vld [vmem:[#allocation2 + $0x1d0] ss:$112 sps:$4 sm:$0xff]   ;;  %v8225_v9 = vld [vmem:[#allocation2 + $0x1d8] ss:$112 sps:$4 sm:$0xff]  }
  0x62   :  { %2284 = vmatprep.subr.bf16.mxu0 %v8170_v24  ;;  %2327 = vmatprep.subr.bf16.mxu1 %v8172_v25  ;;  %v8230_v10 = vld [vmem:[#allocation2 + $0x2b4] ss:$112 sps:$4 sm:$0xff]   ;;  %v8233_v11 = vld [vmem:[#allocation2 + $0x2bc] ss:$112 sps:$4 sm:$0xff]   ;;  %v8228_v12 = vld [vmem:[#allocation2 + $0x2b0] ss:$112 sps:$4 sm:$0xff]  }
  0x63   :  { %v8231_v13 = vld [vmem:[#allocation2 + $0x2b8] ss:$112 sps:$4 sm:$0xff]   ;;  %v8236_v14 = vld [vmem:[#allocation2 + $0x394] ss:$112 sps:$4 sm:$0xff]   ;;  %v8239_v15 = vld [vmem:[#allocation2 + $0x39c] ss:$112 sps:$4 sm:$0xff]  }
  0x64   :  { %v8234_v16 = vld [vmem:[#allocation2 + $0x390] ss:$112 sps:$4 sm:$0xff]   ;;  %v8237_v17 = vld [vmem:[#allocation2 + $0x398] ss:$112 sps:$4 sm:$0xff]   ;;  %v8242_v18 = vld [vmem:[#allocation2 + $0x474] ss:$112 sps:$4 sm:$0xff]  }
  0x65   :  { %2285 = vmatpush1.bf16.msra.mxu0 %v8174_v26  ;;  %2328 = vmatpush1.bf16.msra.mxu1 %v8175_v27  ;;  %v8245_v19 = vld [vmem:[#allocation2 + $0x47c] ss:$112 sps:$4 sm:$0xff]   ;;  %v8240_v20 = vld [vmem:[#allocation2 + $0x470] ss:$112 sps:$4 sm:$0xff]   ;;  %v8243_v21 = vld [vmem:[#allocation2 + $0x478] ss:$112 sps:$4 sm:$0xff]  }
  0x66   :  { %2286 = vmatprep.subr.bf16.mxu0 %v8176_v28  ;;  %2329 = vmatprep.subr.bf16.mxu1 %v8178_v29  ;;  %v8248_v22 = vld [vmem:[#allocation2 + $0x554] ss:$112 sps:$4 sm:$0xff]   ;;  %v8251_v23 = vld [vmem:[#allocation2 + $0x55c] ss:$112 sps:$4 sm:$0xff]   ;;  %v8246_v24 = vld [vmem:[#allocation2 + $0x550] ss:$112 sps:$4 sm:$0xff]  }
  0x67   :  { %v8249_v25 = vld [vmem:[#allocation2 + $0x558] ss:$112 sps:$4 sm:$0xff]   ;;  %v8254_v26 = vld [vmem:[#allocation2 + $0x634] ss:$112 sps:$4 sm:$0xff]   ;;  %v8257_v27 = vld [vmem:[#allocation2 + $0x63c] ss:$112 sps:$4 sm:$0xff]  }
  0x68   :  { %v8252_v28 = vld [vmem:[#allocation2 + $0x630] ss:$112 sps:$4 sm:$0xff]   ;;  %v8255_v29 = vld [vmem:[#allocation2 + $0x638] ss:$112 sps:$4 sm:$0xff]   ;;  %v8275_v39 = vld [vmem:[#allocation2 + $0x8dc] ss:$112 sps:$4 sm:$0xff]  }
  0x69   :  { %2287 = vmatpush1.bf16.msra.mxu0 %v8180_v30  ;;  %2330 = vmatpush1.bf16.msra.mxu1 %v8181_v31  ;;  %v8260_v30 = vld [vmem:[#allocation2 + $0x714] ss:$112 sps:$4 sm:$0xff]   ;;  %v8263_v31 = vld [vmem:[#allocation2 + $0x71c] ss:$112 sps:$4 sm:$0xff]   ;;  %v8264_v36 = vld [vmem:[#allocation2 + $0x7f0] ss:$112 sps:$4 sm:$0xff]  }
  0x6a   :  { %2288 = vmatprep.subr.bf16.mxu0 %v8182_v32  ;;  %2331 = vmatprep.subr.bf16.mxu1 %v8184_v33  ;;  %v8258_v32 = vld [vmem:[#allocation2 + $0x710] ss:$112 sps:$4 sm:$0xff]   ;;  %v8261_v33 = vld [vmem:[#allocation2 + $0x718] ss:$112 sps:$4 sm:$0xff]   ;;  %v8288_v53 = vld [vmem:[#allocation2 + $0x24] ss:$112 sps:$4 sm:$0xff]  }
  0x6b   :  { %v8291_v56 = vld [vmem:[#allocation2 + $0x2c] ss:$112 sps:$4 sm:$0xff]   ;;  %v8289_v58 = vld [vmem:[#allocation2 + $0x28] ss:$112 sps:$4 sm:$0xff]   ;;  %v8294_v59 = vld [vmem:[#allocation2 + $0x104] ss:$112 sps:$4 sm:$0xff]  }
  0x6d   :  { %2289 = vmatpush1.bf16.msra.mxu0 %v8186_v34  ;;  %2332 = vmatpush1.bf16.msra.mxu1 %v8187_v35  ;;  %v8266_v34 = vld [vmem:[#allocation2 + $0x7f4] ss:$112 sps:$4 sm:$0xff]   ;;  %v8269_v35 = vld [vmem:[#allocation2 + $0x7fc] ss:$112 sps:$4 sm:$0xff]  }
  0x6e   :  { %2290 = vmatprep.subr.bf16.mxu0 %v8188_v37  ;;  %2333 = vmatprep.subr.bf16.mxu1 %v8190_v38  ;;  %v8267_v37 = vld [vmem:[#allocation2 + $0x7f8] ss:$112 sps:$4 sm:$0xff]   ;;  %v8272_v38 = vld [vmem:[#allocation2 + $0x8d4] ss:$112 sps:$4 sm:$0xff]  }
  0x71   :  { %2291 = vmatpush1.bf16.msra.mxu0 %v8192_v41  ;;  %2334 = vmatpush1.bf16.msra.mxu1 %v8193_v42  ;;  %v8270_v41 = vld [vmem:[#allocation2 + $0x8d0] ss:$112 sps:$4 sm:$0xff]   ;;  %v8273_v42 = vld [vmem:[#allocation2 + $0x8d8] ss:$112 sps:$4 sm:$0xff]  }
  0x72   :  { %2292 = vmatprep.subr.bf16.mxu0 %v8194_v43  ;;  %2335 = vmatprep.subr.bf16.mxu1 %v8196_v44  ;;  %v8278_v43 = vld [vmem:[#allocation2 + $0x9b4] ss:$112 sps:$4 sm:$0xff]   ;;  %v8281_v44 = vld [vmem:[#allocation2 + $0x9bc] ss:$112 sps:$4 sm:$0xff]  }
  0x75   :  { %2293 = vmatpush1.bf16.msra.mxu0 %v8198_v45  ;;  %2336 = vmatpush1.bf16.msra.mxu1 %v8199_v46  ;;  %v421_v45 = vld [vmem:[#allocation2 + $0xa90] sm:$0x33]  ;;  %v422_v46 = vld [vmem:[#allocation2 + $0xa98] sm:$0x33] }
  0x76   :  { %2294 = vmatprep.subr.bf16.mxu0 %v8200_v47  ;;  %2337 = vmatprep.subr.bf16.mxu1 %v8202_v48  ;;  %v8276_v47 = vld [vmem:[#allocation2 + $0x9b0] ss:$112 sps:$4 sm:$0xff]   ;;  %v8279_v48 = vld [vmem:[#allocation2 + $0x9b8] ss:$112 sps:$4 sm:$0xff]   ;;  %v7384_v49 = vcombine.high %v421_v45, %v421_v45  ;;  %v7386_v50 = vcombine.high %v422_v46, %v422_v46 }
  0x79   :  { %2295 = vmatpush1.bf16.msra.mxu0 %v8204_v51  ;;  %2338 = vmatpush1.bf16.msra.mxu1 %v8205_v52  ;;  %v7383_v51 = vcombine.low %v421_v45, %v421_v45  ;;  %v7385_v52 = vcombine.low %v422_v46, %v422_v46 }
  0x7a   :  { %7407 = vmatprep.subr.msk.bf16.mxu0 %vm2187_vm1, %v7380_v54  ;;  %7409 = vmatprep.subr.msk.bf16.mxu1 %vm2187_vm1, %v7382_v55 }
  0x7b   :  { %v2201_v54 = vsel %vm2187_vm1, %v7383_v51, 0  ;;  %v2207_v55 = vsel %vm2187_vm1, %v7385_v52, 0  ;;  %v8362_v51 = vld [vmem:[#allocation2 + $0x30] ss:$112 sps:$4 sm:$0xff]   ;;  %v8365_v52 = vld [vmem:[#allocation2 + $0x38] ss:$112 sps:$4 sm:$0xff]  }
  0x7d   :  { %2297 = vmatpush1.bf16.msra.mxu0 %v2189_v57  ;;  %2340 = vmatpush1.bf16.msra.mxu1 %v2195_v60  ;;  %v8286_v57 = vld [vmem:[#allocation2 + $0x20] ss:$112 sps:$4 sm:$0xff]   ;;  %v8297_v60 = vld [vmem:[#allocation2 + $0x10c] ss:$112 sps:$4 sm:$0xff]  }
  0x7e   :  { %2358 = vmatprep.subr.bf16.mxu0 %v8212_v61  ;;  %2401 = vmatprep.subr.bf16.mxu1 %v8215_v62  ;;  %v8292_v61 = vld [vmem:[#allocation2 + $0x100] ss:$112 sps:$4 sm:$0xff]   ;;  %v8295_v62 = vld [vmem:[#allocation2 + $0x108] ss:$112 sps:$4 sm:$0xff]  }
  0x80   :  { %2305 = vmatmul.mubr.bf16.vlgmr.msra.gmra.mrb[0].mxu0 %v8930_v63  ;;  %2348 = vmatmul.mubr.bf16.vlgmr.msra.gmra.mrb[0].mxu1 %v8930_v63 }
  0x81   :  { %2359 = vmatpush1.bf16.msra.mxu0 %v8210_v0  ;;  %2402 = vmatpush1.bf16.msra.mxu1 %v8213_v1  ;;  %v8300_v0 = vld [vmem:[#allocation2 + $0x1e4] ss:$112 sps:$4 sm:$0xff]   ;;  %v8303_v1 = vld [vmem:[#allocation2 + $0x1ec] ss:$112 sps:$4 sm:$0xff]  }
  0x82   :  { %2360 = vmatprep.subr.bf16.mxu0 %v8218_v2  ;;  %2403 = vmatprep.subr.bf16.mxu1 %v8221_v3  ;;  %v8298_v2 = vld [vmem:[#allocation2 + $0x1e0] ss:$112 sps:$4 sm:$0xff]   ;;  %v8301_v3 = vld [vmem:[#allocation2 + $0x1e8] ss:$112 sps:$4 sm:$0xff]  }
  0x83   :  { %7412 = vmatprep.mubr.msk.bf16.mxu0 %vm2183_vm0, %v8914_v40  ;;  %7414 = vmatprep.mubr.msk.bf16.mxu1 %vm2183_vm0, %v8914_v40 }
  0x85   :  { %2361 = vmatpush1.bf16.msra.mxu0 %v8216_v4  ;;  %2404 = vmatpush1.bf16.msra.mxu1 %v8219_v5  ;;  %v8306_v4 = vld [vmem:[#allocation2 + $0x2c4] ss:$112 sps:$4 sm:$0xff]   ;;  %v8309_v5 = vld [vmem:[#allocation2 + $0x2cc] ss:$112 sps:$4 sm:$0xff]  }
  0x86   :  { %2362 = vmatprep.subr.bf16.mxu0 %v8224_v6  ;;  %2405 = vmatprep.subr.bf16.mxu1 %v8227_v7  ;;  %v8304_v6 = vld [vmem:[#allocation2 + $0x2c0] ss:$112 sps:$4 sm:$0xff]   ;;  %v8307_v7 = vld [vmem:[#allocation2 + $0x2c8] ss:$112 sps:$4 sm:$0xff]  }
  0x89   :  { %2363 = vmatpush1.bf16.msra.mxu0 %v8222_v8  ;;  %2406 = vmatpush1.bf16.msra.mxu1 %v8225_v9  ;;  %v8312_v8 = vld [vmem:[#allocation2 + $0x3a4] ss:$112 sps:$4 sm:$0xff]   ;;  %v8315_v9 = vld [vmem:[#allocation2 + $0x3ac] ss:$112 sps:$4 sm:$0xff]  }
  0x8a   :  { %2364 = vmatprep.subr.bf16.mxu0 %v8230_v10  ;;  %2407 = vmatprep.subr.bf16.mxu1 %v8233_v11  ;;  %v8310_v10 = vld [vmem:[#allocation2 + $0x3a0] ss:$112 sps:$4 sm:$0xff]   ;;  %v8313_v11 = vld [vmem:[#allocation2 + $0x3a8] ss:$112 sps:$4 sm:$0xff]  }
  0x8d   :  { %2365 = vmatpush1.bf16.msra.mxu0 %v8228_v12  ;;  %2408 = vmatpush1.bf16.msra.mxu1 %v8231_v13  ;;  %v8318_v12 = vld [vmem:[#allocation2 + $0x484] ss:$112 sps:$4 sm:$0xff]   ;;  %v8321_v13 = vld [vmem:[#allocation2 + $0x48c] ss:$112 sps:$4 sm:$0xff]  }
  0x8e   :  { %2366 = vmatprep.subr.bf16.mxu0 %v8236_v14  ;;  %2409 = vmatprep.subr.bf16.mxu1 %v8239_v15  ;;  %v8316_v14 = vld [vmem:[#allocation2 + $0x480] ss:$112 sps:$4 sm:$0xff]   ;;  %v8319_v15 = vld [vmem:[#allocation2 + $0x488] ss:$112 sps:$4 sm:$0xff]  }
  0x91   :  { %2367 = vmatpush1.bf16.msra.mxu0 %v8234_v16  ;;  %2410 = vmatpush1.bf16.msra.mxu1 %v8237_v17  ;;  %v8324_v16 = vld [vmem:[#allocation2 + $0x564] ss:$112 sps:$4 sm:$0xff]   ;;  %v8327_v17 = vld [vmem:[#allocation2 + $0x56c] ss:$112 sps:$4 sm:$0xff]  }
  0x92   :  { %2368 = vmatprep.subr.bf16.mxu0 %v8242_v18  ;;  %2411 = vmatprep.subr.bf16.mxu1 %v8245_v19  ;;  %v8322_v18 = vld [vmem:[#allocation2 + $0x560] ss:$112 sps:$4 sm:$0xff]   ;;  %v8325_v19 = vld [vmem:[#allocation2 + $0x568] ss:$112 sps:$4 sm:$0xff]  }
  0x95   :  { %2369 = vmatpush1.bf16.msra.mxu0 %v8240_v20  ;;  %2412 = vmatpush1.bf16.msra.mxu1 %v8243_v21  ;;  %v8330_v20 = vld [vmem:[#allocation2 + $0x644] ss:$112 sps:$4 sm:$0xff]   ;;  %v8333_v21 = vld [vmem:[#allocation2 + $0x64c] ss:$112 sps:$4 sm:$0xff]  }
  0x96   :  { %2370 = vmatprep.subr.bf16.mxu0 %v8248_v22  ;;  %2413 = vmatprep.subr.bf16.mxu1 %v8251_v23  ;;  %v8328_v22 = vld [vmem:[#allocation2 + $0x640] ss:$112 sps:$4 sm:$0xff]   ;;  %v8331_v23 = vld [vmem:[#allocation2 + $0x648] ss:$112 sps:$4 sm:$0xff]  }
  0x99   :  { %2371 = vmatpush1.bf16.msra.mxu0 %v8246_v24  ;;  %2414 = vmatpush1.bf16.msra.mxu1 %v8249_v25  ;;  %v8336_v24 = vld [vmem:[#allocation2 + $0x724] ss:$112 sps:$4 sm:$0xff]   ;;  %v8339_v25 = vld [vmem:[#allocation2 + $0x72c] ss:$112 sps:$4 sm:$0xff]  }
  0x9a   :  { %2372 = vmatprep.subr.bf16.mxu0 %v8254_v26  ;;  %2415 = vmatprep.subr.bf16.mxu1 %v8257_v27  ;;  %v8334_v26 = vld [vmem:[#allocation2 + $0x720] ss:$112 sps:$4 sm:$0xff]   ;;  %v8337_v27 = vld [vmem:[#allocation2 + $0x728] ss:$112 sps:$4 sm:$0xff]  }
  0x9d   :  { %2373 = vmatpush1.bf16.msra.mxu0 %v8252_v28  ;;  %2416 = vmatpush1.bf16.msra.mxu1 %v8255_v29  ;;  %v8342_v28 = vld [vmem:[#allocation2 + $0x804] ss:$112 sps:$4 sm:$0xff]   ;;  %v8345_v29 = vld [vmem:[#allocation2 + $0x80c] ss:$112 sps:$4 sm:$0xff]  }
  0x9e   :  { %2374 = vmatprep.subr.bf16.mxu0 %v8260_v30  ;;  %2417 = vmatprep.subr.bf16.mxu1 %v8263_v31  ;;  %v8340_v30 = vld [vmem:[#allocation2 + $0x800] ss:$112 sps:$4 sm:$0xff]   ;;  %v8343_v31 = vld [vmem:[#allocation2 + $0x808] ss:$112 sps:$4 sm:$0xff]  }
  0xa1   :  { %2375 = vmatpush1.bf16.msra.mxu0 %v8258_v32  ;;  %2418 = vmatpush1.bf16.msra.mxu1 %v8261_v33  ;;  %v8348_v32 = vld [vmem:[#allocation2 + $0x8e4] ss:$112 sps:$4 sm:$0xff]   ;;  %v8351_v33 = vld [vmem:[#allocation2 + $0x8ec] ss:$112 sps:$4 sm:$0xff]  }
  0xa2   :  { %2376 = vmatprep.subr.bf16.mxu0 %v8266_v34  ;;  %2419 = vmatprep.subr.bf16.mxu1 %v8269_v35  ;;  %v8346_v34 = vld [vmem:[#allocation2 + $0x8e0] ss:$112 sps:$4 sm:$0xff]   ;;  %v8349_v35 = vld [vmem:[#allocation2 + $0x8e8] ss:$112 sps:$4 sm:$0xff]  }
  0xa5   :  { %2377 = vmatpush1.bf16.msra.mxu0 %v8264_v36  ;;  %2420 = vmatpush1.bf16.msra.mxu1 %v8267_v37  ;;  %v8354_v36 = vld [vmem:[#allocation2 + $0x9c4] ss:$112 sps:$4 sm:$0xff]   ;;  %v8357_v37 = vld [vmem:[#allocation2 + $0x9cc] ss:$112 sps:$4 sm:$0xff]  }
  0xa6   :  { %2378 = vmatprep.subr.bf16.mxu0 %v8272_v38  ;;  %2421 = vmatprep.subr.bf16.mxu1 %v8275_v39  ;;  %v423_v38 = vld [vmem:[#allocation2 + $0xaa0] sm:$0x33]  ;;  %v424_v39 = vld [vmem:[#allocation2 + $0xaa8] sm:$0x33] }
  0xa7   :  { %v7387_v45 = vcombine.low %v423_v38, %v423_v38  ;;  %v7389_v46 = vcombine.low %v424_v39, %v424_v39 }
  0xa9   :  { %2379 = vmatpush1.bf16.msra.mxu0 %v8270_v41  ;;  %2422 = vmatpush1.bf16.msra.mxu1 %v8273_v42  ;;  %v8352_v41 = vld [vmem:[#allocation2 + $0x9c0] ss:$112 sps:$4 sm:$0xff]   ;;  %v8355_v42 = vld [vmem:[#allocation2 + $0x9c8] ss:$112 sps:$4 sm:$0xff]  }
  0xaa   :  { %2380 = vmatprep.subr.bf16.mxu0 %v8278_v43  ;;  %2423 = vmatprep.subr.bf16.mxu1 %v8281_v44  ;;  %v7388_v43 = vcombine.high %v423_v38, %v423_v38  ;;  %v7390_v44 = vcombine.high %v424_v39, %v424_v39 }
  0xad   :  { %2381 = vmatpush1.bf16.msra.mxu0 %v8276_v47  ;;  %2424 = vmatpush1.bf16.msra.mxu1 %v8279_v48  ;;  %v8364_v47 = vld [vmem:[#allocation2 + $0x34] ss:$112 sps:$4 sm:$0xff]   ;;  %v2213_v48 = vsel %vm2187_vm1, %v7387_v45, 0  ;;  %v8438_v45 = vld [vmem:[#allocation2 + $0x40] ss:$112 sps:$4 sm:$0xff]  }
  0xae   :  { %7411 = vmatprep.subr.msk.bf16.mxu0 %vm2187_vm1, %v7384_v49  ;;  %7413 = vmatprep.subr.msk.bf16.mxu1 %vm2187_vm1, %v7386_v50  ;;  %v2219_v49 = vsel %vm2187_vm1, %v7389_v46, 0  ;;  %v8367_v50 = vld [vmem:[#allocation2 + $0x3c] ss:$112 sps:$4 sm:$0xff]   ;;  %v8441_v46 = vld [vmem:[#allocation2 + $0x48] ss:$112 sps:$4 sm:$0xff]  }
  0xb1   :  { %2383 = vmatpush1.bf16.msra.mxu0 %v2201_v54  ;;  %2426 = vmatpush1.bf16.msra.mxu1 %v2207_v55  ;;  %v8373_v54 = vld [vmem:[#allocation2 + $0x11c] ss:$112 sps:$4 sm:$0xff]   ;;  %v8368_v55 = vld [vmem:[#allocation2 + $0x110] ss:$112 sps:$4 sm:$0xff]  }
  0xb2   :  { %2444 = vmatprep.subr.bf16.mxu0 %v8288_v53  ;;  %2487 = vmatprep.subr.bf16.mxu1 %v8291_v56  ;;  %v8370_v53 = vld [vmem:[#allocation2 + $0x114] ss:$112 sps:$4 sm:$0xff]   ;;  %v8371_v56 = vld [vmem:[#allocation2 + $0x118] ss:$112 sps:$4 sm:$0xff]  }
  0xb4   :  { %2391 = vmatmul.mubr.bf16.vlgmr.msra.gmra.mrb[4].mxu0 %v8930_v63  ;;  %2434 = vmatmul.mubr.bf16.vlgmr.msra.gmra.mrb[4].mxu1 %v8930_v63 }
  0xb5   :  { %2445 = vmatpush1.bf16.msra.mxu0 %v8286_v57  ;;  %2488 = vmatpush1.bf16.msra.mxu1 %v8289_v58  ;;  %v8376_v57 = vld [vmem:[#allocation2 + $0x1f4] ss:$112 sps:$4 sm:$0xff]   ;;  %v8379_v58 = vld [vmem:[#allocation2 + $0x1fc] ss:$112 sps:$4 sm:$0xff]  }
  0xb6   :  { %2446 = vmatprep.subr.bf16.mxu0 %v8294_v59  ;;  %2489 = vmatprep.subr.bf16.mxu1 %v8297_v60  ;;  %v8374_v59 = vld [vmem:[#allocation2 + $0x1f0] ss:$112 sps:$4 sm:$0xff]   ;;  %v8377_v60 = vld [vmem:[#allocation2 + $0x1f8] ss:$112 sps:$4 sm:$0xff]  }
  0xb7   :  { %7416 = vmatprep.mubr.msk.bf16.mxu0 %vm2183_vm0, %v8914_v40  ;;  %7418 = vmatprep.mubr.msk.bf16.mxu1 %vm2183_vm0, %v8914_v40 }
  0xb9   :  { %2447 = vmatpush1.bf16.msra.mxu0 %v8292_v61  ;;  %2490 = vmatpush1.bf16.msra.mxu1 %v8295_v62  ;;  %v8382_v61 = vld [vmem:[#allocation2 + $0x2d4] ss:$112 sps:$4 sm:$0xff]   ;;  %v8385_v62 = vld [vmem:[#allocation2 + $0x2dc] ss:$112 sps:$4 sm:$0xff]  }
  0xba   :  { %2448 = vmatprep.subr.bf16.mxu0 %v8300_v0  ;;  %2491 = vmatprep.subr.bf16.mxu1 %v8303_v1  ;;  %v8380_v0 = vld [vmem:[#allocation2 + $0x2d0] ss:$112 sps:$4 sm:$0xff]   ;;  %v8383_v1 = vld [vmem:[#allocation2 + $0x2d8] ss:$112 sps:$4 sm:$0xff]  }
  0xbd   :  { %2449 = vmatpush1.bf16.msra.mxu0 %v8298_v2  ;;  %2492 = vmatpush1.bf16.msra.mxu1 %v8301_v3  ;;  %v8388_v2 = vld [vmem:[#allocation2 + $0x3b4] ss:$112 sps:$4 sm:$0xff]   ;;  %v8391_v3 = vld [vmem:[#allocation2 + $0x3bc] ss:$112 sps:$4 sm:$0xff]  }
  0xbe   :  { %2450 = vmatprep.subr.bf16.mxu0 %v8306_v4  ;;  %2493 = vmatprep.subr.bf16.mxu1 %v8309_v5  ;;  %v8386_v4 = vld [vmem:[#allocation2 + $0x3b0] ss:$112 sps:$4 sm:$0xff]   ;;  %v8389_v5 = vld [vmem:[#allocation2 + $0x3b8] ss:$112 sps:$4 sm:$0xff]  }
  0xc1   :  { %2451 = vmatpush1.bf16.msra.mxu0 %v8304_v6  ;;  %2494 = vmatpush1.bf16.msra.mxu1 %v8307_v7  ;;  %v8394_v6 = vld [vmem:[#allocation2 + $0x494] ss:$112 sps:$4 sm:$0xff]   ;;  %v8397_v7 = vld [vmem:[#allocation2 + $0x49c] ss:$112 sps:$4 sm:$0xff]  }
  0xc2   :  { %2452 = vmatprep.subr.bf16.mxu0 %v8312_v8  ;;  %2495 = vmatprep.subr.bf16.mxu1 %v8315_v9  ;;  %v8392_v8 = vld [vmem:[#allocation2 + $0x490] ss:$112 sps:$4 sm:$0xff]   ;;  %v8395_v9 = vld [vmem:[#allocation2 + $0x498] ss:$112 sps:$4 sm:$0xff]  }
  0xc5   :  { %2453 = vmatpush1.bf16.msra.mxu0 %v8310_v10  ;;  %2496 = vmatpush1.bf16.msra.mxu1 %v8313_v11  ;;  %v8400_v10 = vld [vmem:[#allocation2 + $0x574] ss:$112 sps:$4 sm:$0xff]   ;;  %v8403_v11 = vld [vmem:[#allocation2 + $0x57c] ss:$112 sps:$4 sm:$0xff]  }
  0xc6   :  { %2454 = vmatprep.subr.bf16.mxu0 %v8318_v12  ;;  %2497 = vmatprep.subr.bf16.mxu1 %v8321_v13  ;;  %v8398_v12 = vld [vmem:[#allocation2 + $0x570] ss:$112 sps:$4 sm:$0xff]   ;;  %v8401_v13 = vld [vmem:[#allocation2 + $0x578] ss:$112 sps:$4 sm:$0xff]  }
  0xc9   :  { %2455 = vmatpush1.bf16.msra.mxu0 %v8316_v14  ;;  %2498 = vmatpush1.bf16.msra.mxu1 %v8319_v15  ;;  %v8406_v14 = vld [vmem:[#allocation2 + $0x654] ss:$112 sps:$4 sm:$0xff]   ;;  %v8409_v15 = vld [vmem:[#allocation2 + $0x65c] ss:$112 sps:$4 sm:$0xff]  }
  0xca   :  { %2456 = vmatprep.subr.bf16.mxu0 %v8324_v16  ;;  %2499 = vmatprep.subr.bf16.mxu1 %v8327_v17  ;;  %v8404_v16 = vld [vmem:[#allocation2 + $0x650] ss:$112 sps:$4 sm:$0xff]   ;;  %v8407_v17 = vld [vmem:[#allocation2 + $0x658] ss:$112 sps:$4 sm:$0xff]  }
  0xcd   :  { %2457 = vmatpush1.bf16.msra.mxu0 %v8322_v18  ;;  %2500 = vmatpush1.bf16.msra.mxu1 %v8325_v19  ;;  %v8412_v18 = vld [vmem:[#allocation2 + $0x734] ss:$112 sps:$4 sm:$0xff]   ;;  %v8415_v19 = vld [vmem:[#allocation2 + $0x73c] ss:$112 sps:$4 sm:$0xff]  }
  0xce   :  { %2458 = vmatprep.subr.bf16.mxu0 %v8330_v20  ;;  %2501 = vmatprep.subr.bf16.mxu1 %v8333_v21  ;;  %v8410_v20 = vld [vmem:[#allocation2 + $0x730] ss:$112 sps:$4 sm:$0xff]   ;;  %v8413_v21 = vld [vmem:[#allocation2 + $0x738] ss:$112 sps:$4 sm:$0xff]  }
  0xd1   :  { %2459 = vmatpush1.bf16.msra.mxu0 %v8328_v22  ;;  %2502 = vmatpush1.bf16.msra.mxu1 %v8331_v23  ;;  %v8418_v22 = vld [vmem:[#allocation2 + $0x814] ss:$112 sps:$4 sm:$0xff]   ;;  %v8421_v23 = vld [vmem:[#allocation2 + $0x81c] ss:$112 sps:$4 sm:$0xff]  }
  0xd2   :  { %2460 = vmatprep.subr.bf16.mxu0 %v8336_v24  ;;  %2503 = vmatprep.subr.bf16.mxu1 %v8339_v25  ;;  %v8416_v24 = vld [vmem:[#allocation2 + $0x810] ss:$112 sps:$4 sm:$0xff]   ;;  %v8419_v25 = vld [vmem:[#allocation2 + $0x818] ss:$112 sps:$4 sm:$0xff]  }
  0xd5   :  { %2461 = vmatpush1.bf16.msra.mxu0 %v8334_v26  ;;  %2504 = vmatpush1.bf16.msra.mxu1 %v8337_v27  ;;  %v8424_v26 = vld [vmem:[#allocation2 + $0x8f4] ss:$112 sps:$4 sm:$0xff]   ;;  %v8427_v27 = vld [vmem:[#allocation2 + $0x8fc] ss:$112 sps:$4 sm:$0xff]  }
  0xd6   :  { %2462 = vmatprep.subr.bf16.mxu0 %v8342_v28  ;;  %2505 = vmatprep.subr.bf16.mxu1 %v8345_v29  ;;  %v8422_v28 = vld [vmem:[#allocation2 + $0x8f0] ss:$112 sps:$4 sm:$0xff]   ;;  %v8425_v29 = vld [vmem:[#allocation2 + $0x8f8] ss:$112 sps:$4 sm:$0xff]  }
  0xd9   :  { %2463 = vmatpush1.bf16.msra.mxu0 %v8340_v30  ;;  %2506 = vmatpush1.bf16.msra.mxu1 %v8343_v31  ;;  %v8430_v30 = vld [vmem:[#allocation2 + $0x9d4] ss:$112 sps:$4 sm:$0xff]   ;;  %v8433_v31 = vld [vmem:[#allocation2 + $0x9dc] ss:$112 sps:$4 sm:$0xff]  }
  0xda   :  { %2464 = vmatprep.subr.bf16.mxu0 %v8348_v32  ;;  %2507 = vmatprep.subr.bf16.mxu1 %v8351_v33  ;;  %v425_v32 = vld [vmem:[#allocation2 + $0xab0] sm:$0x33]  ;;  %v426_v33 = vld [vmem:[#allocation2 + $0xab8] sm:$0x33] }
  0xdb   :  { %v7391_v38 = vcombine.low %v425_v32, %v425_v32  ;;  %v7393_v39 = vcombine.low %v426_v33, %v426_v33 }
  0xdd   :  { %2465 = vmatpush1.bf16.msra.mxu0 %v8346_v34  ;;  %2508 = vmatpush1.bf16.msra.mxu1 %v8349_v35  ;;  %v8428_v34 = vld [vmem:[#allocation2 + $0x9d0] ss:$112 sps:$4 sm:$0xff]   ;;  %v8431_v35 = vld [vmem:[#allocation2 + $0x9d8] ss:$112 sps:$4 sm:$0xff]  }
  0xde   :  { %2466 = vmatprep.subr.bf16.mxu0 %v8354_v36  ;;  %2509 = vmatprep.subr.bf16.mxu1 %v8357_v37  ;;  %v7392_v36 = vcombine.high %v425_v32, %v425_v32  ;;  %v7394_v37 = vcombine.high %v426_v33, %v426_v33  ;;  %v8504_v32 = vld [vmem:[#allocation2 + $0x9e0] ss:$112 sps:$4 sm:$0xff]   ;;  %v8507_v33 = vld [vmem:[#allocation2 + $0x9e8] ss:$112 sps:$4 sm:$0xff]  }
  0xe1   :  { %2467 = vmatpush1.bf16.msra.mxu0 %v8352_v41  ;;  %2510 = vmatpush1.bf16.msra.mxu1 %v8355_v42  ;;  %v8440_v41 = vld [vmem:[#allocation2 + $0x44] ss:$112 sps:$4 sm:$0xff]   ;;  %v2225_v42 = vsel %vm2187_vm1, %v7391_v38, 0  ;;  %v8514_v38 = vld [vmem:[#allocation2 + $0x50] ss:$112 sps:$4 sm:$0xff]  }
  0xe2   :  { %7415 = vmatprep.subr.msk.bf16.mxu0 %vm2187_vm1, %v7388_v43  ;;  %7417 = vmatprep.subr.msk.bf16.mxu1 %vm2187_vm1, %v7390_v44  ;;  %v2231_v43 = vsel %vm2187_vm1, %v7393_v39, 0  ;;  %v8443_v44 = vld [vmem:[#allocation2 + $0x4c] ss:$112 sps:$4 sm:$0xff]   ;;  %v8517_v39 = vld [vmem:[#allocation2 + $0x58] ss:$112 sps:$4 sm:$0xff]  }
  0xe5   :  { %2469 = vmatpush1.bf16.msra.mxu0 %v2213_v48  ;;  %2512 = vmatpush1.bf16.msra.mxu1 %v2219_v49  ;;  %v8449_v48 = vld [vmem:[#allocation2 + $0x12c] ss:$112 sps:$4 sm:$0xff]   ;;  %v8444_v49 = vld [vmem:[#allocation2 + $0x120] ss:$112 sps:$4 sm:$0xff]  }
  0xe6   :  { %2530 = vmatprep.subr.bf16.mxu0 %v8364_v47  ;;  %2573 = vmatprep.subr.bf16.mxu1 %v8367_v50  ;;  %v8446_v47 = vld [vmem:[#allocation2 + $0x124] ss:$112 sps:$4 sm:$0xff]   ;;  %v8447_v50 = vld [vmem:[#allocation2 + $0x128] ss:$112 sps:$4 sm:$0xff]  }
  0xe8   :  { %2477 = vmatmul.mubr.bf16.vlgmr.msra.gmra.mrb[8].mxu0 %v8930_v63  ;;  %2520 = vmatmul.mubr.bf16.vlgmr.msra.gmra.mrb[8].mxu1 %v8930_v63 }
  0xe9   :  { %2531 = vmatpush1.bf16.msra.mxu0 %v8362_v51  ;;  %2574 = vmatpush1.bf16.msra.mxu1 %v8365_v52  ;;  %v8452_v51 = vld [vmem:[#allocation2 + $0x204] ss:$112 sps:$4 sm:$0xff]   ;;  %v8455_v52 = vld [vmem:[#allocation2 + $0x20c] ss:$112 sps:$4 sm:$0xff]  }
  0xea   :  { %2532 = vmatprep.subr.bf16.mxu0 %v8370_v53  ;;  %2575 = vmatprep.subr.bf16.mxu1 %v8373_v54  ;;  %v8450_v53 = vld [vmem:[#allocation2 + $0x200] ss:$112 sps:$4 sm:$0xff]   ;;  %v8453_v54 = vld [vmem:[#allocation2 + $0x208] ss:$112 sps:$4 sm:$0xff]  }
  0xeb   :  { %7420 = vmatprep.mubr.msk.bf16.mxu0 %vm2183_vm0, %v8914_v40  ;;  %7422 = vmatprep.mubr.msk.bf16.mxu1 %vm2183_vm0, %v8914_v40 }
  0xed   :  { %2533 = vmatpush1.bf16.msra.mxu0 %v8368_v55  ;;  %2576 = vmatpush1.bf16.msra.mxu1 %v8371_v56  ;;  %v8458_v55 = vld [vmem:[#allocation2 + $0x2e4] ss:$112 sps:$4 sm:$0xff]   ;;  %v8461_v56 = vld [vmem:[#allocation2 + $0x2ec] ss:$112 sps:$4 sm:$0xff]  }
  0xee   :  { %2534 = vmatprep.subr.bf16.mxu0 %v8376_v57  ;;  %2577 = vmatprep.subr.bf16.mxu1 %v8379_v58  ;;  %v8456_v57 = vld [vmem:[#allocation2 + $0x2e0] ss:$112 sps:$4 sm:$0xff]   ;;  %v8459_v58 = vld [vmem:[#allocation2 + $0x2e8] ss:$112 sps:$4 sm:$0xff]  }
  0xf1   :  { %2535 = vmatpush1.bf16.msra.mxu0 %v8374_v59  ;;  %2578 = vmatpush1.bf16.msra.mxu1 %v8377_v60  ;;  %v8464_v59 = vld [vmem:[#allocation2 + $0x3c4] ss:$112 sps:$4 sm:$0xff]   ;;  %v8467_v60 = vld [vmem:[#allocation2 + $0x3cc] ss:$112 sps:$4 sm:$0xff]  }
  0xf2   :  { %2536 = vmatprep.subr.bf16.mxu0 %v8382_v61  ;;  %2579 = vmatprep.subr.bf16.mxu1 %v8385_v62  ;;  %v8462_v61 = vld [vmem:[#allocation2 + $0x3c0] ss:$112 sps:$4 sm:$0xff]   ;;  %v8465_v62 = vld [vmem:[#allocation2 + $0x3c8] ss:$112 sps:$4 sm:$0xff]  }
  0xf5   :  { %2537 = vmatpush1.bf16.msra.mxu0 %v8380_v0  ;;  %2580 = vmatpush1.bf16.msra.mxu1 %v8383_v1  ;;  %v8470_v0 = vld [vmem:[#allocation2 + $0x4a4] ss:$112 sps:$4 sm:$0xff]   ;;  %v8473_v1 = vld [vmem:[#allocation2 + $0x4ac] ss:$112 sps:$4 sm:$0xff]  }
  0xf6   :  { %2538 = vmatprep.subr.bf16.mxu0 %v8388_v2  ;;  %2581 = vmatprep.subr.bf16.mxu1 %v8391_v3  ;;  %v8468_v2 = vld [vmem:[#allocation2 + $0x4a0] ss:$112 sps:$4 sm:$0xff]   ;;  %v8471_v3 = vld [vmem:[#allocation2 + $0x4a8] ss:$112 sps:$4 sm:$0xff]  }
  0xf9   :  { %2539 = vmatpush1.bf16.msra.mxu0 %v8386_v4  ;;  %2582 = vmatpush1.bf16.msra.mxu1 %v8389_v5  ;;  %v8476_v4 = vld [vmem:[#allocation2 + $0x584] ss:$112 sps:$4 sm:$0xff]   ;;  %v8479_v5 = vld [vmem:[#allocation2 + $0x58c] ss:$112 sps:$4 sm:$0xff]  }
  0xfa   :  { %2540 = vmatprep.subr.bf16.mxu0 %v8394_v6  ;;  %2583 = vmatprep.subr.bf16.mxu1 %v8397_v7  ;;  %v427_v6 = vld [vmem:[#allocation2 + $0xac0] sm:$0x33]  ;;  %v428_v7 = vld [vmem:[#allocation2 + $0xac8] sm:$0x33] }
  0xfd   :  { %2541 = vmatpush1.bf16.msra.mxu0 %v8392_v8  ;;  %2584 = vmatpush1.bf16.msra.mxu1 %v8395_v9  ;;  %v8474_v8 = vld [vmem:[#allocation2 + $0x580] ss:$112 sps:$4 sm:$0xff]   ;;  %v8477_v9 = vld [vmem:[#allocation2 + $0x588] ss:$112 sps:$4 sm:$0xff]  }
  0xfe   :  { %2542 = vmatprep.subr.bf16.mxu0 %v8400_v10  ;;  %2585 = vmatprep.subr.bf16.mxu1 %v8403_v11  ;;  %v8482_v10 = vld [vmem:[#allocation2 + $0x664] ss:$112 sps:$4 sm:$0xff]   ;;  %v8485_v11 = vld [vmem:[#allocation2 + $0x66c] ss:$112 sps:$4 sm:$0xff]  }
 0x101   :  { %2543 = vmatpush1.bf16.msra.mxu0 %v8398_v12  ;;  %2586 = vmatpush1.bf16.msra.mxu1 %v8401_v13  ;;  %v7395_v12 = vcombine.low %v427_v6, %v427_v6  ;;  %v7397_v13 = vcombine.low %v428_v7, %v428_v7 }
 0x102   :  { %2544 = vmatprep.subr.bf16.mxu0 %v8406_v14  ;;  %2587 = vmatprep.subr.bf16.mxu1 %v8409_v15  ;;  %v8480_v14 = vld [vmem:[#allocation2 + $0x660] ss:$112 sps:$4 sm:$0xff]   ;;  %v8483_v15 = vld [vmem:[#allocation2 + $0x668] ss:$112 sps:$4 sm:$0xff]  }
 0x105   :  { %2545 = vmatpush1.bf16.msra.mxu0 %v8404_v16  ;;  %2588 = vmatpush1.bf16.msra.mxu1 %v8407_v17  ;;  %v8488_v16 = vld [vmem:[#allocation2 + $0x744] ss:$112 sps:$4 sm:$0xff]   ;;  %v8491_v17 = vld [vmem:[#allocation2 + $0x74c] ss:$112 sps:$4 sm:$0xff]  }
 0x106   :  { %2546 = vmatprep.subr.bf16.mxu0 %v8412_v18  ;;  %2589 = vmatprep.subr.bf16.mxu1 %v8415_v19  ;;  %v2237_v18 = vsel %vm2187_vm1, %v7395_v12, 0  ;;  %v2243_v19 = vsel %vm2187_vm1, %v7397_v13, 0  ;;  %v8556_v12 = vld [vmem:[#allocation2 + $0x670] ss:$112 sps:$4 sm:$0xff]   ;;  %v8559_v13 = vld [vmem:[#allocation2 + $0x678] ss:$112 sps:$4 sm:$0xff]  }
 0x109   :  { %2547 = vmatpush1.bf16.msra.mxu0 %v8410_v20  ;;  %2590 = vmatpush1.bf16.msra.mxu1 %v8413_v21  ;;  %v8486_v20 = vld [vmem:[#allocation2 + $0x740] ss:$112 sps:$4 sm:$0xff]   ;;  %v8489_v21 = vld [vmem:[#allocation2 + $0x748] ss:$112 sps:$4 sm:$0xff]  }
 0x10a   :  { %2548 = vmatprep.subr.bf16.mxu0 %v8418_v22  ;;  %2591 = vmatprep.subr.bf16.mxu1 %v8421_v23  ;;  %v8494_v22 = vld [vmem:[#allocation2 + $0x824] ss:$112 sps:$4 sm:$0xff]   ;;  %v8497_v23 = vld [vmem:[#allocation2 + $0x82c] ss:$112 sps:$4 sm:$0xff]  }
 0x10d   :  { %2549 = vmatpush1.bf16.msra.mxu0 %v8416_v24  ;;  %2592 = vmatpush1.bf16.msra.mxu1 %v8419_v25  ;;  %v8492_v24 = vld [vmem:[#allocation2 + $0x820] ss:$112 sps:$4 sm:$0xff]   ;;  %v8495_v25 = vld [vmem:[#allocation2 + $0x828] ss:$112 sps:$4 sm:$0xff]  }
 0x10e   :  { %2550 = vmatprep.subr.bf16.mxu0 %v8424_v26  ;;  %2593 = vmatprep.subr.bf16.mxu1 %v8427_v27  ;;  %v8500_v26 = vld [vmem:[#allocation2 + $0x904] ss:$112 sps:$4 sm:$0xff]   ;;  %v8503_v27 = vld [vmem:[#allocation2 + $0x90c] ss:$112 sps:$4 sm:$0xff]  }
 0x111   :  { %2551 = vmatpush1.bf16.msra.mxu0 %v8422_v28  ;;  %2594 = vmatpush1.bf16.msra.mxu1 %v8425_v29  ;;  %v8498_v28 = vld [vmem:[#allocation2 + $0x900] ss:$112 sps:$4 sm:$0xff]   ;;  %v8501_v29 = vld [vmem:[#allocation2 + $0x908] ss:$112 sps:$4 sm:$0xff]  }
 0x112   :  { %2552 = vmatprep.subr.bf16.mxu0 %v8430_v30  ;;  %2595 = vmatprep.subr.bf16.mxu1 %v8433_v31  ;;  %v8506_v30 = vld [vmem:[#allocation2 + $0x9e4] ss:$112 sps:$4 sm:$0xff]   ;;  %v8509_v31 = vld [vmem:[#allocation2 + $0x9ec] ss:$112 sps:$4 sm:$0xff]  }
 0x115   :  { %2553 = vmatpush1.bf16.msra.mxu0 %v8428_v34  ;;  %2596 = vmatpush1.bf16.msra.mxu1 %v8431_v35  ;;  %v7396_v34 = vcombine.high %v427_v6, %v427_v6  ;;  %v7398_v35 = vcombine.high %v428_v7, %v428_v7  ;;  %v8552_v6 = vld [vmem:[#allocation2 + $0x594] ss:$112 sps:$4 sm:$0xff]   ;;  %v8555_v7 = vld [vmem:[#allocation2 + $0x59c] ss:$112 sps:$4 sm:$0xff]  }
 0x116   :  { %7419 = vmatprep.subr.msk.bf16.mxu0 %vm2187_vm1, %v7392_v36  ;;  %7421 = vmatprep.subr.msk.bf16.mxu1 %vm2187_vm1, %v7394_v37  ;;  %v8516_v36 = vld [vmem:[#allocation2 + $0x54] ss:$112 sps:$4 sm:$0xff]   ;;  %v8519_v37 = vld [vmem:[#allocation2 + $0x5c] ss:$112 sps:$4 sm:$0xff]  }
 0x119   :  { %2555 = vmatpush1.bf16.msra.mxu0 %v2225_v42  ;;  %2598 = vmatpush1.bf16.msra.mxu1 %v2231_v43  ;;  %v8525_v42 = vld [vmem:[#allocation2 + $0x13c] ss:$112 sps:$4 sm:$0xff]   ;;  %v8520_v43 = vld [vmem:[#allocation2 + $0x130] ss:$112 sps:$4 sm:$0xff]  }
 0x11a   :  { %2616 = vmatprep.subr.bf16.mxu0 %v8440_v41  ;;  %2659 = vmatprep.subr.bf16.mxu1 %v8443_v44  ;;  %v8522_v41 = vld [vmem:[#allocation2 + $0x134] ss:$112 sps:$4 sm:$0xff]   ;;  %v8523_v44 = vld [vmem:[#allocation2 + $0x138] ss:$112 sps:$4 sm:$0xff]  }
 0x11c   :  { %2563 = vmatmul.mubr.bf16.vlgmr.msra.gmra.mrb[12].mxu0 %v8930_v63  ;;  %2606 = vmatmul.mubr.bf16.vlgmr.msra.gmra.mrb[12].mxu1 %v8930_v63 }
 0x11d   :  { %2617 = vmatpush1.bf16.msra.mxu0 %v8438_v45  ;;  %2660 = vmatpush1.bf16.msra.mxu1 %v8441_v46  ;;  %v8528_v45 = vld [vmem:[#allocation2 + $0x214] ss:$112 sps:$4 sm:$0xff]   ;;  %v8531_v46 = vld [vmem:[#allocation2 + $0x21c] ss:$112 sps:$4 sm:$0xff]  }
 0x11e   :  { %2618 = vmatprep.subr.bf16.mxu0 %v8446_v47  ;;  %2661 = vmatprep.subr.bf16.mxu1 %v8449_v48 }
 0x11f   :  { %7424 = vmatprep.mubr.msk.bf16.mxu0 %vm2183_vm0, %v8914_v40  ;;  %7426 = vmatprep.mubr.msk.bf16.mxu1 %vm2183_vm0, %v8914_v40 }
 0x121   :  { %2619 = vmatpush1.bf16.msra.mxu0 %v8444_v49  ;;  %2662 = vmatpush1.bf16.msra.mxu1 %v8447_v50 }
 0x122   :  { %2620 = vmatprep.subr.bf16.mxu0 %v8452_v51  ;;  %2663 = vmatprep.subr.bf16.mxu1 %v8455_v52 }
 0x125   :  { %2621 = vmatpush1.bf16.msra.mxu0 %v8450_v53  ;;  %2664 = vmatpush1.bf16.msra.mxu1 %v8453_v54  ;;  %v8526_v53 = vld [vmem:[#allocation2 + $0x210] ss:$112 sps:$4 sm:$0xff]   ;;  %v8529_v54 = vld [vmem:[#allocation2 + $0x218] ss:$112 sps:$4 sm:$0xff]  }
 0x126   :  { %2622 = vmatprep.subr.bf16.mxu0 %v8458_v55  ;;  %2665 = vmatprep.subr.bf16.mxu1 %v8461_v56 }
 0x129   :  { %2623 = vmatpush1.bf16.msra.mxu0 %v8456_v57  ;;  %2666 = vmatpush1.bf16.msra.mxu1 %v8459_v58  ;;  %v8534_v57 = vld [vmem:[#allocation2 + $0x2f4] ss:$112 sps:$4 sm:$0xff]   ;;  %v8537_v58 = vld [vmem:[#allocation2 + $0x2fc] ss:$112 sps:$4 sm:$0xff]  }
 0x12a   :  { %2624 = vmatprep.subr.bf16.mxu0 %v8464_v59  ;;  %2667 = vmatprep.subr.bf16.mxu1 %v8467_v60  ;;  %v8532_v59 = vld [vmem:[#allocation2 + $0x2f0] ss:$112 sps:$4 sm:$0xff]   ;;  %v8535_v60 = vld [vmem:[#allocation2 + $0x2f8] ss:$112 sps:$4 sm:$0xff]  }
 0x12d   :  { %2625 = vmatpush1.bf16.msra.mxu0 %v8462_v61  ;;  %2668 = vmatpush1.bf16.msra.mxu1 %v8465_v62  ;;  %v8540_v61 = vld [vmem:[#allocation2 + $0x3d4] ss:$112 sps:$4 sm:$0xff]   ;;  %v8543_v62 = vld [vmem:[#allocation2 + $0x3dc] ss:$112 sps:$4 sm:$0xff]  }
 0x12e   :  { %2626 = vmatprep.subr.bf16.mxu0 %v8470_v0  ;;  %2669 = vmatprep.subr.bf16.mxu1 %v8473_v1  ;;  %v8538_v0 = vld [vmem:[#allocation2 + $0x3d0] ss:$112 sps:$4 sm:$0xff]   ;;  %v8541_v1 = vld [vmem:[#allocation2 + $0x3d8] ss:$112 sps:$4 sm:$0xff]  }
 0x131   :  { %2627 = vmatpush1.bf16.msra.mxu0 %v8468_v2  ;;  %2670 = vmatpush1.bf16.msra.mxu1 %v8471_v3  ;;  %v8546_v2 = vld [vmem:[#allocation2 + $0x4b4] ss:$112 sps:$4 sm:$0xff]   ;;  %v8549_v3 = vld [vmem:[#allocation2 + $0x4bc] ss:$112 sps:$4 sm:$0xff]  }
 0x132   :  { %2628 = vmatprep.subr.bf16.mxu0 %v8476_v4  ;;  %2671 = vmatprep.subr.bf16.mxu1 %v8479_v5  ;;  %v8544_v4 = vld [vmem:[#allocation2 + $0x4b0] ss:$112 sps:$4 sm:$0xff]   ;;  %v8547_v5 = vld [vmem:[#allocation2 + $0x4b8] ss:$112 sps:$4 sm:$0xff]  }
 0x135   :  { %2629 = vmatpush1.bf16.msra.mxu0 %v8474_v8  ;;  %2672 = vmatpush1.bf16.msra.mxu1 %v8477_v9  ;;  %v8550_v8 = vld [vmem:[#allocation2 + $0x590] ss:$112 sps:$4 sm:$0xff]   ;;  %v8553_v9 = vld [vmem:[#allocation2 + $0x598] ss:$112 sps:$4 sm:$0xff]  }
 0x136   :  { %2630 = vmatprep.subr.bf16.mxu0 %v8482_v10  ;;  %2673 = vmatprep.subr.bf16.mxu1 %v8485_v11  ;;  %v8558_v10 = vld [vmem:[#allocation2 + $0x674] ss:$112 sps:$4 sm:$0xff]   ;;  %v8561_v11 = vld [vmem:[#allocation2 + $0x67c] ss:$112 sps:$4 sm:$0xff]  }
 0x139   :  { %2631 = vmatpush1.bf16.msra.mxu0 %v8480_v14  ;;  %2674 = vmatpush1.bf16.msra.mxu1 %v8483_v15  ;;  %v8564_v14 = vld [vmem:[#allocation2 + $0x754] ss:$112 sps:$4 sm:$0xff]   ;;  %v8567_v15 = vld [vmem:[#allocation2 + $0x75c] ss:$112 sps:$4 sm:$0xff]  }
 0x13a   :  { %2632 = vmatprep.subr.bf16.mxu0 %v8488_v16  ;;  %2675 = vmatprep.subr.bf16.mxu1 %v8491_v17  ;;  %v8562_v16 = vld [vmem:[#allocation2 + $0x750] ss:$112 sps:$4 sm:$0xff]   ;;  %v8565_v17 = vld [vmem:[#allocation2 + $0x758] ss:$112 sps:$4 sm:$0xff]  }
 0x13d   :  { %2633 = vmatpush1.bf16.msra.mxu0 %v8486_v20  ;;  %2676 = vmatpush1.bf16.msra.mxu1 %v8489_v21  ;;  %v8568_v20 = vld [vmem:[#allocation2 + $0x830] ss:$112 sps:$4 sm:$0xff]   ;;  %v8571_v21 = vld [vmem:[#allocation2 + $0x838] ss:$112 sps:$4 sm:$0xff]  }
 0x13e   :  { %2634 = vmatprep.subr.bf16.mxu0 %v8494_v22  ;;  %2677 = vmatprep.subr.bf16.mxu1 %v8497_v23  ;;  %v8576_v22 = vld [vmem:[#allocation2 + $0x914] ss:$112 sps:$4 sm:$0xff]   ;;  %v8579_v23 = vld [vmem:[#allocation2 + $0x91c] ss:$112 sps:$4 sm:$0xff]  }
 0x141   :  { %2635 = vmatpush1.bf16.msra.mxu0 %v8492_v24  ;;  %2678 = vmatpush1.bf16.msra.mxu1 %v8495_v25  ;;  %v8574_v24 = vld [vmem:[#allocation2 + $0x910] ss:$112 sps:$4 sm:$0xff]   ;;  %v8577_v25 = vld [vmem:[#allocation2 + $0x918] ss:$112 sps:$4 sm:$0xff]  }
 0x142   :  { %2636 = vmatprep.subr.bf16.mxu0 %v8500_v26  ;;  %2679 = vmatprep.subr.bf16.mxu1 %v8503_v27  ;;  %v8582_v26 = vld [vmem:[#allocation2 + $0x9f4] ss:$112 sps:$4 sm:$0xff]   ;;  %v8585_v27 = vld [vmem:[#allocation2 + $0x9fc] ss:$112 sps:$4 sm:$0xff]  }
 0x145   :  { %2637 = vmatpush1.bf16.msra.mxu0 %v8498_v28  ;;  %2680 = vmatpush1.bf16.msra.mxu1 %v8501_v29  ;;  %v429_v28 = vld [vmem:[#allocation2 + $0xad0] sm:$0x33]  ;;  %v430_v29 = vld [vmem:[#allocation2 + $0xad8] sm:$0x33] }
 0x146   :  { %2638 = vmatprep.subr.bf16.mxu0 %v8506_v30  ;;  %2681 = vmatprep.subr.bf16.mxu1 %v8509_v31  ;;  %v8580_v30 = vld [vmem:[#allocation2 + $0x9f0] ss:$112 sps:$4 sm:$0xff]   ;;  %v8583_v31 = vld [vmem:[#allocation2 + $0x9f8] ss:$112 sps:$4 sm:$0xff]  }
 0x149   :  { %2639 = vmatpush1.bf16.msra.mxu0 %v8504_v32  ;;  %2682 = vmatpush1.bf16.msra.mxu1 %v8507_v33  ;;  %v7400_v32 = vcombine.high %v429_v28, %v429_v28  ;;  %v7402_v33 = vcombine.high %v430_v29, %v430_v29 }
 0x14a   :  { %7423 = vmatprep.subr.msk.bf16.mxu0 %vm2187_vm1, %v7396_v34  ;;  %7425 = vmatprep.subr.msk.bf16.mxu1 %vm2187_vm1, %v7398_v35  ;;  %v7399_v34 = vcombine.low %v429_v28, %v429_v28  ;;  %v7401_v35 = vcombine.low %v430_v29, %v430_v29  ;;  %v8641_v28 = vld [vmem:[#allocation2 + $0x768] ss:$112 sps:$4 sm:$0xff]   ;;  %v8646_v29 = vld [vmem:[#allocation2 + $0x844] ss:$112 sps:$4 sm:$0xff]  }
 0x14d   :  { %2641 = vmatpush1.bf16.msra.mxu0 %v2237_v18  ;;  %2684 = vmatpush1.bf16.msra.mxu1 %v2243_v19  ;;  %v8570_v18 = vld [vmem:[#allocation2 + $0x834] ss:$112 sps:$4 sm:$0xff]   ;;  %v8573_v19 = vld [vmem:[#allocation2 + $0x83c] ss:$112 sps:$4 sm:$0xff]  }
 0x14e   :  { %2702 = vmatprep.subr.bf16.mxu0 %v8516_v36  ;;  %2745 = vmatprep.subr.bf16.mxu1 %v8519_v37  ;;  %v2249_v36 = vsel %vm2187_vm1, %v7399_v34, 0  ;;  %v2255_v37 = vsel %vm2187_vm1, %v7401_v35, 0  ;;  %v8655_v34 = vld [vmem:[#allocation2 + $0x92c] ss:$112 sps:$4 sm:$0xff]   ;;  %v8650_v35 = vld [vmem:[#allocation2 + $0x920] ss:$112 sps:$4 sm:$0xff]  }
 0x150   :  { %2649 = vmatmul.mubr.bf16.vlgmr.msra.gmra.mrb[16].mxu0 %v8930_v63  ;;  %2692 = vmatmul.mubr.bf16.vlgmr.msra.gmra.mrb[16].mxu1 %v8930_v63 }
 0x151   :  { %2703 = vmatpush1.bf16.msra.mxu0 %v8514_v38  ;;  %2746 = vmatpush1.bf16.msra.mxu1 %v8517_v39  ;;  %v8592_v38 = vld [vmem:[#allocation2 + $0x64] ss:$112 sps:$4 sm:$0xff]   ;;  %v8595_v39 = vld [vmem:[#allocation2 + $0x6c] ss:$112 sps:$4 sm:$0xff]  }
 0x152   :  { %2704 = vmatprep.subr.bf16.mxu0 %v8522_v41  ;;  %2747 = vmatprep.subr.bf16.mxu1 %v8525_v42  ;;  %v8590_v41 = vld [vmem:[#allocation2 + $0x60] ss:$112 sps:$4 sm:$0xff]   ;;  %v8593_v42 = vld [vmem:[#allocation2 + $0x68] ss:$112 sps:$4 sm:$0xff]  }
 0x153   :  { %v8974_v47 = vpop.f32.mrb[0].mxu0  ;;  %v8976_v48 = vpop.f32.mrb[0].mxu1  ;;  %7428 = vmatprep.mubr.msk.bf16.mxu0 %vm2183_vm0, %v8914_v40  ;;  %7430 = vmatprep.mubr.msk.bf16.mxu1 %vm2183_vm0, %v8914_v40 }
 0x154   :  { %v8982_v49 = vpop.f32.mrb[1].mxu0  ;;  %v8984_v50 = vpop.f32.mrb[1].mxu1 }
 0x155   :  { %v8986_v51 = vpop.f32.mrb[2].mxu0  ;;  %v8988_v52 = vpop.f32.mrb[2].mxu1  ;;  %2705 = vmatpush1.bf16.msra.mxu0 %v8520_v43  ;;  %2748 = vmatpush1.bf16.msra.mxu1 %v8523_v44  ;;  %v8598_v43 = vld [vmem:[#allocation2 + $0x144] ss:$112 sps:$4 sm:$0xff]   ;;  %v8601_v44 = vld [vmem:[#allocation2 + $0x14c] ss:$112 sps:$4 sm:$0xff]  }
 0x156   :  { %v8990_v55 = vpop.f32.mrb[3].mxu0  ;;  %v8992_v56 = vpop.f32.mrb[3].mxu1  ;;  %2706 = vmatprep.subr.bf16.mxu0 %v8528_v45  ;;  %2749 = vmatprep.subr.bf16.mxu1 %v8531_v46  ;;  %v8596_v45 = vld [vmem:[#allocation2 + $0x140] ss:$112 sps:$4 sm:$0xff]   ;;  %v8599_v46 = vld [vmem:[#allocation2 + $0x148] ss:$112 sps:$4 sm:$0xff]  }
 0x159   :  { %2707 = vmatpush1.bf16.msra.mxu0 %v8526_v53  ;;  %2750 = vmatpush1.bf16.msra.mxu1 %v8529_v54  ;;  %v8604_v53 = vld [vmem:[#allocation2 + $0x224] ss:$112 sps:$4 sm:$0xff]   ;;  %v8607_v54 = vld [vmem:[#allocation2 + $0x22c] ss:$112 sps:$4 sm:$0xff]  }
 0x15a   :  { %2708 = vmatprep.subr.bf16.mxu0 %v8534_v57  ;;  %2751 = vmatprep.subr.bf16.mxu1 %v8537_v58 }
 0x15d   :  { %2709 = vmatpush1.bf16.msra.mxu0 %v8532_v59  ;;  %2752 = vmatpush1.bf16.msra.mxu1 %v8535_v60 }
 0x15e   :  { %2710 = vmatprep.subr.bf16.mxu0 %v8540_v61  ;;  %2753 = vmatprep.subr.bf16.mxu1 %v8543_v62 }
 0x161   :  { %2711 = vmatpush1.bf16.msra.mxu0 %v8538_v0  ;;  %2754 = vmatpush1.bf16.msra.mxu1 %v8541_v1  ;;  %v8602_v1 = vld [vmem:[#allocation2 + $0x220] ss:$112 sps:$4 sm:$0xff]  }
 0x162   :  { %2712 = vmatprep.subr.bf16.mxu0 %v8546_v2  ;;  %2755 = vmatprep.subr.bf16.mxu1 %v8549_v3  ;;  %v8605_v2 = vld [vmem:[#allocation2 + $0x228] ss:$112 sps:$4 sm:$0xff]  }
 0x165   :  { %2713 = vmatpush1.bf16.msra.mxu0 %v8544_v4  ;;  %2756 = vmatpush1.bf16.msra.mxu1 %v8547_v5  ;;  %v8613_v5 = vld [vmem:[#allocation2 + $0x30c] ss:$112 sps:$4 sm:$0xff]  }
 0x166   :  { %2714 = vmatprep.subr.bf16.mxu0 %v8552_v6  ;;  %2757 = vmatprep.subr.bf16.mxu1 %v8555_v7  ;;  %v8608_v7 = vld [vmem:[#allocation2 + $0x300] ss:$112 sps:$4 sm:$0xff]  }
 0x169   :  { %2715 = vmatpush1.bf16.msra.mxu0 %v8550_v8  ;;  %2758 = vmatpush1.bf16.msra.mxu1 %v8553_v9  ;;  %v8611_v8 = vld [vmem:[#allocation2 + $0x308] ss:$112 sps:$4 sm:$0xff]   ;;  %v8616_v9 = vld [vmem:[#allocation2 + $0x3e4] ss:$112 sps:$4 sm:$0xff]  }
 0x16a   :  { %2716 = vmatprep.subr.bf16.mxu0 %v8558_v10  ;;  %2759 = vmatprep.subr.bf16.mxu1 %v8561_v11  ;;  %v8619_v10 = vld [vmem:[#allocation2 + $0x3ec] ss:$112 sps:$4 sm:$0xff]   ;;  %v8614_v11 = vld [vmem:[#allocation2 + $0x3e0] ss:$112 sps:$4 sm:$0xff]  }
 0x16d   :  { %2717 = vmatpush1.bf16.msra.mxu0 %v8556_v12  ;;  %2760 = vmatpush1.bf16.msra.mxu1 %v8559_v13  ;;  %v8617_v12 = vld [vmem:[#allocation2 + $0x3e8] ss:$112 sps:$4 sm:$0xff]   ;;  %v8622_v13 = vld [vmem:[#allocation2 + $0x4c4] ss:$112 sps:$4 sm:$0xff]  }
 0x16e   :  { %2718 = vmatprep.subr.bf16.mxu0 %v8564_v14  ;;  %2761 = vmatprep.subr.bf16.mxu1 %v8567_v15  ;;  %v8625_v14 = vld [vmem:[#allocation2 + $0x4cc] ss:$112 sps:$4 sm:$0xff]   ;;  %v8620_v15 = vld [vmem:[#allocation2 + $0x4c0] ss:$112 sps:$4 sm:$0xff]  }
 0x171   :  { %2719 = vmatpush1.bf16.msra.mxu0 %v8562_v16  ;;  %2762 = vmatpush1.bf16.msra.mxu1 %v8565_v17  ;;  %v8623_v16 = vld [vmem:[#allocation2 + $0x4c8] ss:$112 sps:$4 sm:$0xff]   ;;  %v8628_v17 = vld [vmem:[#allocation2 + $0x5a4] ss:$112 sps:$4 sm:$0xff]  }
 0x172   :  { %2720 = vmatprep.subr.bf16.mxu0 %v8570_v18  ;;  %2763 = vmatprep.subr.bf16.mxu1 %v8573_v19  ;;  %v8631_v18 = vld [vmem:[#allocation2 + $0x5ac] ss:$112 sps:$4 sm:$0xff]   ;;  %v8626_v19 = vld [vmem:[#allocation2 + $0x5a0] ss:$112 sps:$4 sm:$0xff]  }
 0x175   :  { %2721 = vmatpush1.bf16.msra.mxu0 %v8568_v20  ;;  %2764 = vmatpush1.bf16.msra.mxu1 %v8571_v21  ;;  %v8629_v20 = vld [vmem:[#allocation2 + $0x5a8] ss:$112 sps:$4 sm:$0xff]   ;;  %v8634_v21 = vld [vmem:[#allocation2 + $0x684] ss:$112 sps:$4 sm:$0xff]  }
 0x176   :  { %2722 = vmatprep.subr.bf16.mxu0 %v8576_v22  ;;  %2765 = vmatprep.subr.bf16.mxu1 %v8579_v23  ;;  %v8637_v22 = vld [vmem:[#allocation2 + $0x68c] ss:$112 sps:$4 sm:$0xff]   ;;  %v8632_v23 = vld [vmem:[#allocation2 + $0x680] ss:$112 sps:$4 sm:$0xff]  }
 0x179   :  { %2723 = vmatpush1.bf16.msra.mxu0 %v8574_v24  ;;  %2766 = vmatpush1.bf16.msra.mxu1 %v8577_v25  ;;  %v8635_v24 = vld [vmem:[#allocation2 + $0x688] ss:$112 sps:$4 sm:$0xff]   ;;  %v8640_v25 = vld [vmem:[#allocation2 + $0x764] ss:$112 sps:$4 sm:$0xff]  }
 0x17a   :  { %2724 = vmatprep.subr.bf16.mxu0 %v8582_v26  ;;  %2767 = vmatprep.subr.bf16.mxu1 %v8585_v27  ;;  %v8643_v26 = vld [vmem:[#allocation2 + $0x76c] ss:$112 sps:$4 sm:$0xff]   ;;  %v8638_v27 = vld [vmem:[#allocation2 + $0x760] ss:$112 sps:$4 sm:$0xff]  }
 0x17d   :  { %2725 = vmatpush1.bf16.msra.mxu0 %v8580_v30  ;;  %2768 = vmatpush1.bf16.msra.mxu1 %v8583_v31  ;;  %v8649_v30 = vld [vmem:[#allocation2 + $0x84c] ss:$112 sps:$4 sm:$0xff]   ;;  %v8644_v31 = vld [vmem:[#allocation2 + $0x840] ss:$112 sps:$4 sm:$0xff]  }
 0x17e   :  { %7427 = vmatprep.subr.msk.bf16.mxu0 %vm2187_vm1, %v7400_v32  ;;  %7429 = vmatprep.subr.msk.bf16.mxu1 %vm2187_vm1, %v7402_v33  ;;  %v8647_v32 = vld [vmem:[#allocation2 + $0x848] ss:$112 sps:$4 sm:$0xff]   ;;  %v8652_v33 = vld [vmem:[#allocation2 + $0x924] ss:$112 sps:$4 sm:$0xff]  }
 0x181   :  { %2727 = vmatpush1.bf16.msra.mxu0 %v2249_v36  ;;  %2770 = vmatpush1.bf16.msra.mxu1 %v2255_v37  ;;  %v8653_v36 = vld [vmem:[#allocation2 + $0x928] ss:$112 sps:$4 sm:$0xff]   ;;  %v8658_v37 = vld [vmem:[#allocation2 + $0xa04] ss:$112 sps:$4 sm:$0xff]  }
 0x182   :  { %2788 = vmatprep.subr.bf16.mxu0 %v8592_v38  ;;  %2831 = vmatprep.subr.bf16.mxu1 %v8595_v39  ;;  %v8661_v38 = vld [vmem:[#allocation2 + $0xa0c] ss:$112 sps:$4 sm:$0xff]   ;;  %v431_v39 = vld [vmem:[#allocation2 + $0xae0] sm:$0x33] }
 0x184   :  { %2735 = vmatmul.mubr.bf16.vlgmr.msra.gmra.mrb[20].mxu0 %v8930_v63  ;;  %2778 = vmatmul.mubr.bf16.vlgmr.msra.gmra.mrb[20].mxu1 %v8930_v63 }
 0x185   :  { %2789 = vmatpush1.bf16.msra.mxu0 %v8590_v41  ;;  %2832 = vmatpush1.bf16.msra.mxu1 %v8593_v42  ;;  %v432_v41 = vld [vmem:[#allocation2 + $0xae8] sm:$0x33]  ;;  %v8656_v42 = vld [vmem:[#allocation2 + $0xa00] ss:$112 sps:$4 sm:$0xff]  }
 0x186   :  { %2790 = vmatprep.subr.bf16.mxu0 %v8598_v43  ;;  %2833 = vmatprep.subr.bf16.mxu1 %v8601_v44  ;;  %v8659_v43 = vld [vmem:[#allocation2 + $0xa08] ss:$112 sps:$4 sm:$0xff]   ;;  %v7404_v44 = vcombine.high %v431_v39, %v431_v39 }
 0x187   :  { %v9000_v57 = vpop.f32.mrb[4].mxu0  ;;  %v9002_v58 = vpop.f32.mrb[4].mxu1  ;;  %7432 = vmatprep.mubr.msk.bf16.mxu0 %vm2183_vm0, %v8914_v40  ;;  %7434 = vmatprep.mubr.msk.bf16.mxu1 %vm2183_vm0, %v8914_v40  ;;  %v8610_v40 = vld [vmem:[#allocation2 + $0x304] ss:$112 sps:$4 sm:$0xff]  }
 0x188   :  { %v9008_v59 = vpop.f32.mrb[5].mxu0  ;;  %v9010_v60 = vpop.f32.mrb[5].mxu1 }
 0x189   :  { %v9014_v62 = vpop.f32.mrb[6].mxu0  ;;  %v9016_v0 = vpop.f32.mrb[6].mxu1  ;;  %2791 = vmatpush1.bf16.msra.mxu0 %v8596_v45  ;;  %2834 = vmatpush1.bf16.msra.mxu1 %v8599_v46  ;;  %v7406_v45 = vcombine.high %v432_v41, %v432_v41  ;;  %v7403_v46 = vcombine.low %v431_v39, %v431_v39 }
 0x18a   :  { %9373 = vst [vmem:[#allocation12_spill] sm:$0xff] %v9014_v62  ;;  %9374 = vst [vmem:[#allocation13_spill] sm:$0xff] %v9016_v0  ;;  %v9018_v3 = vpop.f32.mrb[7].mxu0  ;;  %v9020_v4 = vpop.f32.mrb[7].mxu1  ;;  %2792 = vmatprep.subr.bf16.mxu0 %v8604_v53  ;;  %2835 = vmatprep.subr.bf16.mxu1 %v8607_v54  ;;  %v7405_v53 = vcombine.low %v432_v41, %v432_v41  ;;  %v2988_v54 = vld [vmem:[#allocation4] sm:$0xff] }
 0x18d   :  { %2793 = vmatpush1.bf16.msra.mxu0 %v8602_v1  ;;  %2836 = vmatpush1.bf16.msra.mxu1 %v8605_v2  ;;  %v2992_v1 = vld [vmem:[#allocation4 + $0x20] sm:$0xff]  ;;  %v2989_v2 = vld [vmem:[#allocation4 + $0x8] sm:$0xff] }
 0x18e   :  { %2794 = vmatprep.subr.bf16.mxu0 %v8610_v40  ;;  %2837 = vmatprep.subr.bf16.mxu1 %v8613_v5  ;;  %v2993_v40 = vld [vmem:[#allocation4 + $0x28] sm:$0xff]  ;;  %v2261_v5 = vsel %vm2187_vm1, %v7403_v46, 0 }
 0x191   :  { %2795 = vmatpush1.bf16.msra.mxu0 %v8608_v7  ;;  %2838 = vmatpush1.bf16.msra.mxu1 %v8611_v8  ;;  %v2267_v7 = vsel %vm2187_vm1, %v7405_v53, 0  ;;  %v7436_v8 = vcombine.high %v2988_v54, %v2992_v1 }
 0x192   :  { %2796 = vmatprep.subr.bf16.mxu0 %v8616_v9  ;;  %2839 = vmatprep.subr.bf16.mxu1 %v8619_v10  ;;  %v7438_v9 = vcombine.high %v2989_v2, %v2993_v40  ;;  %v2996_v10 = vld [vmem:[#allocation4 + $0x40] sm:$0xff] }
 0x195   :  { %2797 = vmatpush1.bf16.msra.mxu0 %v8614_v11  ;;  %2840 = vmatpush1.bf16.msra.mxu1 %v8617_v12  ;;  %v3000_v11 = vld [vmem:[#allocation4 + $0x60] sm:$0xff]  ;;  %v2997_v12 = vld [vmem:[#allocation4 + $0x48] sm:$0xff] }
 0x196   :  { %2798 = vmatprep.subr.bf16.mxu0 %v8622_v13  ;;  %2841 = vmatprep.subr.bf16.mxu1 %v8625_v14  ;;  %v3001_v13 = vld [vmem:[#allocation4 + $0x68] sm:$0xff]  ;;  %v7435_v14 = vcombine.low %v2988_v54, %v2992_v1  ;;  %v3020_v54 = vld [vmem:[#allocation4 + $0x100] sm:$0xff] }
 0x199   :  { %2799 = vmatpush1.bf16.msra.mxu0 %v8620_v15  ;;  %2842 = vmatpush1.bf16.msra.mxu1 %v8623_v16  ;;  %v7437_v15 = vcombine.low %v2989_v2, %v2993_v40  ;;  %v7444_v16 = vcombine.high %v2996_v10, %v3000_v11  ;;  %v3024_v40 = vld [vmem:[#allocation4 + $0x120] sm:$0xff] }
 0x19a   :  { %2800 = vmatprep.subr.bf16.mxu0 %v8628_v17  ;;  %2843 = vmatprep.subr.bf16.mxu1 %v8631_v18  ;;  %v7446_v17 = vcombine.high %v2997_v12, %v3001_v13  ;;  %v3004_v18 = vld [vmem:[#allocation4 + $0x80] sm:$0xff] }
 0x19d   :  { %2801 = vmatpush1.bf16.msra.mxu0 %v8626_v19  ;;  %2844 = vmatpush1.bf16.msra.mxu1 %v8629_v20  ;;  %v3008_v19 = vld [vmem:[#allocation4 + $0xa0] sm:$0xff]  ;;  %v3005_v20 = vld [vmem:[#allocation4 + $0x88] sm:$0xff] }
 0x19e   :  { %2802 = vmatprep.subr.bf16.mxu0 %v8634_v21  ;;  %2845 = vmatprep.subr.bf16.mxu1 %v8637_v22  ;;  %v3009_v21 = vld [vmem:[#allocation4 + $0xa8] sm:$0xff]  ;;  %v7443_v22 = vcombine.low %v2996_v10, %v3000_v11  ;;  %v7468_v10 = vcombine.high %v3020_v54, %v3024_v40 }
 0x1a1   :  { %2803 = vmatpush1.bf16.msra.mxu0 %v8632_v23  ;;  %2846 = vmatpush1.bf16.msra.mxu1 %v8635_v24  ;;  %v7445_v23 = vcombine.low %v2997_v12, %v3001_v13  ;;  %v7452_v24 = vcombine.high %v3004_v18, %v3008_v19  ;;  %v3028_v12 = vld [vmem:[#allocation4 + $0x140] sm:$0xff] }
 0x1a2   :  { %2804 = vmatprep.subr.bf16.mxu0 %v8640_v25  ;;  %2847 = vmatprep.subr.bf16.mxu1 %v8643_v26  ;;  %v7454_v25 = vcombine.high %v3005_v20, %v3009_v21  ;;  %v3012_v26 = vld [vmem:[#allocation4 + $0xc0] sm:$0xff] }
 0x1a3   :  { %v3032_v13 = vld [vmem:[#allocation4 + $0x160] sm:$0xff] }
 0x1a5   :  { %2805 = vmatpush1.bf16.msra.mxu0 %v8638_v27  ;;  %2848 = vmatpush1.bf16.msra.mxu1 %v8641_v28  ;;  %v3016_v27 = vld [vmem:[#allocation4 + $0xe0] sm:$0xff] }
 0x1a6   :  { %2806 = vmatprep.subr.bf16.mxu0 %v8646_v29  ;;  %2849 = vmatprep.subr.bf16.mxu1 %v8649_v30  ;;  %v3013_v30 = vld [vmem:[#allocation4 + $0xc8] sm:$0xff] }
 0x1a9   :  { %2807 = vmatpush1.bf16.msra.mxu0 %v8644_v31  ;;  %2850 = vmatpush1.bf16.msra.mxu1 %v8647_v32  ;;  %v3017_v31 = vld [vmem:[#allocation4 + $0xe8] sm:$0xff] }
 0x1aa   :  { %2808 = vmatprep.subr.bf16.mxu0 %v8652_v33  ;;  %2851 = vmatprep.subr.bf16.mxu1 %v8655_v34  ;;  %v7462_v53 = vcombine.high %v3013_v30, %v3017_v31 }
 0x1ad   :  { %2809 = vmatpush1.bf16.msra.mxu0 %v8650_v35  ;;  %2852 = vmatpush1.bf16.msra.mxu1 %v8653_v36  ;;  %v7451_v35 = vcombine.low %v3004_v18, %v3008_v19  ;;  %v7453_v36 = vcombine.low %v3005_v20, %v3009_v21  ;;  %v7476_v18 = vcombine.high %v3028_v12, %v3032_v13  ;;  %v3036_v20 = vld [vmem:[#allocation4 + $0x180] sm:$0xff] }
 0x1ae   :  { %2810 = vmatprep.subr.bf16.mxu0 %v8658_v37  ;;  %2853 = vmatprep.subr.bf16.mxu1 %v8661_v38  ;;  %v3040_v21 = vld [vmem:[#allocation4 + $0x1a0] sm:$0xff] }
 0x1b1   :  { %2811 = vmatpush1.bf16.msra.mxu0 %v8656_v42  ;;  %2854 = vmatpush1.bf16.msra.mxu1 %v8659_v43  ;;  %v7460_v42 = vcombine.high %v3012_v26, %v3016_v27 }
 0x1b2   :  { %7431 = vmatprep.subr.msk.bf16.mxu0 %vm2187_vm1, %v7404_v44  ;;  %7433 = vmatprep.subr.msk.bf16.mxu1 %vm2187_vm1, %v7406_v45 }
 0x1b5   :  { %2813 = vmatpush1.bf16.msra.mxu0 %v2261_v5  ;;  %2856 = vmatpush1.bf16.msra.mxu1 %v2267_v7  ;;  %v3021_v5 = vld [vmem:[#allocation4 + $0x108] sm:$0xff] }
 0x1b6   :  { %5676 = vmatprep.subr.bf16.mxu0 %v7436_v8  ;;  %5848 = vmatprep.subr.bf16.mxu1 %v7438_v9  ;;  %v3025_v7 = vld [vmem:[#allocation4 + $0x128] sm:$0xff]  ;;  %v7459_v8 = vcombine.low %v3012_v26, %v3016_v27  ;;  %v7461_v9 = vcombine.low %v3013_v30, %v3017_v31  ;;  %v7484_v26 = vcombine.high %v3036_v20, %v3040_v21  ;;  %v3044_v30 = vld [vmem:[#allocation4 + $0x1c0] sm:$0xff] }
 0x1b7   :  { %v7470_v11 = vcombine.high %v3021_v5, %v3025_v7  ;;  %v3048_v31 = vld [vmem:[#allocation4 + $0x1e0] sm:$0xff] }
 0x1b8   :  { %2821 = vmatmul.mubr.bf16.vlgmr.msra.gmra.mrb[24].mxu0 %v8930_v63  ;;  %2864 = vmatmul.mubr.bf16.vlgmr.msra.gmra.mrb[24].mxu1 %v8930_v63 }
 0x1b9   :  { %5677 = vmatpush1.bf16.msra.mxu0 %v7435_v14  ;;  %5849 = vmatpush1.bf16.msra.mxu1 %v7437_v15  ;;  %v3029_v14 = vld [vmem:[#allocation4 + $0x148] sm:$0xff] }
 0x1ba   :  { %5678 = vmatprep.subr.bf16.mxu0 %v7444_v16  ;;  %5850 = vmatprep.subr.bf16.mxu1 %v7446_v17  ;;  %v3033_v15 = vld [vmem:[#allocation4 + $0x168] sm:$0xff]  ;;  %v7467_v16 = vcombine.low %v3020_v54, %v3024_v40  ;;  %v7469_v17 = vcombine.low %v3021_v5, %v3025_v7  ;;  %v7492_v54 = vcombine.high %v3044_v30, %v3048_v31  ;;  %v3052_v5 = vld [vmem:[#allocation4 + $0x200] sm:$0xff] }
 0x1bb   :  { %v9030_v28 = vpop.f32.mrb[8].mxu0  ;;  %v9032_v29 = vpop.f32.mrb[8].mxu1  ;;  %v7478_v19 = vcombine.high %v3029_v14, %v3033_v15  ;;  %v3056_v7 = vld [vmem:[#allocation4 + $0x220] sm:$0xff] }
 0x1bc   :  { %v2875_v32 = vmax.f32 %v8982_v49, %v9030_v28  ;;  %v9038_v33 = vpop.f32.mrb[9].mxu0  ;;  %v9040_v34 = vpop.f32.mrb[9].mxu1  ;;  %v9381_v28 = vmax.f32 %v8986_v51, %v9020_v4 }
 0x1bd   :  { %v9046_v39 = vpop.f32.mrb[10].mxu0  ;;  %v9048_v41 = vpop.f32.mrb[10].mxu1  ;;  %5679 = vmatpush1.bf16.msra.mxu0 %v7443_v22  ;;  %5851 = vmatpush1.bf16.msra.mxu1 %v7445_v23  ;;  %v3037_v22 = vld [vmem:[#allocation4 + $0x188] sm:$0xff] }
 0x1be   :  { %v9054_v45 = vpop.f32.mrb[11].mxu0  ;;  %v9056_v46 = vpop.f32.mrb[11].mxu1  ;;  %5680 = vmatprep.subr.bf16.mxu0 %v7452_v24  ;;  %5852 = vmatprep.subr.bf16.mxu1 %v7454_v25  ;;  %v3041_v23 = vld [vmem:[#allocation4 + $0x1a8] sm:$0xff]  ;;  %v7475_v24 = vcombine.low %v3028_v12, %v3032_v13  ;;  %v7477_v25 = vcombine.low %v3029_v14, %v3033_v15  ;;  %v7500_v12 = vcombine.high %v3052_v5, %v3056_v7  ;;  %v3060_v14 = vld [vmem:[#allocation4 + $0x240] sm:$0xff] }
 0x1bf   :  { %9375 = vst [vmem:[#allocation14_spill] sm:$0xff] %v9056_v46  ;;  %v7486_v27 = vcombine.high %v3037_v22, %v3041_v23  ;;  %v3064_v15 = vld [vmem:[#allocation4 + $0x260] sm:$0xff]  ;;  %v9380_v62 = vmax.f32 %v8990_v55, %v9046_v39  ;;  %v3129_v39 = vld [vmem:[#allocation4 + $0x468] sm:$0xff] }
 0x1c0   :  { %v3128_v55 = vld [vmem:[#allocation4 + $0x460] sm:$0xff] }
 0x1c1   :  { %5681 = vmatpush1.bf16.msra.mxu0 %v7451_v35  ;;  %5853 = vmatpush1.bf16.msra.mxu1 %v7453_v36  ;;  %v3045_v35 = vld [vmem:[#allocation4 + $0x1c8] sm:$0xff] }
 0x1c2   :  { %5682 = vmatprep.subr.bf16.mxu0 %v7460_v42  ;;  %5854 = vmatprep.subr.bf16.mxu1 %v7462_v53  ;;  %v3049_v36 = vld [vmem:[#allocation4 + $0x1e8] sm:$0xff]  ;;  %v7483_v42 = vcombine.low %v3036_v20, %v3040_v21  ;;  %v7485_v53 = vcombine.low %v3037_v22, %v3041_v23  ;;  %v7508_v21 = vcombine.high %v3060_v14, %v3064_v15  ;;  %v3068_v23 = vld [vmem:[#allocation4 + $0x280] sm:$0xff] }
 0x1c3   :  { %v7494_v40 = vcombine.high %v3045_v35, %v3049_v36 }
 0x1c5   :  { %5683 = vmatpush1.bf16.msra.mxu0 %v7459_v8  ;;  %5855 = vmatpush1.bf16.msra.mxu1 %v7461_v9  ;;  %v3053_v8 = vld [vmem:[#allocation4 + $0x208] sm:$0xff] }
 0x1c6   :  { %5684 = vmatprep.subr.bf16.mxu0 %v7468_v10  ;;  %5856 = vmatprep.subr.bf16.mxu1 %v7470_v11  ;;  %v3057_v9 = vld [vmem:[#allocation4 + $0x228] sm:$0xff]  ;;  %v7491_v10 = vcombine.low %v3044_v30, %v3048_v31  ;;  %v7493_v11 = vcombine.low %v3045_v35, %v3049_v36  ;;  %v9064_v30 = vld [vmem:[#allocation7] sm:$0xff]  ;;  %v7507_v31 = vcombine.low %v3060_v14, %v3064_v15 }
 0x1c7   :  { %v7502_v13 = vcombine.high %v3053_v8, %v3057_v9  ;;  %v7501_v20 = vcombine.low %v3053_v8, %v3057_v9  ;;  %v3088_v14 = vld [vmem:[#allocation4 + $0x320] sm:$0xff]  ;;  %v3085_v15 = vld [vmem:[#allocation4 + $0x308] sm:$0xff] }
 0x1c9   :  { %5685 = vmatpush1.bf16.msra.mxu0 %v7467_v16  ;;  %5857 = vmatpush1.bf16.msra.mxu1 %v7469_v17  ;;  %v3061_v16 = vld [vmem:[#allocation4 + $0x248] sm:$0xff] }
 0x1ca   :  { %5686 = vmatprep.subr.bf16.mxu0 %v7476_v18  ;;  %5858 = vmatprep.subr.bf16.mxu1 %v7478_v19  ;;  %v3065_v17 = vld [vmem:[#allocation4 + $0x268] sm:$0xff]  ;;  %v2917_v18 = vlaneseq  ;;  %v7499_v19 = vcombine.low %v3052_v5, %v3056_v7 }
 0x1cb   :  { %v7510_v22 = vcombine.high %v3061_v16, %v3065_v17  ;;  %v7509_v35 = vcombine.low %v3061_v16, %v3065_v17  ;;  %v3077_v5 = vld [vmem:[#allocation4 + $0x2c8] sm:$0xff] }
 0x1cc   :  { %v3081_v7 = vld [vmem:[#allocation4 + $0x2e8] sm:$0xff] }
 0x1cd   :  { %5687 = vmatpush1.bf16.msra.mxu0 %v7475_v24  ;;  %5859 = vmatpush1.bf16.msra.mxu1 %v7477_v25  ;;  %v9062_v24 = vshrl.u32 %v2917_v18, 7  ;;  %v3072_v25 = vld [vmem:[#allocation4 + $0x2a0] sm:$0xff]  ;;  %v3089_v16 = vld [vmem:[#allocation4 + $0x328] sm:$0xff]  ;;  %v7525_v18 = vcombine.low %v3077_v5, %v3081_v7 }
 0x1ce   :  { %5688 = vmatprep.subr.bf16.mxu0 %v7484_v26  ;;  %5860 = vmatprep.subr.bf16.mxu1 %v7486_v27  ;;  %v3069_v26 = vld [vmem:[#allocation4 + $0x288] sm:$0xff]  ;;  %v7515_v9 = vcombine.low %v3068_v23, %v3072_v25 }
 0x1cf   :  { %v3073_v27 = vld [vmem:[#allocation4 + $0x2a8] sm:$0xff]  ;;  %v2927_v36 = vsub.s32 2, %v9062_v24 }
 0x1d1   :  { %5689 = vmatpush1.bf16.msra.mxu0 %v7483_v42  ;;  %5861 = vmatpush1.bf16.msra.mxu1 %v7485_v53  ;;  %v7516_v42 = vcombine.high %v3068_v23, %v3072_v25  ;;  %v7518_v53 = vcombine.high %v3069_v26, %v3073_v27  ;;  %v9068_v8 = vrot.slane %v9064_v30, %v2927_v36  ;;  %v3092_v25 = vld [vmem:[#allocation4 + $0x340] sm:$0xff] }
 0x1d2   :  { %5690 = vmatprep.subr.bf16.mxu0 %v7492_v54  ;;  %5862 = vmatprep.subr.bf16.mxu1 %v7494_v40  ;;  %v3076_v54 = vld [vmem:[#allocation4 + $0x2c0] sm:$0xff]  ;;  %v7534_v23 = vcombine.high %v3085_v15, %v3089_v16 }
 0x1d3   :  { %v3080_v40 = vld [vmem:[#allocation4 + $0x2e0] sm:$0xff] }
 0x1d4   :  { %v7523_v17 = vcombine.low %v3076_v54, %v3080_v40 }
 0x1d5   :  { %5691 = vmatpush1.bf16.msra.mxu0 %v7491_v10  ;;  %5863 = vmatpush1.bf16.msra.mxu1 %v7493_v11  ;;  %v7517_v10 = vcombine.low %v3069_v26, %v3073_v27  ;;  %v7524_v11 = vcombine.high %v3076_v54, %v3080_v40  ;;  %v9076_v26 = vld [vmem:[#allocation4 + $0x428] sm:$0xff]  ;;  %v3096_v27 = vld [vmem:[#allocation4 + $0x360] sm:$0xff]  ;;  %v7533_v54 = vcombine.low %v3085_v15, %v3089_v16 }
 0x1d6   :  { %5692 = vmatprep.subr.bf16.mxu0 %v7500_v12  ;;  %5864 = vmatprep.subr.bf16.mxu1 %v7502_v13  ;;  %v7526_v12 = vcombine.high %v3077_v5, %v3081_v7  ;;  %v3084_v13 = vld [vmem:[#allocation4 + $0x300] sm:$0xff]  ;;  %v7540_v40 = vcombine.high %v3092_v25, %v3096_v27 }
 0x1d7   :  { %v3100_v7 = vld [vmem:[#allocation4 + $0x380] sm:$0xff] }
 0x1d9   :  { %5693 = vmatpush1.bf16.msra.mxu0 %v7499_v19  ;;  %5865 = vmatpush1.bf16.msra.mxu1 %v7501_v20  ;;  %v9070_v19 = vld [vmem:[#allocation4 + $0x400] sm:$0xff] }
 0x1da   :  { %5694 = vmatprep.subr.bf16.mxu0 %v7508_v21  ;;  %5866 = vmatprep.subr.bf16.mxu1 %v7510_v22  ;;  %v9072_v20 = vld [vmem:[#allocation4 + $0x420] sm:$0xff]  ;;  %v9074_v21 = vld [vmem:[#allocation4 + $0x408] sm:$0xff]  ;;  %v7532_v22 = vcombine.high %v3084_v13, %v3088_v14 }
 0x1dd   :  { %5695 = vmatpush1.bf16.msra.mxu0 %v7507_v31  ;;  %5867 = vmatpush1.bf16.msra.mxu1 %v7509_v35  ;;  %v3093_v31 = vld [vmem:[#allocation4 + $0x348] sm:$0xff] }
 0x1de   :  { %5696 = vmatprep.subr.bf16.mxu0 %v7516_v42  ;;  %5868 = vmatprep.subr.bf16.mxu1 %v7518_v53  ;;  %v3097_v35 = vld [vmem:[#allocation4 + $0x368] sm:$0xff]  ;;  %v7531_v53 = vcombine.low %v3084_v13, %v3088_v14 }
 0x1df   :  { %v7542_v5 = vcombine.high %v3093_v31, %v3097_v35  ;;  %v7541_v2 = vcombine.low %v3093_v31, %v3097_v35  ;;  %v3109_v13 = vld [vmem:[#allocation4 + $0x3c8] sm:$0xff] }
 0x1e0   :  { %v3113_v14 = vld [vmem:[#allocation4 + $0x3e8] sm:$0xff] }
 0x1e1   :  { %5697 = vmatpush1.bf16.msra.mxu0 %v7515_v9  ;;  %5869 = vmatpush1.bf16.msra.mxu1 %v7517_v10  ;;  %v3104_v9 = vld [vmem:[#allocation4 + $0x3a0] sm:$0xff]  ;;  %v3101_v10 = vld [vmem:[#allocation4 + $0x388] sm:$0xff] }
 0x1e2   :  { %5698 = vmatprep.subr.bf16.mxu0 %v7524_v11  ;;  %5870 = vmatprep.subr.bf16.mxu1 %v7526_v12  ;;  %v3105_v11 = vld [vmem:[#allocation4 + $0x3a8] sm:$0xff]  ;;  %v7539_v12 = vcombine.low %v3092_v25, %v3096_v27  ;;  %v7548_v44 = vcombine.high %v3100_v7, %v3104_v9  ;;  %v7547_v15 = vcombine.low %v3100_v7, %v3104_v9 }
 0x1e3   :  { %v7550_v38 = vcombine.high %v3101_v10, %v3105_v11  ;;  %v7549_v16 = vcombine.low %v3101_v10, %v3105_v11  ;;  %v7564_v10 = vcombine.high %v9070_v19, %v9072_v20  ;;  %v7566_v11 = vcombine.high %v9074_v21, %v9076_v26 }
 0x1e5   :  { %5699 = vmatpush1.bf16.msra.mxu0 %v7523_v17  ;;  %5871 = vmatpush1.bf16.msra.mxu1 %v7525_v18  ;;  %v3108_v17 = vld [vmem:[#allocation4 + $0x3c0] sm:$0xff] }
 0x1e6   :  { %5700 = vmatprep.subr.bf16.mxu0 %v7532_v22  ;;  %5872 = vmatprep.subr.bf16.mxu1 %v7534_v23  ;;  %v3112_v18 = vld [vmem:[#allocation4 + $0x3e0] sm:$0xff]  ;;  %v7558_v23 = vcombine.high %v3109_v13, %v3113_v14 }
 0x1e7   :  { %v7556_v22 = vcombine.high %v3108_v17, %v3112_v18 }
 0x1e9   :  { %5701 = vmatpush1.bf16.msra.mxu0 %v7531_v53  ;;  %5873 = vmatpush1.bf16.msra.mxu1 %v7533_v54 }
 0x1ea   :  { %5702 = vmatprep.subr.bf16.mxu0 %v7540_v40  ;;  %5874 = vmatprep.subr.bf16.mxu1 %v7542_v5  ;;  %v9370_v5 = vsub.s32 0, %v9062_v24 }
 0x1ec   :  { %v2920_v6 = vrot.slane %v9064_v30, %v9370_v5 }
 0x1ed   :  { %5703 = vmatpush1.bf16.msra.mxu0 %v7539_v12  ;;  %5875 = vmatpush1.bf16.msra.mxu1 %v7541_v2 }
 0x1ee   :  { %5704 = vmatprep.subr.bf16.mxu0 %v7548_v44  ;;  %5876 = vmatprep.subr.bf16.mxu1 %v7550_v38  ;;  %v7555_v38 = vcombine.low %v3108_v17, %v3112_v18  ;;  %v7557_v44 = vcombine.low %v3109_v13, %v3113_v14  ;;  %v2939_v17 = vsub.s32 5, %v9062_v24  ;;  %v2935_v18 = vsub.s32 4, %v9062_v24 }
 0x1ef   :  { %v9082_v53 = vpop.f32.mrb[12].mxu0  ;;  %v2607_v25 = vpop.f32.mrb[12].mxu1  ;;  %v2943_v13 = vsub.s32 6, %v9062_v24 }
 0x1f0   :  { %v9086_v31 = vpop.f32.mrb[13].mxu0  ;;  %v2609_v35 = vpop.f32.mrb[13].mxu1  ;;  %v9106_v14 = vrot.slane %v9064_v30, %v2939_v17 }
 0x1f1   :  { %v9090_v40 = vpop.f32.mrb[14].mxu0  ;;  %v2611_v2 = vpop.f32.mrb[14].mxu1  ;;  %5705 = vmatpush1.bf16.msra.mxu0 %v7547_v15  ;;  %5877 = vmatpush1.bf16.msra.mxu1 %v7549_v16  ;;  %v9109_v15 = vrot.slane %v9064_v30, %v2935_v18  ;;  %v9112_v16 = vrot.slane %v9064_v30, %v2943_v13  ;;  %v9368_v18 = vsub.s32 1, %v9062_v24 }
 0x1f2   :  { %v9094_v7 = vpop.f32.mrb[15].mxu0  ;;  %v2613_v9 = vpop.f32.mrb[15].mxu1  ;;  %5706 = vmatprep.subr.bf16.mxu0 %v7556_v22  ;;  %5878 = vmatprep.subr.bf16.mxu1 %v7558_v23 }
 0x1f3   :  { %9376 = vst [vmem:[#allocation15_spill] sm:$0xff] %v9094_v7  ;;  %9377 = vst [vmem:[#allocation16_spill] sm:$0xff] %v9112_v16  ;;  %v2924_v63 = vrot.slane %v9064_v30, %v9368_v18  ;;  %v9378_v18 = vmax.f32 %v8974_v47, %v9010_v60  ;;  %v9382_v47 = vmax.f32 %v8988_v52, %v9054_v45  ;;  %v3132_v45 = vld [vmem:[#allocation4 + $0x480] sm:$0xff] }
 0x1f5   :  { %5707 = vmatpush1.bf16.msra.mxu0 %v7555_v38  ;;  %5879 = vmatpush1.bf16.msra.mxu1 %v7557_v44 }
 0x1f6   :  { %5719 = vmatprep.subr.bf16.mxu0 %v7564_v10  ;;  %5891 = vmatprep.subr.bf16.mxu1 %v7566_v11 }
 0x223   :  { %v2650_v22 = vpop.f32.mrb[16].mxu0  ;;  %v9114_v23 = vpop.f32.mrb[16].mxu1 }
 0x224   :  { %v9116_v38 = vpop.f32.mrb[17].mxu0  ;;  %v9118_v44 = vpop.f32.mrb[17].mxu1 }
 0x225   :  { %v2654_v10 = vpop.f32.mrb[18].mxu0  ;;  %v9120_v11 = vpop.f32.mrb[18].mxu1 }
 0x226   :  { %v9122_v12 = vpop.f32.mrb[19].mxu0  ;;  %v9124_v17 = vpop.f32.mrb[19].mxu1 }
 0x257   :  { %v9128_v13 = vpop.f32.mrb[20].mxu0  ;;  %v2779_v54 = vpop.f32.mrb[20].mxu1 }
 0x258   :  { %v2889_v27 = vmax.f32 %v2609_v35, %v2779_v54  ;;  %v2738_v42 = vpop.f32.mrb[21].mxu0  ;;  %v2781_v36 = vpop.f32.mrb[21].mxu1 }
 0x259   :  { %v2888_v1 = vmax.f32 %v2607_v25, %v2738_v42  ;;  %v2890_v43 = vmax.f32 %v2650_v22, %v2781_v36  ;;  %v9136_v37 = vpop.f32.mrb[22].mxu0  ;;  %v2783_v61 = vpop.f32.mrb[22].mxu1  ;;  %v9379_v42 = vmax.f32 %v8976_v48, %v9038_v33 }
 0x25a   :  { %v2903_v7 = vmax.f32 %v2875_v32, %v2889_v27  ;;  %v2896_v35 = vmax.f32 %v2613_v9, %v2783_v61  ;;  %v2742_v54 = vpop.f32.mrb[23].mxu0  ;;  %v2785_v0 = vpop.f32.mrb[23].mxu1 }
 0x25b   :  { %v2902_v46 = vmax.f32 %v9378_v18, %v2888_v1  ;;  %v2904_v25 = vmax.f32 %v9379_v42, %v2890_v43  ;;  %v2895_v5 = vmax.f32 %v2611_v2, %v2742_v54  ;;  %v2897_v36 = vmax.f32 %v2654_v10, %v2785_v0  ;;  %v3124_v43 = vld [vmem:[#allocation4 + $0x440] sm:$0xff] }
 0x25c   :  { %v2953_v22 = vadd.f32 %v2924_v63, %v2903_v7  ;;  %v2910_v16 = vmax.f32 %v9380_v62, %v2896_v35  ;;  %v3125_v62 = vld [vmem:[#allocation4 + $0x448] sm:$0xff]  ;;  %v9383_v10 = vcombine.low %v9070_v19, %v9072_v20  ;;  %v9384_v18 = vcombine.low %v9074_v21, %v9076_v26  ;;  %v3148_v21 = vld [vmem:[#allocation4 + $0x500] sm:$0xff] }
 0x25d   :  { %v2952_v49 = vadd.f32 %v2920_v6, %v2902_v46  ;;  %v2954_v61 = vadd.f32 %v9068_v8, %v2904_v25  ;;  %v2909_v32 = vmax.f32 %v9381_v28, %v2895_v5  ;;  %v2911_v60 = vmax.f32 %v9382_v47, %v2897_v36  ;;  %v3133_v5 = vld [vmem:[#allocation4 + $0x488] sm:$0xff]  ;;  %v3140_v36 = vld [vmem:[#allocation4 + $0x4c0] sm:$0xff] }
 0x25e   :  { %v2960_v48 = vadd.f32 %v2924_v63, %v2910_v16  ;;  %v2967_v1 = vmax.f32 %v2953_v22, 0.0  ;;  %v7572_v63 = vcombine.high %v3124_v43, %v3128_v55  ;;  %v3137_v16 = vld [vmem:[#allocation4 + $0x4a8] sm:$0xff]  ;;  %v7571_v35 = vcombine.low %v3124_v43, %v3128_v55  ;;  %v3144_v22 = vld [vmem:[#allocation4 + $0x4e0] sm:$0xff] }
 0x25f   :  { %v2959_v33 = vadd.f32 %v2920_v6, %v2909_v32  ;;  %v2961_v0 = vadd.f32 %v9068_v8, %v2911_v60  ;;  %v2966_v46 = vmax.f32 %v2952_v49, 0.0  ;;  %v2968_v2 = vmax.f32 %v2954_v61, 0.0  ;;  %v3136_v8 = vld [vmem:[#allocation4 + $0x4a0] sm:$0xff]  ;;  %v3141_v49 = vld [vmem:[#allocation4 + $0x4c8] sm:$0xff] }
 0x260   :  { %v2974_v27 = vmax.f32 %v2960_v48, 0.0  ;;  %v7574_v6 = vcombine.high %v3125_v62, %v3129_v39  ;;  %v7573_v54 = vcombine.low %v3125_v62, %v3129_v39  ;;  %v7580_v42 = vcombine.high %v3132_v45, %v3136_v8  ;;  %v3145_v61 = vld [vmem:[#allocation4 + $0x4e8] sm:$0xff]  ;;  %v3152_v26 = vld [vmem:[#allocation4 + $0x520] sm:$0xff] }
 0x261   :  { %v2973_v7 = vmax.f32 %v2959_v33, 0.0  ;;  %v2975_v9 = vmax.f32 %v2961_v0, 0.0  ;;  %v7582_v25 = vcombine.high %v3133_v5, %v3137_v16  ;;  %v7579_v28 = vcombine.low %v3132_v45, %v3136_v8  ;;  %v3149_v47 = vld [vmem:[#allocation4 + $0x508] sm:$0xff] }
 0x262   :  { %v9158_v51 = vpack.c.bf16 %v2974_v27, %v2967_v1  ;;  %v7581_v32 = vcombine.low %v3133_v5, %v3137_v16  ;;  %v7588_v19 = vcombine.high %v3140_v36, %v3144_v22  ;;  %v7590_v20 = vcombine.high %v3141_v49, %v3145_v61  ;;  %v3153_v60 = vld [vmem:[#allocation4 + $0x528] sm:$0xff]  ;;  %v3156_v1 = vld [vmem:[#allocation4 + $0x540] sm:$0xff] }
 0x263   :  { %v9160_v4 = vpack.c.bf16 %v2973_v7, %v2966_v46  ;;  %v9162_v52 = vpack.c.bf16 %v2975_v9, %v2968_v2  ;;  %v7587_v48 = vcombine.low %v3140_v36, %v3144_v22  ;;  %v7589_v33 = vcombine.low %v3141_v49, %v3145_v61  ;;  %v3160_v27 = vld [vmem:[#allocation4 + $0x560] sm:$0xff]  ;;  %v3157_v55 = vld [vmem:[#allocation4 + $0x548] sm:$0xff] }
 0x264   :  { %5708 = vmatprep.mubr.bf16.mxu0 %v9158_v51  ;;  %5880 = vmatprep.mubr.bf16.mxu1 %v9158_v51  ;;  %v7596_v0 = vcombine.high %v3148_v21, %v3152_v26  ;;  %v7598_v43 = vcombine.high %v3149_v47, %v3153_v60  ;;  %v3161_v62 = vld [vmem:[#allocation4 + $0x568] sm:$0xff]  ;;  %v7595_v39 = vcombine.low %v3148_v21, %v3152_v26  ;;  %v3164_v9 = vld [vmem:[#allocation4 + $0x580] sm:$0xff] }
 0x265   :  { %5709 = vmatmul.mubr.bf16.vlgmr.msra.gmra.mrb[28].mxu0 %v9160_v4  ;;  %5881 = vmatmul.mubr.bf16.vlgmr.msra.gmra.mrb[28].mxu1 %v9160_v4  ;;  %v7597_v46 = vcombine.low %v3149_v47, %v3153_v60  ;;  %v7604_v2 = vcombine.high %v3156_v1, %v3160_v27  ;;  %v7606_v7 = vcombine.high %v3157_v55, %v3161_v62  ;;  %v3169_v45 = vld [vmem:[#allocation4 + $0x5a8] sm:$0xff]  ;;  %v3180_v61 = vld [vmem:[#allocation4 + $0x600] sm:$0xff] }
 0x266   :  { %5720 = vmatpush1.bf16.msra.mxu0 %v9383_v10  ;;  %5892 = vmatpush1.bf16.msra.mxu1 %v9384_v18  ;;  %v7603_v8 = vcombine.low %v3156_v1, %v3160_v27  ;;  %v7605_v5 = vcombine.low %v3157_v55, %v3161_v62  ;;  %v3172_v18 = vld [vmem:[#allocation4 + $0x5c0] sm:$0xff] }
 0x267   :  { %5721 = vmatprep.subr.bf16.mxu0 %v7572_v63  ;;  %5893 = vmatprep.subr.bf16.mxu1 %v7574_v6  ;;  %v3168_v63 = vld [vmem:[#allocation4 + $0x5a0] sm:$0xff]  ;;  %v3165_v6 = vld [vmem:[#allocation4 + $0x588] sm:$0xff] }
 0x268   :  { %v7612_v16 = vcombine.high %v3164_v9, %v3168_v63  ;;  %v7614_v10 = vcombine.high %v3165_v6, %v3169_v45  ;;  %v7613_v36 = vcombine.low %v3165_v6, %v3169_v45  ;;  %v3188_v60 = vld [vmem:[#allocation4 + $0x640] sm:$0xff] }
 0x269   :  { %v3196_v62 = vld [vmem:[#allocation4 + $0x680] sm:$0xff] }
 0x26a   :  { %5722 = vmatpush1.bf16.msra.mxu0 %v7571_v35  ;;  %5894 = vmatpush1.bf16.msra.mxu1 %v7573_v54  ;;  %v3176_v35 = vld [vmem:[#allocation4 + $0x5e0] sm:$0xff]  ;;  %v3173_v54 = vld [vmem:[#allocation4 + $0x5c8] sm:$0xff] }
 0x26b   :  { %5723 = vmatprep.subr.bf16.mxu0 %v7580_v42  ;;  %5895 = vmatprep.subr.bf16.mxu1 %v7582_v25  ;;  %v3177_v42 = vld [vmem:[#allocation4 + $0x5e8] sm:$0xff]  ;;  %v7611_v25 = vcombine.low %v3164_v9, %v3168_v63  ;;  %v7620_v22 = vcombine.high %v3172_v18, %v3176_v35  ;;  %v2931_v63 = vsub.s32 3, %v9062_v24 }
 0x26c   :  { %v7622_v49 = vcombine.high %v3173_v54, %v3177_v42  ;;  %v7621_v21 = vcombine.low %v3173_v54, %v3177_v42 }
 0x26d   :  { %v2932_v54 = vrot.slane %v9064_v30, %v2931_v63 }
 0x26e   :  { %5724 = vmatpush1.bf16.msra.mxu0 %v7579_v28  ;;  %5896 = vmatpush1.bf16.msra.mxu1 %v7581_v32  ;;  %v3184_v28 = vld [vmem:[#allocation4 + $0x620] sm:$0xff]  ;;  %v3181_v32 = vld [vmem:[#allocation4 + $0x608] sm:$0xff] }
 0x26f   :  { %5725 = vmatprep.subr.bf16.mxu0 %v7588_v19  ;;  %5897 = vmatprep.subr.bf16.mxu1 %v7590_v20  ;;  %v3185_v19 = vld [vmem:[#allocation4 + $0x628] sm:$0xff]  ;;  %v7619_v20 = vcombine.low %v3172_v18, %v3176_v35  ;;  %v7628_v26 = vcombine.high %v3180_v61, %v3184_v28  ;;  %v9177_v18 = vld [vmem:[#allocation4 + $0x700] sm:$0xff] }
 0x270   :  { %v7630_v47 = vcombine.high %v3181_v32, %v3185_v19  ;;  %v7629_v1 = vcombine.low %v3181_v32, %v3185_v19  ;;  %v9179_v35 = vld [vmem:[#allocation4 + $0x720] sm:$0xff] }
 0x272   :  { %5726 = vmatpush1.bf16.msra.mxu0 %v7587_v48  ;;  %5898 = vmatpush1.bf16.msra.mxu1 %v7589_v33  ;;  %v3192_v48 = vld [vmem:[#allocation4 + $0x660] sm:$0xff]  ;;  %v3189_v33 = vld [vmem:[#allocation4 + $0x648] sm:$0xff] }
 0x273   :  { %5727 = vmatprep.subr.bf16.mxu0 %v7596_v0  ;;  %5899 = vmatprep.subr.bf16.mxu1 %v7598_v43  ;;  %v3193_v0 = vld [vmem:[#allocation4 + $0x668] sm:$0xff]  ;;  %v7627_v43 = vcombine.low %v3180_v61, %v3184_v28  ;;  %v7636_v27 = vcombine.high %v3188_v60, %v3192_v48 }
 0x274   :  { %v7638_v55 = vcombine.high %v3189_v33, %v3193_v0  ;;  %v7637_v9 = vcombine.low %v3189_v33, %v3193_v0 }
 0x276   :  { %5728 = vmatpush1.bf16.msra.mxu0 %v7595_v39  ;;  %5900 = vmatpush1.bf16.msra.mxu1 %v7597_v46  ;;  %v3200_v39 = vld [vmem:[#allocation4 + $0x6a0] sm:$0xff]  ;;  %v3197_v46 = vld [vmem:[#allocation4 + $0x688] sm:$0xff] }
 0x277   :  { %5729 = vmatprep.subr.bf16.mxu0 %v7604_v2  ;;  %5901 = vmatprep.subr.bf16.mxu1 %v7606_v7  ;;  %v3201_v2 = vld [vmem:[#allocation4 + $0x6a8] sm:$0xff]  ;;  %v7635_v7 = vcombine.low %v3188_v60, %v3192_v48  ;;  %v7644_v6 = vcombine.high %v3196_v62, %v3200_v39  ;;  %v7643_v42 = vcombine.low %v3196_v62, %v3200_v39 }
 0x278   :  { %v7646_v45 = vcombine.high %v3197_v46, %v3201_v2  ;;  %v7660_v60 = vcombine.high %v9177_v18, %v9179_v35 }
 0x27a   :  { %5730 = vmatpush1.bf16.msra.mxu0 %v7603_v8  ;;  %5902 = vmatpush1.bf16.msra.mxu1 %v7605_v5  ;;  %v3204_v8 = vld [vmem:[#allocation4 + $0x6c0] sm:$0xff] }
 0x27b   :  { %5731 = vmatprep.subr.bf16.mxu0 %v7612_v16  ;;  %5903 = vmatprep.subr.bf16.mxu1 %v7614_v10  ;;  %v3208_v5 = vld [vmem:[#allocation4 + $0x6e0] sm:$0xff]  ;;  %v9175_v16 = vld [vmem:[#allocation4 + $0x6c8] sm:$0xff] }
 0x27c   :  { %v3209_v10 = vld [vmem:[#allocation4 + $0x6e8] sm:$0xff]  ;;  %v7651_v28 = vcombine.low %v3204_v8, %v3208_v5  ;;  %v7652_v32 = vcombine.high %v3204_v8, %v3208_v5 }
 0x27d   :  { %v7653_v19 = vcombine.low %v9175_v16, %v3209_v10  ;;  %v9391_v8 = vld [vmem:[#allocation16_spill] sm:$0xff] }
 0x27e   :  { %5732 = vmatpush1.bf16.msra.mxu0 %v7611_v25  ;;  %5904 = vmatpush1.bf16.msra.mxu1 %v7613_v36  ;;  %v7645_v25 = vcombine.low %v3197_v46, %v3201_v2  ;;  %v9182_v36 = vld [vmem:[#allocation4 + $0x708] sm:$0xff]  ;;  %v9387_v2 = vmax.f32 %v9000_v57, %v9040_v34  ;;  %v9390_v57 = vmax.f32 %v9018_v3, %v9090_v40 }
 0x27f   :  { %5733 = vmatprep.subr.bf16.mxu0 %v7620_v22  ;;  %5905 = vmatprep.subr.bf16.mxu1 %v7622_v49  ;;  %v9184_v22 = vld [vmem:[#allocation4 + $0x728] sm:$0xff] }
 0x280   :  { %v9392_v5 = vld [vmem:[#allocation12_spill] sm:$0xff]  ;;  %v7661_v40 = vcombine.low %v9182_v36, %v9184_v22 }
 0x282   :  { %5734 = vmatpush1.bf16.msra.mxu0 %v7619_v20  ;;  %5906 = vmatpush1.bf16.msra.mxu1 %v7621_v21 }
 0x283   :  { %5735 = vmatprep.subr.bf16.mxu0 %v7628_v26  ;;  %5907 = vmatprep.subr.bf16.mxu1 %v7630_v47  ;;  %v7654_v47 = vcombine.high %v9175_v16, %v3209_v10  ;;  %v9393_v16 = vld [vmem:[#allocation14_spill] sm:$0xff] }
 0x284   :  { %v9394_v10 = vmax.f32 %v9392_v5, %v9393_v16  ;;  %v3261_v16 = vld [vmem:[#allocation4 + $0x888] sm:$0xff] }
 0x286   :  { %5736 = vmatpush1.bf16.msra.mxu0 %v7627_v43  ;;  %5908 = vmatpush1.bf16.msra.mxu1 %v7629_v1  ;;  %v7659_v1 = vcombine.low %v9177_v18, %v9179_v35  ;;  %v9395_v35 = vld [vmem:[#allocation13_spill] sm:$0xff] }
 0x287   :  { %5737 = vmatprep.subr.bf16.mxu0 %v7636_v27  ;;  %5909 = vmatprep.subr.bf16.mxu1 %v7638_v55  ;;  %v9386_v55 = vmax.f32 %v9008_v59, %v9082_v53  ;;  %v3220_v53 = vld [vmem:[#allocation4 + $0x740] sm:$0xff] }
 0x28a   :  { %5738 = vmatpush1.bf16.msra.mxu0 %v7635_v7  ;;  %5910 = vmatpush1.bf16.msra.mxu1 %v7637_v9  ;;  %v9388_v9 = vmax.f32 %v9002_v58, %v9086_v31  ;;  %v3221_v58 = vld [vmem:[#allocation4 + $0x748] sm:$0xff] }
 0x28b   :  { %v2822_v49 = vpop.f32.mrb[24].mxu0  ;;  %v2865_v61 = vpop.f32.mrb[24].mxu1  ;;  %5739 = vmatprep.subr.bf16.mxu0 %v7644_v6  ;;  %5911 = vmatprep.subr.bf16.mxu1 %v7646_v45  ;;  %v9389_v6 = vmax.f32 %v8992_v56, %v9048_v41  ;;  %v3225_v31 = vld [vmem:[#allocation4 + $0x768] sm:$0xff] }
 0x28c   :  { %v2891_v20 = vmax.f32 %v9116_v38, %v2822_v49  ;;  %v2893_v21 = vmax.f32 %v9118_v44, %v2865_v61  ;;  %v2824_v26 = vpop.f32.mrb[25].mxu0  ;;  %v2867_v30 = vpop.f32.mrb[25].mxu1  ;;  %v7662_v38 = vcombine.high %v9182_v36, %v9184_v22  ;;  %v9385_v44 = vmax.f32 %v8984_v50, %v9032_v29  ;;  %v3229_v36 = vld [vmem:[#allocation4 + $0x788] sm:$0xff] }
 0x28d   :  { %v2892_v48 = vmax.f32 %v9114_v23, %v2824_v26  ;;  %v2894_v33 = vmax.f32 %v9128_v13, %v2867_v30  ;;  %v2826_v0 = vpop.f32.mrb[26].mxu0  ;;  %v2869_v43 = vpop.f32.mrb[26].mxu1  ;;  %v3233_v22 = vld [vmem:[#allocation4 + $0x7a8] sm:$0xff] }
 0x28e   :  { %v2905_v27 = vmax.f32 %v9385_v44, %v2891_v20  ;;  %v2907_v62 = vmax.f32 %v9386_v55, %v2893_v21  ;;  %v2898_v23 = vmax.f32 %v9122_v12, %v2826_v0  ;;  %v2900_v13 = vmax.f32 %v9124_v17, %v2869_v43  ;;  %5740 = vmatpush1.bf16.msra.mxu0 %v7643_v42  ;;  %v2828_v39 = vpop.f32.mrb[27].mxu0  ;;  %v2871_v46 = vpop.f32.mrb[27].mxu1  ;;  %v3224_v12 = vld [vmem:[#allocation4 + $0x760] sm:$0xff] }
 0x28f   :  { %v2906_v7 = vmax.f32 %v9387_v2, %v2892_v48  ;;  %v2908_v50 = vmax.f32 %v9388_v9, %v2894_v33  ;;  %5912 = vmatpush1.bf16.msra.mxu1 %v7645_v25  ;;  %v2899_v29 = vmax.f32 %v9120_v11, %v2828_v39  ;;  %v2901_v59 = vmax.f32 %v9136_v37, %v2871_v46  ;;  %v9396_v42 = vld [vmem:[#allocation15_spill] sm:$0xff] }
 0x290   :  { %v2955_v63 = vadd.f32 %v2932_v54, %v2905_v27  ;;  %v2957_v17 = vadd.f32 %v9106_v14, %v2907_v62  ;;  %v2912_v45 = vmax.f32 %v9389_v6, %v2898_v23  ;;  %v2914_v34 = vmax.f32 %v9390_v57, %v2900_v13  ;;  %5741 = vmatprep.subr.bf16.mxu0 %v7652_v32  ;;  %v3236_v62 = vld [vmem:[#allocation4 + $0x7c0] sm:$0xff]  ;;  %v3237_v13 = vld [vmem:[#allocation4 + $0x7c8] sm:$0xff] }
 0x291   :  { %v2956_v11 = vadd.f32 %v9109_v15, %v2906_v7  ;;  %v2958_v37 = vadd.f32 %v9391_v8, %v2908_v50  ;;  %v2913_v18 = vmax.f32 %v9394_v10, %v2899_v29  ;;  %v9397_v25 = vmax.f32 %v9395_v35, %v9396_v42  ;;  %5913 = vmatprep.subr.bf16.mxu1 %v7654_v47  ;;  %v3232_v47 = vld [vmem:[#allocation4 + $0x7a0] sm:$0xff]  ;;  %v3241_v39 = vld [vmem:[#allocation4 + $0x7e8] sm:$0xff] }
 0x292   :  { %v2962_v41 = vadd.f32 %v2932_v54, %v2912_v45  ;;  %v2964_v3 = vadd.f32 %v9106_v14, %v2914_v34  ;;  %5742 = vmatpush1.bf16.msra.mxu0 %v7651_v28  ;;  %v7668_v49 = vcombine.high %v3220_v53, %v3224_v12  ;;  %v7670_v20 = vcombine.high %v3221_v58, %v3225_v31  ;;  %v3228_v54 = vld [vmem:[#allocation4 + $0x780] sm:$0xff]  ;;  %v3245_v29 = vld [vmem:[#allocation4 + $0x808] sm:$0xff] }
 0x293   :  { %v2915_v56 = vmax.f32 %v9397_v25, %v2901_v59  ;;  %v2963_v61 = vadd.f32 %v9109_v15, %v2913_v18  ;;  %5914 = vmatpush1.bf16.msra.mxu1 %v7653_v19  ;;  %5743 = vmatprep.subr.bf16.mxu0 %v7660_v60  ;;  %v2969_v21 = vmax.f32 %v2955_v63, 0.0  ;;  %v2971_v26 = vmax.f32 %v2957_v17, 0.0  ;;  %v3240_v23 = vld [vmem:[#allocation4 + $0x7e0] sm:$0xff]  ;;  %v3249_v59 = vld [vmem:[#allocation4 + $0x828] sm:$0xff] }
 0x294   :  { %v2976_v30 = vmax.f32 %v2962_v41, 0.0  ;;  %v2978_v48 = vmax.f32 %v2964_v3, 0.0  ;;  %5915 = vmatprep.subr.bf16.mxu1 %v7662_v38  ;;  %v2970_v14 = vmax.f32 %v2956_v11, 0.0  ;;  %v2972_v28 = vmax.f32 %v2958_v37, 0.0  ;;  %v3244_v9 = vld [vmem:[#allocation4 + $0x800] sm:$0xff]  ;;  %v3253_v34 = vld [vmem:[#allocation4 + $0x848] sm:$0xff] }
 0x295   :  { %v2965_v32 = vadd.f32 %v9391_v8, %v2915_v56  ;;  %v2977_v33 = vmax.f32 %v2963_v61, 0.0  ;;  %v7667_v19 = vcombine.low %v3220_v53, %v3224_v12  ;;  %v7669_v60 = vcombine.low %v3221_v58, %v3225_v31  ;;  %v3248_v50 = vld [vmem:[#allocation4 + $0x820] sm:$0xff]  ;;  %v3257_v58 = vld [vmem:[#allocation4 + $0x868] sm:$0xff] }
 0x296   :  { %v9234_v43 = vpack.c.bf16 %v2976_v30, %v2969_v21  ;;  %v9236_v15 = vpack.c.bf16 %v2978_v48, %v2971_v26  ;;  %5744 = vmatpush1.bf16.msra.mxu0 %v7659_v1  ;;  %v7676_v38 = vcombine.high %v3228_v54, %v3232_v47  ;;  %v7678_v55 = vcombine.high %v3229_v36, %v3233_v22  ;;  %v3252_v6 = vld [vmem:[#allocation4 + $0x840] sm:$0xff]  ;;  %v3265_v10 = vld [vmem:[#allocation4 + $0x8a8] sm:$0xff] }
 0x297   :  { %v2979_v0 = vmax.f32 %v2965_v32, 0.0  ;;  %v9238_v44 = vpack.c.bf16 %v2977_v33, %v2970_v14  ;;  %5916 = vmatpush1.bf16.msra.mxu1 %v7661_v40  ;;  %5745 = vmatprep.subr.bf16.mxu0 %v7668_v49  ;;  %v7675_v1 = vcombine.low %v3228_v54, %v3232_v47  ;;  %v7677_v46 = vcombine.low %v3229_v36, %v3233_v22  ;;  %v3256_v45 = vld [vmem:[#allocation4 + $0x860] sm:$0xff]  ;;  %v3269_v3 = vld [vmem:[#allocation4 + $0x8c8] sm:$0xff] }
 0x298   :  { %5751 = vmatprep.mubr.bf16.mxu0 %v9234_v43  ;;  %5917 = vmatprep.subr.bf16.mxu1 %v7670_v20  ;;  %v7684_v2 = vcombine.high %v3236_v62, %v3240_v23  ;;  %v7686_v7 = vcombine.high %v3237_v13, %v3241_v39  ;;  %v7683_v53 = vcombine.low %v3236_v62, %v3240_v23  ;;  %v3260_v8 = vld [vmem:[#allocation4 + $0x880] sm:$0xff]  ;;  %v3273_v40 = vld [vmem:[#allocation4 + $0x8e8] sm:$0xff] }
 0x299   :  { %v9240_v27 = vpack.c.bf16 %v2979_v0, %v2972_v28  ;;  %5923 = vmatprep.mubr.bf16.mxu1 %v9234_v43  ;;  %v7685_v12 = vcombine.low %v3237_v13, %v3241_v39  ;;  %v7692_v63 = vcombine.high %v3244_v9, %v3248_v50  ;;  %v7694_v17 = vcombine.high %v3245_v29, %v3249_v59  ;;  %v3264_v37 = vld [vmem:[#allocation4 + $0x8a0] sm:$0xff]  ;;  %v3277_v30 = vld [vmem:[#allocation4 + $0x908] sm:$0xff] }
 0x29a   :  { %5746 = vmatpush1.bf16.msra.mxu0 %v7667_v19  ;;  %v7691_v57 = vcombine.low %v3244_v9, %v3248_v50  ;;  %v7693_v31 = vcombine.low %v3245_v29, %v3249_v59  ;;  %v7700_v11 = vcombine.high %v3252_v6, %v3256_v45  ;;  %v7702_v5 = vcombine.high %v3253_v34, %v3257_v58  ;;  %v3268_v56 = vld [vmem:[#allocation4 + $0x8c0] sm:$0xff]  ;;  %v3281_v48 = vld [vmem:[#allocation4 + $0x928] sm:$0xff] }
 0x29b   :  { %5918 = vmatpush1.bf16.msra.mxu1 %v7669_v60  ;;  %5747 = vmatprep.subr.bf16.mxu0 %v7676_v38  ;;  %v7699_v18 = vcombine.low %v3252_v6, %v3256_v45  ;;  %v7701_v35 = vcombine.low %v3253_v34, %v3257_v58  ;;  %v7708_v42 = vcombine.high %v3260_v8, %v3264_v37  ;;  %v3272_v41 = vld [vmem:[#allocation4 + $0x8e0] sm:$0xff]  ;;  %v3285_v36 = vld [vmem:[#allocation4 + $0x948] sm:$0xff] }
 0x29c   :  { %5919 = vmatprep.subr.bf16.mxu1 %v7678_v55  ;;  %v7710_v25 = vcombine.high %v3261_v16, %v3265_v10  ;;  %v7707_v49 = vcombine.low %v3260_v8, %v3264_v37  ;;  %v7709_v61 = vcombine.low %v3261_v16, %v3265_v10  ;;  %v7716_v32 = vcombine.high %v3268_v56, %v3272_v41  ;;  %v3276_v21 = vld [vmem:[#allocation4 + $0x900] sm:$0xff]  ;;  %v3289_v22 = vld [vmem:[#allocation4 + $0x968] sm:$0xff] }
 0x29d   :  { %v7718_v20 = vcombine.high %v3269_v3, %v3273_v40  ;;  %v3280_v26 = vld [vmem:[#allocation4 + $0x920] sm:$0xff]  ;;  %v7715_v54 = vcombine.low %v3268_v56, %v3272_v41  ;;  %v7717_v47 = vcombine.low %v3269_v3, %v3273_v40  ;;  %v7726_v28 = vcombine.high %v3277_v30, %v3281_v48  ;;  %v3293_v13 = vld [vmem:[#allocation4 + $0x988] sm:$0xff] }
 0x29e   :  { %5748 = vmatpush1.bf16.msra.mxu0 %v7675_v1  ;;  %v7724_v14 = vcombine.high %v3276_v21, %v3280_v26  ;;  %v3284_v33 = vld [vmem:[#allocation4 + $0x940] sm:$0xff]  ;;  %v7723_v19 = vcombine.low %v3276_v21, %v3280_v26  ;;  %v7725_v60 = vcombine.low %v3277_v30, %v3281_v48  ;;  %v7734_v55 = vcombine.high %v3285_v36, %v3289_v22  ;;  %v3297_v39 = vld [vmem:[#allocation4 + $0x9a8] sm:$0xff] }
 0x29f   :  { %5920 = vmatpush1.bf16.msra.mxu1 %v7677_v46  ;;  %5749 = vmatprep.subr.bf16.mxu0 %v7684_v2  ;;  %v3288_v0 = vld [vmem:[#allocation4 + $0x960] sm:$0xff]  ;;  %v7733_v46 = vcombine.low %v3285_v36, %v3289_v22  ;;  %v3301_v29 = vld [vmem:[#allocation4 + $0x9c8] sm:$0xff] }
 0x2a0   :  { %5921 = vmatprep.subr.bf16.mxu1 %v7686_v7  ;;  %v7732_v38 = vcombine.high %v3284_v33, %v3288_v0  ;;  %v3292_v62 = vld [vmem:[#allocation4 + $0x980] sm:$0xff]  ;;  %v7731_v1 = vcombine.low %v3284_v33, %v3288_v0  ;;  %v7742_v7 = vcombine.high %v3293_v13, %v3297_v39  ;;  %v3305_v59 = vld [vmem:[#allocation4 + $0x9e8] sm:$0xff] }
 0x2a1   :  { %v3296_v23 = vld [vmem:[#allocation4 + $0x9a0] sm:$0xff]  ;;  %v3313_v34 = vld [vmem:[#allocation4 + $0xa28] sm:$0xff] }
 0x2a2   :  { %5750 = vmatpush1.bf16.msra.mxu0 %v7683_v53  ;;  %v7740_v2 = vcombine.high %v3292_v62, %v3296_v23  ;;  %v3300_v9 = vld [vmem:[#allocation4 + $0x9c0] sm:$0xff]  ;;  %v7739_v53 = vcombine.low %v3292_v62, %v3296_v23  ;;  %v3317_v16 = vld [vmem:[#allocation4 + $0xa48] sm:$0xff] }
 0x2a3   :  { %5922 = vmatpush1.bf16.msra.mxu1 %v7685_v12  ;;  %5762 = vmatprep.subr.bf16.mxu0 %v7692_v63  ;;  %v3304_v50 = vld [vmem:[#allocation4 + $0x9e0] sm:$0xff]  ;;  %v7741_v12 = vcombine.low %v3293_v13, %v3297_v39  ;;  %v3321_v10 = vld [vmem:[#allocation4 + $0xa68] sm:$0xff] }
 0x2a4   :  { %5934 = vmatprep.subr.bf16.mxu1 %v7694_v17  ;;  %v7748_v63 = vcombine.high %v3300_v9, %v3304_v50  ;;  %v7750_v17 = vcombine.high %v3301_v29, %v3305_v59  ;;  %v3308_v6 = vld [vmem:[#allocation4 + $0xa00] sm:$0xff]  ;;  %v7747_v58 = vcombine.low %v3300_v9, %v3304_v50  ;;  %v3325_v3 = vld [vmem:[#allocation4 + $0xa88] sm:$0xff] }
 0x2a5   :  { %5752 = vmatmul.mubr.bf16.vlgmr.msra.gmra.mrb[28].mxu0 %v9162_v52  ;;  %v3312_v45 = vld [vmem:[#allocation4 + $0xa20] sm:$0xff]  ;;  %v3329_v40 = vld [vmem:[#allocation4 + $0xaa8] sm:$0xff] }
 0x2a6   :  { %5924 = vmatmul.mubr.bf16.vlgmr.msra.gmra.mrb[28].mxu1 %v9162_v52  ;;  %5763 = vmatpush1.bf16.msra.mxu0 %v7691_v57  ;;  %v3309_v57 = vld [vmem:[#allocation4 + $0xa08] sm:$0xff]  ;;  %v3316_v37 = vld [vmem:[#allocation4 + $0xa40] sm:$0xff] }
 0x2a7   :  { %5794 = vmatprep.mubr.bf16.mxu0 %v9236_v15  ;;  %5935 = vmatpush1.bf16.msra.mxu1 %v7693_v31  ;;  %v7749_v31 = vcombine.low %v3301_v29, %v3305_v59  ;;  %v7758_v8 = vcombine.high %v3309_v57, %v3313_v34  ;;  %v3324_v56 = vld [vmem:[#allocation4 + $0xa80] sm:$0xff]  ;;  %v3333_v30 = vld [vmem:[#allocation4 + $0xac8] sm:$0xff] }
 0x2a8   :  { %5966 = vmatprep.mubr.bf16.mxu1 %v9236_v15  ;;  %5764 = vmatprep.subr.bf16.mxu0 %v7700_v11  ;;  %v7756_v11 = vcombine.high %v3308_v6, %v3312_v45  ;;  %v3328_v41 = vld [vmem:[#allocation4 + $0xaa0] sm:$0xff]  ;;  %v3337_v48 = vld [vmem:[#allocation4 + $0xae8] sm:$0xff] }
 0x2a9   :  { %5936 = vmatprep.subr.bf16.mxu1 %v7702_v5  ;;  %v3320_v5 = vld [vmem:[#allocation4 + $0xa60] sm:$0xff]  ;;  %v3341_v36 = vld [vmem:[#allocation4 + $0xb08] sm:$0xff] }
 0x2aa   :  { %5765 = vmatpush1.bf16.msra.mxu0 %v7699_v18  ;;  %v7755_v18 = vcombine.low %v3308_v6, %v3312_v45  ;;  %v3332_v21 = vld [vmem:[#allocation4 + $0xac0] sm:$0xff]  ;;  %v3345_v22 = vld [vmem:[#allocation4 + $0xb28] sm:$0xff] }
 0x2ab   :  { %5937 = vmatpush1.bf16.msra.mxu1 %v7701_v35  ;;  %5766 = vmatprep.subr.bf16.mxu0 %v7708_v42  ;;  %v7757_v35 = vcombine.low %v3309_v57, %v3313_v34  ;;  %v7764_v42 = vcombine.high %v3316_v37, %v3320_v5  ;;  %v3336_v26 = vld [vmem:[#allocation4 + $0xae0] sm:$0xff]  ;;  %v3349_v13 = vld [vmem:[#allocation4 + $0xb48] sm:$0xff] }
 0x2ac   :  { %5938 = vmatprep.subr.bf16.mxu1 %v7710_v25  ;;  %v7766_v25 = vcombine.high %v3317_v16, %v3321_v10  ;;  %v3340_v33 = vld [vmem:[#allocation4 + $0xb00] sm:$0xff]  ;;  %v3353_v39 = vld [vmem:[#allocation4 + $0xb68] sm:$0xff] }
 0x2ad   :  { %v3344_v0 = vld [vmem:[#allocation4 + $0xb20] sm:$0xff]  ;;  %v3357_v29 = vld [vmem:[#allocation4 + $0xb88] sm:$0xff] }
 0x2ae   :  { %5767 = vmatpush1.bf16.msra.mxu0 %v7707_v49  ;;  %v7763_v49 = vcombine.low %v3316_v37, %v3320_v5  ;;  %v3348_v62 = vld [vmem:[#allocation4 + $0xb40] sm:$0xff]  ;;  %v3361_v59 = vld [vmem:[#allocation4 + $0xba8] sm:$0xff] }
 0x2af   :  { %5939 = vmatpush1.bf16.msra.mxu1 %v7709_v61  ;;  %5768 = vmatprep.subr.bf16.mxu0 %v7716_v32  ;;  %v7765_v61 = vcombine.low %v3317_v16, %v3321_v10  ;;  %v7772_v32 = vcombine.high %v3324_v56, %v3328_v41  ;;  %v3352_v23 = vld [vmem:[#allocation4 + $0xb60] sm:$0xff]  ;;  %v3365_v57 = vld [vmem:[#allocation4 + $0xbc8] sm:$0xff] }
 0x2b0   :  { %5940 = vmatprep.subr.bf16.mxu1 %v7718_v20  ;;  %v7774_v20 = vcombine.high %v3325_v3, %v3329_v40  ;;  %v3356_v9 = vld [vmem:[#allocation4 + $0xb80] sm:$0xff]  ;;  %v3369_v34 = vld [vmem:[#allocation4 + $0xbe8] sm:$0xff] }
 0x2b1   :  { %v3360_v50 = vld [vmem:[#allocation4 + $0xba0] sm:$0xff]  ;;  %v3373_v16 = vld [vmem:[#allocation4 + $0xc08] sm:$0xff] }
 0x2b2   :  { %5769 = vmatpush1.bf16.msra.mxu0 %v7715_v54  ;;  %v7771_v54 = vcombine.low %v3324_v56, %v3328_v41  ;;  %v3364_v6 = vld [vmem:[#allocation4 + $0xbc0] sm:$0xff]  ;;  %v3377_v10 = vld [vmem:[#allocation4 + $0xc28] sm:$0xff] }
 0x2b3   :  { %5941 = vmatpush1.bf16.msra.mxu1 %v7717_v47  ;;  %5770 = vmatprep.subr.bf16.mxu0 %v7724_v14  ;;  %v7773_v47 = vcombine.low %v3325_v3, %v3329_v40  ;;  %v7780_v14 = vcombine.high %v3332_v21, %v3336_v26  ;;  %v3368_v45 = vld [vmem:[#allocation4 + $0xbe0] sm:$0xff]  ;;  %v3381_v3 = vld [vmem:[#allocation4 + $0xc48] sm:$0xff] }
 0x2b4   :  { %5942 = vmatprep.subr.bf16.mxu1 %v7726_v28  ;;  %v7782_v28 = vcombine.high %v3333_v30, %v3337_v48  ;;  %v3372_v37 = vld [vmem:[#allocation4 + $0xc00] sm:$0xff]  ;;  %v3385_v40 = vld [vmem:[#allocation4 + $0xc68] sm:$0xff] }
 0x2b5   :  { %v3376_v5 = vld [vmem:[#allocation4 + $0xc20] sm:$0xff] }
 0x2b6   :  { %5771 = vmatpush1.bf16.msra.mxu0 %v7723_v19  ;;  %v7779_v19 = vcombine.low %v3332_v21, %v3336_v26  ;;  %v3380_v56 = vld [vmem:[#allocation4 + $0xc40] sm:$0xff] }
 0x2b7   :  { %5943 = vmatpush1.bf16.msra.mxu1 %v7725_v60  ;;  %5772 = vmatprep.subr.bf16.mxu0 %v7732_v38  ;;  %v7781_v60 = vcombine.low %v3333_v30, %v3337_v48  ;;  %v7788_v38 = vcombine.high %v3340_v33, %v3344_v0  ;;  %v3384_v41 = vld [vmem:[#allocation4 + $0xc60] sm:$0xff]  ;;  %v3389_v30 = vld [vmem:[#allocation4 + $0xc88] sm:$0xff] }
 0x2b8   :  { %5944 = vmatprep.subr.bf16.mxu1 %v7734_v55  ;;  %v7790_v55 = vcombine.high %v3341_v36, %v3345_v22  ;;  %v3388_v21 = vld [vmem:[#allocation4 + $0xc80] sm:$0xff]  ;;  %v3393_v48 = vld [vmem:[#allocation4 + $0xca8] sm:$0xff] }
 0x2b9   :  { %v3392_v26 = vld [vmem:[#allocation4 + $0xca0] sm:$0xff] }
 0x2ba   :  { %5773 = vmatpush1.bf16.msra.mxu0 %v7731_v1  ;;  %v7787_v1 = vcombine.low %v3340_v33, %v3344_v0  ;;  %v3396_v33 = vld [vmem:[#allocation4 + $0xcc0] sm:$0xff] }
 0x2bb   :  { %5945 = vmatpush1.bf16.msra.mxu1 %v7733_v46  ;;  %5774 = vmatprep.subr.bf16.mxu0 %v7740_v2  ;;  %v7789_v46 = vcombine.low %v3341_v36, %v3345_v22  ;;  %v7796_v2 = vcombine.high %v3348_v62, %v3352_v23  ;;  %v3400_v0 = vld [vmem:[#allocation4 + $0xce0] sm:$0xff]  ;;  %v8822_v36 = vmov 0   ;;  %v3397_v22 = vld [vmem:[#allocation4 + $0xcc8] sm:$0xff] }
 0x2bc   :  { %5946 = vmatprep.subr.bf16.mxu1 %v7742_v7  ;;  %v7798_v7 = vcombine.high %v3349_v13, %v3353_v39 }
 0x2be   :  { %5775 = vmatpush1.bf16.msra.mxu0 %v7739_v53  ;;  %v7795_v53 = vcombine.low %v3348_v62, %v3352_v23  ;;  %v3404_v23 = vld [vmem:[#allocation4 + $0xd00] sm:$0xff] }
 0x2bf   :  { %5947 = vmatpush1.bf16.msra.mxu1 %v7741_v12  ;;  %5776 = vmatprep.subr.bf16.mxu0 %v7748_v63  ;;  %v7797_v12 = vcombine.low %v3349_v13, %v3353_v39  ;;  %v7804_v63 = vcombine.high %v3356_v9, %v3360_v50  ;;  %v3408_v13 = vld [vmem:[#allocation4 + $0xd20] sm:$0xff]  ;;  %v3405_v39 = vld [vmem:[#allocation4 + $0xd08] sm:$0xff] }
 0x2c0   :  { %5948 = vmatprep.subr.bf16.mxu1 %v7750_v17  ;;  %v7806_v17 = vcombine.high %v3357_v29, %v3361_v59 }
 0x2c2   :  { %5777 = vmatpush1.bf16.msra.mxu0 %v7747_v58  ;;  %v7803_v58 = vcombine.low %v3356_v9, %v3360_v50  ;;  %v3412_v50 = vld [vmem:[#allocation4 + $0xd40] sm:$0xff] }
 0x2c3   :  { %5949 = vmatpush1.bf16.msra.mxu1 %v7749_v31  ;;  %5778 = vmatprep.subr.bf16.mxu0 %v7756_v11  ;;  %v7805_v31 = vcombine.low %v3357_v29, %v3361_v59  ;;  %v7812_v11 = vcombine.high %v3364_v6, %v3368_v45  ;;  %v3416_v29 = vld [vmem:[#allocation4 + $0xd60] sm:$0xff]  ;;  %v3413_v59 = vld [vmem:[#allocation4 + $0xd48] sm:$0xff] }
 0x2c4   :  { %5950 = vmatprep.subr.bf16.mxu1 %v7758_v8  ;;  %v7814_v8 = vcombine.high %v3365_v57, %v3369_v34 }
 0x2c6   :  { %5779 = vmatpush1.bf16.msra.mxu0 %v7755_v18  ;;  %v7811_v18 = vcombine.low %v3364_v6, %v3368_v45  ;;  %v3420_v45 = vld [vmem:[#allocation4 + $0xd80] sm:$0xff] }
 0x2c7   :  { %5951 = vmatpush1.bf16.msra.mxu1 %v7757_v35  ;;  %5780 = vmatprep.subr.bf16.mxu0 %v7764_v42  ;;  %v7813_v35 = vcombine.low %v3365_v57, %v3369_v34  ;;  %v7820_v42 = vcombine.high %v3372_v37, %v3376_v5  ;;  %v3424_v57 = vld [vmem:[#allocation4 + $0xda0] sm:$0xff]  ;;  %v3421_v34 = vld [vmem:[#allocation4 + $0xd88] sm:$0xff] }
 0x2c8   :  { %5952 = vmatprep.subr.bf16.mxu1 %v7766_v25  ;;  %v7822_v25 = vcombine.high %v3373_v16, %v3377_v10 }
 0x2ca   :  { %5781 = vmatpush1.bf16.msra.mxu0 %v7763_v49  ;;  %v7819_v49 = vcombine.low %v3372_v37, %v3376_v5  ;;  %v3428_v5 = vld [vmem:[#allocation4 + $0xdc0] sm:$0xff] }
 0x2cb   :  { %5953 = vmatpush1.bf16.msra.mxu1 %v7765_v61  ;;  %5782 = vmatprep.subr.bf16.mxu0 %v7772_v32  ;;  %v7821_v61 = vcombine.low %v3373_v16, %v3377_v10  ;;  %v7828_v32 = vcombine.high %v3380_v56, %v3384_v41  ;;  %v3432_v16 = vld [vmem:[#allocation4 + $0xde0] sm:$0xff]  ;;  %v3429_v10 = vld [vmem:[#allocation4 + $0xdc8] sm:$0xff] }
 0x2cc   :  { %5954 = vmatprep.subr.bf16.mxu1 %v7774_v20  ;;  %v7830_v20 = vcombine.high %v3381_v3, %v3385_v40 }
 0x2ce   :  { %5783 = vmatpush1.bf16.msra.mxu0 %v7771_v54  ;;  %v7827_v54 = vcombine.low %v3380_v56, %v3384_v41  ;;  %v2990_v41 = vld [vmem:[#allocation4 + $0x10] sm:$0xff] }
 0x2cf   :  { %5955 = vmatpush1.bf16.msra.mxu1 %v7773_v47  ;;  %5784 = vmatprep.subr.bf16.mxu0 %v7780_v14  ;;  %v7829_v47 = vcombine.low %v3381_v3, %v3385_v40  ;;  %v7836_v14 = vcombine.high %v3388_v21, %v3392_v26  ;;  %v2994_v3 = vld [vmem:[#allocation4 + $0x30] sm:$0xff]  ;;  %v2991_v40 = vld [vmem:[#allocation4 + $0x18] sm:$0xff] }
 0x2d0   :  { %5956 = vmatprep.subr.bf16.mxu1 %v7782_v28  ;;  %v7838_v28 = vcombine.high %v3389_v30, %v3393_v48 }
 0x2d2   :  { %5785 = vmatpush1.bf16.msra.mxu0 %v7779_v19  ;;  %v3401_v19 = vld [vmem:[#allocation4 + $0xce8] sm:$0xff] }
 0x2d3   :  { %5957 = vmatpush1.bf16.msra.mxu1 %v7781_v60  ;;  %5786 = vmatprep.subr.bf16.mxu0 %v7788_v38  ;;  %v7835_v60 = vcombine.low %v3388_v21, %v3392_v26  ;;  %v7837_v38 = vcombine.low %v3389_v30, %v3393_v48  ;;  %v7846_v62 = vcombine.high %v3397_v22, %v3401_v19  ;;  %v2998_v26 = vld [vmem:[#allocation4 + $0x50] sm:$0xff] }
 0x2d4   :  { %5958 = vmatprep.subr.bf16.mxu1 %v7790_v55  ;;  %v7844_v55 = vcombine.high %v3396_v33, %v3400_v0  ;;  %v3002_v30 = vld [vmem:[#allocation4 + $0x70] sm:$0xff]  ;;  %v7439_v48 = vcombine.low %v2990_v41, %v2994_v3 }
 0x2d6   :  { %5787 = vmatpush1.bf16.msra.mxu0 %v7787_v1  ;;  %v3409_v1 = vld [vmem:[#allocation4 + $0xd28] sm:$0xff] }
 0x2d7   :  { %5959 = vmatpush1.bf16.msra.mxu1 %v7789_v46  ;;  %5788 = vmatprep.subr.bf16.mxu0 %v7796_v2  ;;  %v7843_v46 = vcombine.low %v3396_v33, %v3400_v0  ;;  %v7845_v2 = vcombine.low %v3397_v22, %v3401_v19  ;;  %v7854_v9 = vcombine.high %v3405_v39, %v3409_v1  ;;  %v3006_v33 = vld [vmem:[#allocation4 + $0x90] sm:$0xff]  ;;  %v3007_v19 = vld [vmem:[#allocation4 + $0x98] sm:$0xff] }
 0x2d8   :  { %5960 = vmatprep.subr.bf16.mxu1 %v7798_v7  ;;  %v7852_v7 = vcombine.high %v3404_v23, %v3408_v13  ;;  %v3010_v0 = vld [vmem:[#allocation4 + $0xb0] sm:$0xff] }
 0x2da   :  { %5789 = vmatpush1.bf16.msra.mxu0 %v7795_v53  ;;  %v3417_v53 = vld [vmem:[#allocation4 + $0xd68] sm:$0xff] }
 0x2db   :  { %5961 = vmatpush1.bf16.msra.mxu1 %v7797_v12  ;;  %5790 = vmatprep.subr.bf16.mxu0 %v7804_v63  ;;  %v7851_v12 = vcombine.low %v3404_v23, %v3408_v13  ;;  %v7853_v63 = vcombine.low %v3405_v39, %v3409_v1  ;;  %v7862_v6 = vcombine.high %v3413_v59, %v3417_v53  ;;  %v3014_v13 = vld [vmem:[#allocation4 + $0xd0] sm:$0xff]  ;;  %v3015_v1 = vld [vmem:[#allocation4 + $0xd8] sm:$0xff] }
 0x2dc   :  { %5962 = vmatprep.subr.bf16.mxu1 %v7806_v17  ;;  %v7860_v17 = vcombine.high %v3412_v50, %v3416_v29  ;;  %v3018_v39 = vld [vmem:[#allocation4 + $0xf0] sm:$0xff] }
 0x2de   :  { %5791 = vmatpush1.bf16.msra.mxu0 %v7803_v58  ;;  %v3425_v58 = vld [vmem:[#allocation4 + $0xda8] sm:$0xff] }
 0x2df   :  { %5963 = vmatpush1.bf16.msra.mxu1 %v7805_v31  ;;  %5792 = vmatprep.subr.bf16.mxu0 %v7812_v11  ;;  %v7859_v31 = vcombine.low %v3412_v50, %v3416_v29  ;;  %v7861_v11 = vcombine.low %v3413_v59, %v3417_v53  ;;  %v7870_v37 = vcombine.high %v3421_v34, %v3425_v58  ;;  %v3022_v29 = vld [vmem:[#allocation4 + $0x110] sm:$0xff]  ;;  %v3023_v53 = vld [vmem:[#allocation4 + $0x118] sm:$0xff] }
 0x2e0   :  { %5964 = vmatprep.subr.bf16.mxu1 %v7814_v8  ;;  %v7868_v8 = vcombine.high %v3420_v45, %v3424_v57  ;;  %v3026_v59 = vld [vmem:[#allocation4 + $0x130] sm:$0xff] }
 0x2e2   :  { %5793 = vmatpush1.bf16.msra.mxu0 %v7811_v18  ;;  %v3433_v18 = vld [vmem:[#allocation4 + $0xde8] sm:$0xff] }
 0x2e3   :  { %5965 = vmatpush1.bf16.msra.mxu1 %v7813_v35  ;;  %5805 = vmatprep.subr.bf16.mxu0 %v7820_v42  ;;  %v7867_v35 = vcombine.low %v3420_v45, %v3424_v57  ;;  %v7869_v42 = vcombine.low %v3421_v34, %v3425_v58  ;;  %v7878_v56 = vcombine.high %v3429_v10, %v3433_v18  ;;  %v3030_v45 = vld [vmem:[#allocation4 + $0x150] sm:$0xff]  ;;  %v3031_v34 = vld [vmem:[#allocation4 + $0x158] sm:$0xff] }
 0x2e4   :  { %5977 = vmatprep.subr.bf16.mxu1 %v7822_v25  ;;  %v7876_v25 = vcombine.high %v3428_v5, %v3432_v16  ;;  %v3034_v57 = vld [vmem:[#allocation4 + $0x170] sm:$0xff]  ;;  %v3035_v58 = vld [vmem:[#allocation4 + $0x178] sm:$0xff] }
 0x2e5   :  { %5795 = vmatmul.mubr.bf16.vlgmr.msra.gmra.mrb[28].mxu0 %v9238_v44 }
 0x2e6   :  { %5967 = vmatmul.mubr.bf16.vlgmr.msra.gmra.mrb[28].mxu1 %v9238_v44  ;;  %5806 = vmatpush1.bf16.msra.mxu0 %v7819_v49  ;;  %v2995_v49 = vld [vmem:[#allocation4 + $0x38] sm:$0xff] }
 0x2e7   :  { %5978 = vmatpush1.bf16.msra.mxu1 %v7821_v61  ;;  %5807 = vmatprep.subr.bf16.mxu0 %v7828_v32  ;;  %v7875_v61 = vcombine.low %v3428_v5, %v3432_v16  ;;  %v7877_v32 = vcombine.low %v3429_v10, %v3433_v18  ;;  %v7442_v21 = vcombine.high %v2991_v40, %v2995_v49  ;;  %v3038_v5 = vld [vmem:[#allocation4 + $0x190] sm:$0xff]  ;;  %v3039_v10 = vld [vmem:[#allocation4 + $0x198] sm:$0xff] }
 0x2e8   :  { %5979 = vmatprep.subr.bf16.mxu1 %v7830_v20  ;;  %5837 = vmatprep.mubr.bf16.mxu0 %v8822_v36  ;;  %v7440_v20 = vcombine.high %v2990_v41, %v2994_v3  ;;  %v3042_v16 = vld [vmem:[#allocation4 + $0x1b0] sm:$0xff]  ;;  %v3043_v18 = vld [vmem:[#allocation4 + $0x1b8] sm:$0xff] }
 0x2e9   :  { %6009 = vmatprep.mubr.bf16.mxu1 %v8822_v36  ;;  %v3046_v41 = vld [vmem:[#allocation4 + $0x1d0] sm:$0xff] }
 0x2ea   :  { %5808 = vmatpush1.bf16.msra.mxu0 %v7827_v54  ;;  %v2999_v54 = vld [vmem:[#allocation4 + $0x58] sm:$0xff]  ;;  %v3050_v3 = vld [vmem:[#allocation4 + $0x1f0] sm:$0xff] }
 0x2eb   :  { %5980 = vmatpush1.bf16.msra.mxu1 %v7829_v47  ;;  %5809 = vmatprep.subr.bf16.mxu0 %v7836_v14  ;;  %v3003_v47 = vld [vmem:[#allocation4 + $0x78] sm:$0xff]  ;;  %v7441_v14 = vcombine.low %v2991_v40, %v2995_v49 }
 0x2ec   :  { %5981 = vmatprep.subr.bf16.mxu1 %v7838_v28  ;;  %v7448_v28 = vcombine.high %v2998_v26, %v3002_v30  ;;  %v7450_v22 = vcombine.high %v2999_v54, %v3003_v47  ;;  %v3047_v40 = vld [vmem:[#allocation4 + $0x1d8] sm:$0xff] }
 0x2ed   :  { %v3051_v49 = vld [vmem:[#allocation4 + $0x1f8] sm:$0xff] }
 0x2ee   :  { %5810 = vmatpush1.bf16.msra.mxu0 %v7835_v60  ;;  %v3011_v60 = vld [vmem:[#allocation4 + $0xb8] sm:$0xff] }
 0x2ef   :  { %5982 = vmatpush1.bf16.msra.mxu1 %v7837_v38  ;;  %5811 = vmatprep.subr.bf16.mxu0 %v7844_v55  ;;  %v7447_v38 = vcombine.low %v2998_v26, %v3002_v30  ;;  %v7449_v55 = vcombine.low %v2999_v54, %v3003_v47  ;;  %v7458_v23 = vcombine.high %v3007_v19, %v3011_v60  ;;  %v3054_v26 = vld [vmem:[#allocation4 + $0x210] sm:$0xff]  ;;  %v3059_v54 = vld [vmem:[#allocation4 + $0x238] sm:$0xff] }
 0x2f0   :  { %5983 = vmatprep.subr.bf16.mxu1 %v7846_v62  ;;  %v7456_v62 = vcombine.high %v3006_v33, %v3010_v0  ;;  %v3058_v30 = vld [vmem:[#allocation4 + $0x230] sm:$0xff]  ;;  %v7495_v47 = vcombine.low %v3046_v41, %v3050_v3 }
 0x2f2   :  { %5812 = vmatpush1.bf16.msra.mxu0 %v7843_v46  ;;  %v3019_v46 = vld [vmem:[#allocation4 + $0xf8] sm:$0xff] }
 0x2f3   :  { %5984 = vmatpush1.bf16.msra.mxu1 %v7845_v2  ;;  %5813 = vmatprep.subr.bf16.mxu0 %v7852_v7  ;;  %v7455_v2 = vcombine.low %v3006_v33, %v3010_v0  ;;  %v7457_v7 = vcombine.low %v3007_v19, %v3011_v60  ;;  %v7466_v50 = vcombine.high %v3015_v1, %v3019_v46  ;;  %v3062_v0 = vld [vmem:[#allocation4 + $0x250] sm:$0xff]  ;;  %v3063_v19 = vld [vmem:[#allocation4 + $0x258] sm:$0xff] }
 0x2f4   :  { %5985 = vmatprep.subr.bf16.mxu1 %v7854_v9  ;;  %v7464_v9 = vcombine.high %v3014_v13, %v3018_v39  ;;  %v3067_v60 = vld [vmem:[#allocation4 + $0x278] sm:$0xff] }
 0x2f6   :  { %5814 = vmatpush1.bf16.msra.mxu0 %v7851_v12  ;;  %v3027_v12 = vld [vmem:[#allocation4 + $0x138] sm:$0xff] }
 0x2f7   :  { %5986 = vmatpush1.bf16.msra.mxu1 %v7853_v63  ;;  %5815 = vmatprep.subr.bf16.mxu0 %v7860_v17  ;;  %v7465_v63 = vcombine.low %v3015_v1, %v3019_v46  ;;  %v7472_v17 = vcombine.high %v3022_v29, %v3026_v59  ;;  %v3071_v1 = vld [vmem:[#allocation4 + $0x298] sm:$0xff] }
 0x2f8   :  { %5987 = vmatprep.subr.bf16.mxu1 %v7862_v6  ;;  %v7474_v6 = vcombine.high %v3023_v53, %v3027_v12  ;;  %v3075_v46 = vld [vmem:[#allocation4 + $0x2b8] sm:$0xff] }
 0x2fa   :  { %5816 = vmatpush1.bf16.msra.mxu0 %v7859_v31  ;;  %v7471_v31 = vcombine.low %v3022_v29, %v3026_v59  ;;  %v3078_v29 = vld [vmem:[#allocation4 + $0x2d0] sm:$0xff] }
 0x2fb   :  { %5988 = vmatpush1.bf16.msra.mxu1 %v7861_v11  ;;  %5817 = vmatprep.subr.bf16.mxu0 %v7868_v8  ;;  %v7473_v11 = vcombine.low %v3023_v53, %v3027_v12  ;;  %v7480_v8 = vcombine.high %v3030_v45, %v3034_v57  ;;  %v3082_v59 = vld [vmem:[#allocation4 + $0x2f0] sm:$0xff]  ;;  %v3079_v53 = vld [vmem:[#allocation4 + $0x2d8] sm:$0xff] }
 0x2fc   :  { %5989 = vmatprep.subr.bf16.mxu1 %v7870_v37  ;;  %v7482_v37 = vcombine.high %v3031_v34, %v3035_v58  ;;  %v3083_v12 = vld [vmem:[#allocation4 + $0x2f8] sm:$0xff] }
 0x2fe   :  { %5818 = vmatpush1.bf16.msra.mxu0 %v7867_v35  ;;  %v7479_v35 = vcombine.low %v3030_v45, %v3034_v57  ;;  %v3086_v45 = vld [vmem:[#allocation4 + $0x310] sm:$0xff] }
 0x2ff   :  { %5990 = vmatpush1.bf16.msra.mxu1 %v7869_v42  ;;  %5819 = vmatprep.subr.bf16.mxu0 %v7876_v25  ;;  %v7481_v42 = vcombine.low %v3031_v34, %v3035_v58  ;;  %v7488_v25 = vcombine.high %v3038_v5, %v3042_v16  ;;  %v3090_v57 = vld [vmem:[#allocation4 + $0x330] sm:$0xff]  ;;  %v3087_v34 = vld [vmem:[#allocation4 + $0x318] sm:$0xff] }
 0x300   :  { %5991 = vmatprep.subr.bf16.mxu1 %v7878_v56  ;;  %v7490_v56 = vcombine.high %v3039_v10, %v3043_v18  ;;  %v3091_v58 = vld [vmem:[#allocation4 + $0x338] sm:$0xff] }
 0x302   :  { %5820 = vmatpush1.bf16.msra.mxu0 %v7875_v61  ;;  %v7487_v61 = vcombine.low %v3038_v5, %v3042_v16  ;;  %v3094_v5 = vld [vmem:[#allocation4 + $0x350] sm:$0xff] }
 0x303   :  { %5992 = vmatpush1.bf16.msra.mxu1 %v7877_v32  ;;  %6020 = vmatprep.subr.bf16.mxu0 %v7440_v20  ;;  %v7489_v32 = vcombine.low %v3039_v10, %v3043_v18  ;;  %v7496_v20 = vcombine.high %v3046_v41, %v3050_v3  ;;  %v3098_v16 = vld [vmem:[#allocation4 + $0x370] sm:$0xff]  ;;  %v3095_v10 = vld [vmem:[#allocation4 + $0x358] sm:$0xff] }
 0x304   :  { %6192 = vmatprep.subr.bf16.mxu1 %v7442_v21  ;;  %v7498_v21 = vcombine.high %v3047_v40, %v3051_v49  ;;  %v3099_v18 = vld [vmem:[#allocation4 + $0x378] sm:$0xff]  ;;  %v3102_v41 = vld [vmem:[#allocation4 + $0x390] sm:$0xff] }
 0x305   :  { %5838 = vmatmul.mubr.bf16.vlgmr.msra.gmra.mrb[28].mxu0 %v9240_v27  ;;  %v3106_v3 = vld [vmem:[#allocation4 + $0x3b0] sm:$0xff] }
 0x306   :  { %6010 = vmatmul.mubr.bf16.vlgmr.msra.gmra.mrb[28].mxu1 %v9240_v27  ;;  %6021 = vmatpush1.bf16.msra.mxu0 %v7439_v48  ;;  %v3055_v48 = vld [vmem:[#allocation4 + $0x218] sm:$0xff] }
 0x307   :  { %6052 = vmatprep.mubr.bf16.mxu0 %v9158_v51  ;;  %6193 = vmatpush1.bf16.msra.mxu1 %v7441_v14  ;;  %v7497_v14 = vcombine.low %v3047_v40, %v3051_v49  ;;  %v7506_v33 = vcombine.high %v3055_v48, %v3059_v54  ;;  %v3103_v40 = vld [vmem:[#allocation4 + $0x398] sm:$0xff] }
 0x308   :  { %6224 = vmatprep.mubr.bf16.mxu1 %v9158_v51  ;;  %6022 = vmatprep.subr.bf16.mxu0 %v7448_v28  ;;  %v7463_v51 = vcombine.low %v3014_v13, %v3018_v39  ;;  %v7504_v28 = vcombine.high %v3054_v26, %v3058_v30  ;;  %v3070_v13 = vld [vmem:[#allocation4 + $0x290] sm:$0xff]  ;;  %v3107_v49 = vld [vmem:[#allocation4 + $0x3b8] sm:$0xff] }
 0x309   :  { %6194 = vmatprep.subr.bf16.mxu1 %v7450_v22  ;;  %v3066_v22 = vld [vmem:[#allocation4 + $0x270] sm:$0xff] }
 0x30a   :  { %6023 = vmatpush1.bf16.msra.mxu0 %v7447_v38  ;;  %v7503_v38 = vcombine.low %v3054_v26, %v3058_v30  ;;  %v3074_v39 = vld [vmem:[#allocation4 + $0x2b0] sm:$0xff] }
 0x30b   :  { %6195 = vmatpush1.bf16.msra.mxu1 %v7449_v55  ;;  %6024 = vmatprep.subr.bf16.mxu0 %v7456_v62  ;;  %v7505_v55 = vcombine.low %v3055_v48, %v3059_v54  ;;  %v7512_v62 = vcombine.high %v3062_v0, %v3066_v22  ;;  %v3110_v26 = vld [vmem:[#allocation4 + $0x3d0] sm:$0xff]  ;;  %v3111_v48 = vld [vmem:[#allocation4 + $0x3d8] sm:$0xff] }
 0x30c   :  { %6196 = vmatprep.subr.bf16.mxu1 %v7458_v23  ;;  %v7514_v23 = vcombine.high %v3063_v19, %v3067_v60  ;;  %v3114_v30 = vld [vmem:[#allocation4 + $0x3f0] sm:$0xff]  ;;  %v3115_v54 = vld [vmem:[#allocation4 + $0x3f8] sm:$0xff] }
 0x30e   :  { %6025 = vmatpush1.bf16.msra.mxu0 %v7455_v2  ;;  %v7511_v2 = vcombine.low %v3062_v0, %v3066_v22  ;;  %v3118_v0 = vld [vmem:[#allocation4 + $0x410] sm:$0xff] }
 0x30f   :  { %6197 = vmatpush1.bf16.msra.mxu1 %v7457_v7  ;;  %6026 = vmatprep.subr.bf16.mxu0 %v7464_v9  ;;  %v7513_v7 = vcombine.low %v3063_v19, %v3067_v60  ;;  %v7520_v9 = vcombine.high %v3070_v13, %v3074_v39  ;;  %v3122_v22 = vld [vmem:[#allocation4 + $0x430] sm:$0xff]  ;;  %v3119_v19 = vld [vmem:[#allocation4 + $0x418] sm:$0xff] }
 0x310   :  { %6198 = vmatprep.subr.bf16.mxu1 %v7466_v50  ;;  %v7522_v50 = vcombine.high %v3071_v1, %v3075_v46  ;;  %v3123_v60 = vld [vmem:[#allocation4 + $0x438] sm:$0xff] }
 0x312   :  { %6027 = vmatpush1.bf16.msra.mxu0 %v7463_v51  ;;  %v7519_v51 = vcombine.low %v3070_v13, %v3074_v39  ;;  %v3126_v13 = vld [vmem:[#allocation4 + $0x450] sm:$0xff] }
 0x313   :  { %6199 = vmatpush1.bf16.msra.mxu1 %v7465_v63  ;;  %6028 = vmatprep.subr.bf16.mxu0 %v7472_v17  ;;  %v7521_v63 = vcombine.low %v3071_v1, %v3075_v46  ;;  %v7528_v17 = vcombine.high %v3078_v29, %v3082_v59  ;;  %v3130_v39 = vld [vmem:[#allocation4 + $0x470] sm:$0xff]  ;;  %v7567_v1 = vcombine.low %v3118_v0, %v3122_v22  ;;  %v3127_v46 = vld [vmem:[#allocation4 + $0x458] sm:$0xff] }
 0x314   :  { %6200 = vmatprep.subr.bf16.mxu1 %v7474_v6  ;;  %v7530_v6 = vcombine.high %v3079_v53, %v3083_v12 }
 0x316   :  { %6029 = vmatpush1.bf16.msra.mxu0 %v7471_v31  ;;  %v7527_v31 = vcombine.low %v3078_v29, %v3082_v59  ;;  %v3138_v29 = vld [vmem:[#allocation4 + $0x4b0] sm:$0xff] }
 0x317   :  { %6201 = vmatpush1.bf16.msra.mxu1 %v7473_v11  ;;  %6030 = vmatprep.subr.bf16.mxu0 %v7480_v8  ;;  %v7529_v11 = vcombine.low %v3079_v53, %v3083_v12  ;;  %v7536_v8 = vcombine.high %v3086_v45, %v3090_v57  ;;  %v3135_v53 = vld [vmem:[#allocation4 + $0x498] sm:$0xff] }
 0x318   :  { %6202 = vmatprep.subr.bf16.mxu1 %v7482_v37  ;;  %v7538_v37 = vcombine.high %v3087_v34, %v3091_v58  ;;  %v3139_v12 = vld [vmem:[#allocation4 + $0x4b8] sm:$0xff] }
 0x31a   :  { %6031 = vmatpush1.bf16.msra.mxu0 %v7479_v35  ;;  %v7535_v35 = vcombine.low %v3086_v45, %v3090_v57  ;;  %v3142_v45 = vld [vmem:[#allocation4 + $0x4d0] sm:$0xff] }
 0x31b   :  { %6203 = vmatpush1.bf16.msra.mxu1 %v7481_v42  ;;  %6032 = vmatprep.subr.bf16.mxu0 %v7488_v25  ;;  %v7537_v42 = vcombine.low %v3087_v34, %v3091_v58  ;;  %v7544_v25 = vcombine.high %v3094_v5, %v3098_v16  ;;  %v3146_v57 = vld [vmem:[#allocation4 + $0x4f0] sm:$0xff]  ;;  %v3143_v34 = vld [vmem:[#allocation4 + $0x4d8] sm:$0xff] }
 0x31c   :  { %6204 = vmatprep.subr.bf16.mxu1 %v7490_v56  ;;  %v7546_v56 = vcombine.high %v3095_v10, %v3099_v18  ;;  %v3147_v58 = vld [vmem:[#allocation4 + $0x4f8] sm:$0xff] }
 0x31e   :  { %6033 = vmatpush1.bf16.msra.mxu0 %v7487_v61  ;;  %v7543_v61 = vcombine.low %v3094_v5, %v3098_v16  ;;  %v3154_v5 = vld [vmem:[#allocation4 + $0x530] sm:$0xff]  ;;  %v3151_v16 = vld [vmem:[#allocation4 + $0x518] sm:$0xff] }
 0x31f   :  { %6205 = vmatpush1.bf16.msra.mxu1 %v7489_v32  ;;  %6034 = vmatprep.subr.bf16.mxu0 %v7496_v20  ;;  %v7545_v32 = vcombine.low %v3095_v10, %v3099_v18  ;;  %v7552_v20 = vcombine.high %v3102_v41, %v3106_v3  ;;  %v3155_v10 = vld [vmem:[#allocation4 + $0x538] sm:$0xff]  ;;  %v7593_v18 = vcombine.low %v3143_v34, %v3147_v58 }
 0x320   :  { %6206 = vmatprep.subr.bf16.mxu1 %v7498_v21  ;;  %v7554_v21 = vcombine.high %v3103_v40, %v3107_v49 }
 0x322   :  { %6035 = vmatpush1.bf16.msra.mxu0 %v7495_v47  ;;  %v7551_v47 = vcombine.low %v3102_v41, %v3106_v3  ;;  %v3159_v41 = vld [vmem:[#allocation4 + $0x558] sm:$0xff] }
 0x323   :  { %6207 = vmatpush1.bf16.msra.mxu1 %v7497_v14  ;;  %6036 = vmatprep.subr.bf16.mxu0 %v7504_v28  ;;  %v7553_v14 = vcombine.low %v3103_v40, %v3107_v49  ;;  %v7560_v28 = vcombine.high %v3110_v26, %v3114_v30  ;;  %v3163_v3 = vld [vmem:[#allocation4 + $0x578] sm:$0xff]  ;;  %v7601_v49 = vcombine.low %v3151_v16, %v3155_v10 }
 0x324   :  { %6208 = vmatprep.subr.bf16.mxu1 %v7506_v33  ;;  %v7562_v33 = vcombine.high %v3111_v48, %v3115_v54 }
 0x326   :  { %6037 = vmatpush1.bf16.msra.mxu0 %v7503_v38  ;;  %v7559_v38 = vcombine.low %v3110_v26, %v3114_v30  ;;  %v3167_v26 = vld [vmem:[#allocation4 + $0x598] sm:$0xff] }
 0x327   :  { %6209 = vmatpush1.bf16.msra.mxu1 %v7505_v55  ;;  %6038 = vmatprep.subr.bf16.mxu0 %v7512_v62  ;;  %v7561_v55 = vcombine.low %v3111_v48, %v3115_v54  ;;  %v7568_v62 = vcombine.high %v3118_v0, %v3122_v22  ;;  %v3171_v30 = vld [vmem:[#allocation4 + $0x5b8] sm:$0xff]  ;;  %v7609_v54 = vcombine.low %v3159_v41, %v3163_v3 }
 0x328   :  { %6210 = vmatprep.subr.bf16.mxu1 %v7514_v23  ;;  %v7570_v23 = vcombine.high %v3119_v19, %v3123_v60  ;;  %v3175_v0 = vld [vmem:[#allocation4 + $0x5d8] sm:$0xff] }
 0x329   :  { %v3179_v22 = vld [vmem:[#allocation4 + $0x5f8] sm:$0xff] }
 0x32a   :  { %6039 = vmatpush1.bf16.msra.mxu0 %v7511_v2  ;;  %v3131_v2 = vld [vmem:[#allocation4 + $0x478] sm:$0xff] }
 0x32b   :  { %6211 = vmatpush1.bf16.msra.mxu1 %v7513_v7  ;;  %6040 = vmatprep.subr.bf16.mxu0 %v7520_v9  ;;  %v7569_v7 = vcombine.low %v3119_v19, %v3123_v60  ;;  %v7576_v9 = vcombine.high %v3126_v13, %v3130_v39  ;;  %v7578_v59 = vcombine.high %v3127_v46, %v3131_v2 }
 0x32c   :  { %6212 = vmatprep.subr.bf16.mxu1 %v7522_v50  ;;  %v3134_v50 = vld [vmem:[#allocation4 + $0x490] sm:$0xff]  ;;  %v7617_v60 = vcombine.low %v3167_v26, %v3171_v30 }
 0x32e   :  { %6041 = vmatpush1.bf16.msra.mxu0 %v7519_v51  ;;  %v7575_v51 = vcombine.low %v3126_v13, %v3130_v39  ;;  %v3183_v13 = vld [vmem:[#allocation4 + $0x618] sm:$0xff] }
 0x32f   :  { %6213 = vmatpush1.bf16.msra.mxu1 %v7521_v63  ;;  %6042 = vmatprep.subr.bf16.mxu0 %v7528_v17  ;;  %v7577_v63 = vcombine.low %v3127_v46, %v3131_v2  ;;  %v7584_v17 = vcombine.high %v3134_v50, %v3138_v29  ;;  %v3187_v39 = vld [vmem:[#allocation4 + $0x638] sm:$0xff]  ;;  %v7625_v46 = vcombine.low %v3175_v0, %v3179_v22 }
 0x330   :  { %6214 = vmatprep.subr.bf16.mxu1 %v7530_v6  ;;  %v7586_v6 = vcombine.high %v3135_v53, %v3139_v12 }
 0x332   :  { %6043 = vmatpush1.bf16.msra.mxu0 %v7527_v31  ;;  %v7583_v31 = vcombine.low %v3134_v50, %v3138_v29  ;;  %v3194_v50 = vld [vmem:[#allocation4 + $0x670] sm:$0xff]  ;;  %v3191_v29 = vld [vmem:[#allocation4 + $0x658] sm:$0xff] }
 0x333   :  { %6215 = vmatpush1.bf16.msra.mxu1 %v7529_v11  ;;  %6044 = vmatprep.subr.bf16.mxu0 %v7536_v8  ;;  %v7592_v11 = vcombine.high %v3142_v45, %v3146_v57  ;;  %v7594_v8 = vcombine.high %v3143_v34, %v3147_v58 }
 0x334   :  { %6216 = vmatprep.subr.bf16.mxu1 %v7538_v37  ;;  %v3150_v37 = vld [vmem:[#allocation4 + $0x510] sm:$0xff] }
 0x335   :  { %v7599_v40 = vcombine.low %v3150_v37, %v3154_v5 }
 0x336   :  { %6045 = vmatpush1.bf16.msra.mxu0 %v7535_v35  ;;  %v7600_v35 = vcombine.high %v3150_v37, %v3154_v5  ;;  %v3207_v37 = vld [vmem:[#allocation4 + $0x6d8] sm:$0xff] }
 0x337   :  { %6217 = vmatpush1.bf16.msra.mxu1 %v7537_v42  ;;  %6046 = vmatprep.subr.bf16.mxu0 %v7544_v25  ;;  %v7602_v42 = vcombine.high %v3151_v16, %v3155_v10  ;;  %v3158_v25 = vld [vmem:[#allocation4 + $0x550] sm:$0xff]  ;;  %v3211_v5 = vld [vmem:[#allocation4 + $0x6f8] sm:$0xff] }
 0x338   :  { %6218 = vmatprep.subr.bf16.mxu1 %v7546_v56  ;;  %v3162_v56 = vld [vmem:[#allocation4 + $0x570] sm:$0xff] }
 0x339   :  { %v7607_v48 = vcombine.low %v3158_v25, %v3162_v56 }
 0x33a   :  { %6047 = vmatpush1.bf16.msra.mxu0 %v7543_v61  ;;  %v7608_v61 = vcombine.high %v3158_v25, %v3162_v56  ;;  %v3215_v25 = vld [vmem:[#allocation4 + $0x718] sm:$0xff] }
 0x33b   :  { %6219 = vmatpush1.bf16.msra.mxu1 %v7545_v32  ;;  %6048 = vmatprep.subr.bf16.mxu0 %v7552_v20  ;;  %v7610_v32 = vcombine.high %v3159_v41, %v3163_v3  ;;  %v3166_v20 = vld [vmem:[#allocation4 + $0x590] sm:$0xff]  ;;  %v3219_v56 = vld [vmem:[#allocation4 + $0x738] sm:$0xff]  ;;  %v7657_v3 = vcombine.low %v3207_v37, %v3211_v5 }
 0x33c   :  { %6220 = vmatprep.subr.bf16.mxu1 %v7554_v21  ;;  %v3170_v21 = vld [vmem:[#allocation4 + $0x5b0] sm:$0xff] }
 0x33d   :  { %v7615_v19 = vcombine.low %v3166_v20, %v3170_v21 }
 0x33e   :  { %6049 = vmatpush1.bf16.msra.mxu0 %v7551_v47  ;;  %v7616_v47 = vcombine.high %v3166_v20, %v3170_v21  ;;  %v3223_v20 = vld [vmem:[#allocation4 + $0x758] sm:$0xff] }
 0x33f   :  { %6221 = vmatpush1.bf16.msra.mxu1 %v7553_v14  ;;  %6050 = vmatprep.subr.bf16.mxu0 %v7560_v28  ;;  %v7618_v14 = vcombine.high %v3167_v26, %v3171_v30  ;;  %v3174_v28 = vld [vmem:[#allocation4 + $0x5d0] sm:$0xff]  ;;  %v3227_v21 = vld [vmem:[#allocation4 + $0x778] sm:$0xff]  ;;  %v7665_v30 = vcombine.low %v3215_v25, %v3219_v56 }
 0x340   :  { %6222 = vmatprep.subr.bf16.mxu1 %v7562_v33  ;;  %v3178_v33 = vld [vmem:[#allocation4 + $0x5f0] sm:$0xff] }
 0x342   :  { %6051 = vmatpush1.bf16.msra.mxu0 %v7559_v38  ;;  %v7624_v38 = vcombine.high %v3174_v28, %v3178_v33 }
 0x343   :  { %6223 = vmatpush1.bf16.msra.mxu1 %v7561_v55  ;;  %6063 = vmatprep.subr.bf16.mxu0 %v7568_v62  ;;  %v7626_v55 = vcombine.high %v3175_v0, %v3179_v22  ;;  %v3182_v62 = vld [vmem:[#allocation4 + $0x610] sm:$0xff]  ;;  %v7673_v22 = vcombine.low %v3223_v20, %v3227_v21 }
 0x344   :  { %6235 = vmatprep.subr.bf16.mxu1 %v7570_v23  ;;  %v3186_v23 = vld [vmem:[#allocation4 + $0x630] sm:$0xff] }
 0x345   :  { %6053 = vmatmul.mubr.bf16.vlgmr.msra.gmra.mrb[32].mxu0 %v9160_v4  ;;  %v7632_v2 = vcombine.high %v3182_v62, %v3186_v23 }
 0x346   :  { %6225 = vmatmul.mubr.bf16.vlgmr.msra.gmra.mrb[32].mxu1 %v9160_v4  ;;  %6064 = vmatpush1.bf16.msra.mxu0 %v7567_v1  ;;  %v7585_v4 = vcombine.low %v3135_v53, %v3139_v12  ;;  %v7623_v1 = vcombine.low %v3174_v28, %v3178_v33  ;;  %v7631_v53 = vcombine.low %v3182_v62, %v3186_v23  ;;  %v3231_v28 = vld [vmem:[#allocation4 + $0x798] sm:$0xff] }
 0x347   :  { %6095 = vmatprep.mubr.bf16.mxu0 %v9234_v43  ;;  %6236 = vmatpush1.bf16.msra.mxu1 %v7569_v7  ;;  %v7634_v7 = vcombine.high %v3183_v13, %v3187_v39  ;;  %v7633_v12 = vcombine.low %v3183_v13, %v3187_v39  ;;  %v3235_v33 = vld [vmem:[#allocation4 + $0x7b8] sm:$0xff] }
 0x348   :  { %6267 = vmatprep.mubr.bf16.mxu1 %v9234_v43  ;;  %6065 = vmatprep.subr.bf16.mxu0 %v7576_v9  ;;  %v7591_v43 = vcombine.low %v3142_v45, %v3146_v57  ;;  %v3190_v9 = vld [vmem:[#allocation4 + $0x650] sm:$0xff]  ;;  %v3199_v45 = vld [vmem:[#allocation4 + $0x698] sm:$0xff]  ;;  %v7681_v39 = vcombine.low %v3231_v28, %v3235_v33 }
 0x349   :  { %6237 = vmatprep.subr.bf16.mxu1 %v7578_v59  ;;  %v3195_v59 = vld [vmem:[#allocation4 + $0x678] sm:$0xff]  ;;  %v7639_v34 = vcombine.low %v3190_v9, %v3194_v50 }
 0x34a   :  { %6066 = vmatpush1.bf16.msra.mxu0 %v7575_v51  ;;  %v7640_v51 = vcombine.high %v3190_v9, %v3194_v50  ;;  %v3203_v57 = vld [vmem:[#allocation4 + $0x6b8] sm:$0xff]  ;;  %v7641_v58 = vcombine.low %v3191_v29, %v3195_v59 }
 0x34b   :  { %6238 = vmatpush1.bf16.msra.mxu1 %v7577_v63  ;;  %6067 = vmatprep.subr.bf16.mxu0 %v7584_v17  ;;  %v7642_v63 = vcombine.high %v3191_v29, %v3195_v59  ;;  %v3198_v17 = vld [vmem:[#allocation4 + $0x690] sm:$0xff]  ;;  %v7649_v10 = vcombine.low %v3199_v45, %v3203_v57  ;;  %v3239_v62 = vld [vmem:[#allocation4 + $0x7d8] sm:$0xff] }
 0x34c   :  { %6239 = vmatprep.subr.bf16.mxu1 %v7586_v6  ;;  %v3202_v6 = vld [vmem:[#allocation4 + $0x6b0] sm:$0xff]  ;;  %v3243_v23 = vld [vmem:[#allocation4 + $0x7f8] sm:$0xff] }
 0x34d   :  { %v7647_v16 = vcombine.low %v3198_v17, %v3202_v6  ;;  %v3247_v9 = vld [vmem:[#allocation4 + $0x818] sm:$0xff]  ;;  %v7689_v59 = vcombine.low %v3239_v62, %v3243_v23 }
 0x34e   :  { %6068 = vmatpush1.bf16.msra.mxu0 %v7583_v31  ;;  %v7648_v31 = vcombine.high %v3198_v17, %v3202_v6  ;;  %v3251_v50 = vld [vmem:[#allocation4 + $0x838] sm:$0xff] }
 0x34f   :  { %6240 = vmatpush1.bf16.msra.mxu1 %v7585_v4  ;;  %6069 = vmatprep.subr.bf16.mxu0 %v7592_v11  ;;  %v7650_v4 = vcombine.high %v3199_v45, %v3203_v57  ;;  %v3206_v11 = vld [vmem:[#allocation4 + $0x6d0] sm:$0xff]  ;;  %v3255_v6 = vld [vmem:[#allocation4 + $0x858] sm:$0xff]  ;;  %v7697_v57 = vcombine.low %v3247_v9, %v3251_v50 }
 0x350   :  { %6241 = vmatprep.subr.bf16.mxu1 %v7594_v8  ;;  %v3210_v8 = vld [vmem:[#allocation4 + $0x6f0] sm:$0xff]  ;;  %v3259_v45 = vld [vmem:[#allocation4 + $0x878] sm:$0xff] }
 0x351   :  { %v7655_v41 = vcombine.low %v3206_v11, %v3210_v8 }
 0x352   :  { %6070 = vmatpush1.bf16.msra.mxu0 %v7591_v43  ;;  %v7656_v43 = vcombine.high %v3206_v11, %v3210_v8  ;;  %v3263_v11 = vld [vmem:[#allocation4 + $0x898] sm:$0xff] }
 0x353   :  { %6242 = vmatpush1.bf16.msra.mxu1 %v7593_v18  ;;  %6071 = vmatprep.subr.bf16.mxu0 %v7600_v35  ;;  %v7658_v18 = vcombine.high %v3207_v37, %v3211_v5  ;;  %v3214_v35 = vld [vmem:[#allocation4 + $0x710] sm:$0xff]  ;;  %v3267_v8 = vld [vmem:[#allocation4 + $0x8b8] sm:$0xff]  ;;  %v7705_v5 = vcombine.low %v3255_v6, %v3259_v45 }
 0x354   :  { %6243 = vmatprep.subr.bf16.mxu1 %v7602_v42  ;;  %v3218_v42 = vld [vmem:[#allocation4 + $0x730] sm:$0xff] }
 0x355   :  { %v7663_v26 = vcombine.low %v3214_v35, %v3218_v42 }
 0x356   :  { %6072 = vmatpush1.bf16.msra.mxu0 %v7599_v40  ;;  %v7664_v40 = vcombine.high %v3214_v35, %v3218_v42  ;;  %v3271_v35 = vld [vmem:[#allocation4 + $0x8d8] sm:$0xff] }
 0x357   :  { %6244 = vmatpush1.bf16.msra.mxu1 %v7601_v49  ;;  %6073 = vmatprep.subr.bf16.mxu0 %v7608_v61  ;;  %v7666_v49 = vcombine.high %v3215_v25, %v3219_v56  ;;  %v3222_v61 = vld [vmem:[#allocation4 + $0x750] sm:$0xff]  ;;  %v3275_v42 = vld [vmem:[#allocation4 + $0x8f8] sm:$0xff] }
 0x358   :  { %6245 = vmatprep.subr.bf16.mxu1 %v7610_v32  ;;  %v3226_v32 = vld [vmem:[#allocation4 + $0x770] sm:$0xff] }
 0x359   :  { %v7671_v0 = vcombine.low %v3222_v61, %v3226_v32 }
 0x35a   :  { %6074 = vmatpush1.bf16.msra.mxu0 %v7607_v48  ;;  %v7672_v48 = vcombine.high %v3222_v61, %v3226_v32  ;;  %v3283_v61 = vld [vmem:[#allocation4 + $0x938] sm:$0xff]  ;;  %v7721_v32 = vcombine.low %v3271_v35, %v3275_v42 }
 0x35b   :  { %6246 = vmatpush1.bf16.msra.mxu1 %v7609_v54  ;;  %6075 = vmatprep.subr.bf16.mxu0 %v7616_v47  ;;  %v7674_v54 = vcombine.high %v3223_v20, %v3227_v21  ;;  %v3230_v47 = vld [vmem:[#allocation4 + $0x790] sm:$0xff] }
 0x35c   :  { %6247 = vmatprep.subr.bf16.mxu1 %v7618_v14  ;;  %v3234_v14 = vld [vmem:[#allocation4 + $0x7b0] sm:$0xff] }
 0x35d   :  { %v7679_v13 = vcombine.low %v3230_v47, %v3234_v14 }
 0x35e   :  { %6076 = vmatpush1.bf16.msra.mxu0 %v7615_v19  ;;  %v7680_v19 = vcombine.high %v3230_v47, %v3234_v14 }
 0x35f   :  { %6248 = vmatpush1.bf16.msra.mxu1 %v7617_v60  ;;  %6077 = vmatprep.subr.bf16.mxu0 %v7624_v38  ;;  %v7682_v60 = vcombine.high %v3231_v28, %v3235_v33  ;;  %v3238_v38 = vld [vmem:[#allocation4 + $0x7d0] sm:$0xff] }
 0x360   :  { %6249 = vmatprep.subr.bf16.mxu1 %v7626_v55  ;;  %v3242_v55 = vld [vmem:[#allocation4 + $0x7f0] sm:$0xff] }
 0x361   :  { %v7687_v29 = vcombine.low %v3238_v38, %v3242_v55 }
 0x362   :  { %6078 = vmatpush1.bf16.msra.mxu0 %v7623_v1  ;;  %v7688_v1 = vcombine.high %v3238_v38, %v3242_v55 }
 0x363   :  { %6250 = vmatpush1.bf16.msra.mxu1 %v7625_v46  ;;  %6079 = vmatprep.subr.bf16.mxu0 %v7632_v2  ;;  %v7690_v46 = vcombine.high %v3239_v62, %v3243_v23  ;;  %v3246_v2 = vld [vmem:[#allocation4 + $0x810] sm:$0xff] }
 0x364   :  { %6251 = vmatprep.subr.bf16.mxu1 %v7634_v7  ;;  %v3250_v7 = vld [vmem:[#allocation4 + $0x830] sm:$0xff] }
 0x365   :  { %v7695_v17 = vcombine.low %v3246_v2, %v3250_v7 }
 0x366   :  { %6080 = vmatpush1.bf16.msra.mxu0 %v7631_v53  ;;  %v7696_v53 = vcombine.high %v3246_v2, %v3250_v7 }
 0x367   :  { %6252 = vmatpush1.bf16.msra.mxu1 %v7633_v12  ;;  %6081 = vmatprep.subr.bf16.mxu0 %v7640_v51  ;;  %v7698_v12 = vcombine.high %v3247_v9, %v3251_v50  ;;  %v3254_v51 = vld [vmem:[#allocation4 + $0x850] sm:$0xff] }
 0x368   :  { %6253 = vmatprep.subr.bf16.mxu1 %v7642_v63  ;;  %v3258_v63 = vld [vmem:[#allocation4 + $0x870] sm:$0xff] }
 0x369   :  { %v7703_v37 = vcombine.low %v3254_v51, %v3258_v63 }
 0x36a   :  { %6082 = vmatpush1.bf16.msra.mxu0 %v7639_v34  ;;  %v7704_v34 = vcombine.high %v3254_v51, %v3258_v63 }
 0x36b   :  { %6254 = vmatpush1.bf16.msra.mxu1 %v7641_v58  ;;  %6083 = vmatprep.subr.bf16.mxu0 %v7648_v31  ;;  %v3262_v58 = vld [vmem:[#allocation4 + $0x890] sm:$0xff] }
 0x36c   :  { %6255 = vmatprep.subr.bf16.mxu1 %v7650_v4  ;;  %v3266_v31 = vld [vmem:[#allocation4 + $0x8b0] sm:$0xff]  ;;  %v7706_v4 = vcombine.high %v3255_v6, %v3259_v45 }
 0x36d   :  { %v7711_v25 = vcombine.low %v3262_v58, %v3266_v31  ;;  %v3318_v45 = vld [vmem:[#allocation4 + $0xa50] sm:$0xff] }
 0x36e   :  { %6084 = vmatpush1.bf16.msra.mxu0 %v7647_v16  ;;  %v7712_v16 = vcombine.high %v3262_v58, %v3266_v31  ;;  %v3323_v58 = vld [vmem:[#allocation4 + $0xa78] sm:$0xff] }
 0x36f   :  { %6256 = vmatpush1.bf16.msra.mxu1 %v7649_v10  ;;  %6085 = vmatprep.subr.bf16.mxu0 %v7656_v43  ;;  %v7714_v10 = vcombine.high %v3263_v11, %v3267_v8  ;;  %v3270_v43 = vld [vmem:[#allocation4 + $0x8d0] sm:$0xff] }
 0x370   :  { %6257 = vmatprep.subr.bf16.mxu1 %v7658_v18  ;;  %v3274_v18 = vld [vmem:[#allocation4 + $0x8f0] sm:$0xff] }
 0x371   :  { %v7720_v56 = vcombine.high %v3270_v43, %v3274_v18 }
 0x372   :  { %6086 = vmatpush1.bf16.msra.mxu0 %v7655_v41  ;;  %v7722_v41 = vcombine.high %v3271_v35, %v3275_v42 }
 0x373   :  { %6258 = vmatpush1.bf16.msra.mxu1 %v7657_v3  ;;  %6087 = vmatprep.subr.bf16.mxu0 %v7664_v40  ;;  %v3278_v3 = vld [vmem:[#allocation4 + $0x910] sm:$0xff] }
 0x374   :  { %6259 = vmatprep.subr.bf16.mxu1 %v7666_v49  ;;  %v3282_v40 = vld [vmem:[#allocation4 + $0x930] sm:$0xff]  ;;  %v3279_v49 = vld [vmem:[#allocation4 + $0x918] sm:$0xff] }
 0x375   :  { %v7728_v20 = vcombine.high %v3278_v3, %v3282_v40  ;;  %v7730_v21 = vcombine.high %v3279_v49, %v3283_v61  ;;  %v7727_v47 = vcombine.low %v3278_v3, %v3282_v40  ;;  %v7729_v14 = vcombine.low %v3279_v49, %v3283_v61 }
 0x376   :  { %6088 = vmatpush1.bf16.msra.mxu0 %v7663_v26  ;;  %v3286_v26 = vld [vmem:[#allocation4 + $0x950] sm:$0xff] }
 0x377   :  { %6260 = vmatpush1.bf16.msra.mxu1 %v7665_v30  ;;  %6089 = vmatprep.subr.bf16.mxu0 %v7672_v48  ;;  %v3290_v30 = vld [vmem:[#allocation4 + $0x970] sm:$0xff]  ;;  %v3287_v48 = vld [vmem:[#allocation4 + $0x958] sm:$0xff] }
 0x378   :  { %6261 = vmatprep.subr.bf16.mxu1 %v7674_v54  ;;  %v3291_v54 = vld [vmem:[#allocation4 + $0x978] sm:$0xff]  ;;  %v7736_v28 = vcombine.high %v3286_v26, %v3290_v30  ;;  %v7735_v38 = vcombine.low %v3286_v26, %v3290_v30 }
 0x379   :  { %v7738_v33 = vcombine.high %v3287_v48, %v3291_v54  ;;  %v7737_v55 = vcombine.low %v3287_v48, %v3291_v54 }
 0x37a   :  { %6090 = vmatpush1.bf16.msra.mxu0 %v7671_v0  ;;  %v3294_v0 = vld [vmem:[#allocation4 + $0x990] sm:$0xff] }
 0x37b   :  { %6262 = vmatpush1.bf16.msra.mxu1 %v7673_v22  ;;  %6091 = vmatprep.subr.bf16.mxu0 %v7680_v19  ;;  %v3298_v22 = vld [vmem:[#allocation4 + $0x9b0] sm:$0xff]  ;;  %v3295_v19 = vld [vmem:[#allocation4 + $0x998] sm:$0xff] }
 0x37c   :  { %6263 = vmatprep.subr.bf16.mxu1 %v7682_v60  ;;  %v3299_v60 = vld [vmem:[#allocation4 + $0x9b8] sm:$0xff]  ;;  %v7744_v62 = vcombine.high %v3294_v0, %v3298_v22  ;;  %v7743_v2 = vcombine.low %v3294_v0, %v3298_v22 }
 0x37d   :  { %v7746_v23 = vcombine.high %v3295_v19, %v3299_v60  ;;  %v7745_v7 = vcombine.low %v3295_v19, %v3299_v60 }
 0x37e   :  { %6092 = vmatpush1.bf16.msra.mxu0 %v7679_v13  ;;  %v3302_v13 = vld [vmem:[#allocation4 + $0x9d0] sm:$0xff] }
 0x37f   :  { %6264 = vmatpush1.bf16.msra.mxu1 %v7681_v39  ;;  %6093 = vmatprep.subr.bf16.mxu0 %v7688_v1  ;;  %v3306_v39 = vld [vmem:[#allocation4 + $0x9f0] sm:$0xff]  ;;  %v3303_v1 = vld [vmem:[#allocation4 + $0x9d8] sm:$0xff] }
 0x380   :  { %6265 = vmatprep.subr.bf16.mxu1 %v7690_v46  ;;  %v3307_v46 = vld [vmem:[#allocation4 + $0x9f8] sm:$0xff]  ;;  %v7752_v9 = vcombine.high %v3302_v13, %v3306_v39  ;;  %v7751_v51 = vcombine.low %v3302_v13, %v3306_v39 }
 0x381   :  { %v7754_v50 = vcombine.high %v3303_v1, %v3307_v46  ;;  %v7753_v63 = vcombine.low %v3303_v1, %v3307_v46 }
 0x382   :  { %6094 = vmatpush1.bf16.msra.mxu0 %v7687_v29  ;;  %v3310_v29 = vld [vmem:[#allocation4 + $0xa10] sm:$0xff] }
 0x383   :  { %6266 = vmatpush1.bf16.msra.mxu1 %v7689_v59  ;;  %6106 = vmatprep.subr.bf16.mxu0 %v7696_v53  ;;  %v3314_v59 = vld [vmem:[#allocation4 + $0xa30] sm:$0xff]  ;;  %v3311_v53 = vld [vmem:[#allocation4 + $0xa18] sm:$0xff] }
 0x384   :  { %6278 = vmatprep.subr.bf16.mxu1 %v7698_v12  ;;  %v3315_v12 = vld [vmem:[#allocation4 + $0xa38] sm:$0xff]  ;;  %v7759_v31 = vcombine.low %v3310_v29, %v3314_v59 }
 0x385   :  { %6096 = vmatmul.mubr.bf16.vlgmr.msra.gmra.mrb[32].mxu0 %v9162_v52  ;;  %v7762_v6 = vcombine.high %v3311_v53, %v3315_v12 }
 0x386   :  { %6268 = vmatmul.mubr.bf16.vlgmr.msra.gmra.mrb[32].mxu1 %v9162_v52  ;;  %6107 = vmatpush1.bf16.msra.mxu0 %v7695_v17  ;;  %v7713_v52 = vcombine.low %v3263_v11, %v3267_v8  ;;  %v7760_v17 = vcombine.high %v3310_v29, %v3314_v59 }
 0x387   :  { %6138 = vmatprep.mubr.bf16.mxu0 %v9236_v15  ;;  %6279 = vmatpush1.bf16.msra.mxu1 %v7697_v57  ;;  %v3322_v57 = vld [vmem:[#allocation4 + $0xa70] sm:$0xff] }
 0x388   :  { %6310 = vmatprep.mubr.bf16.mxu1 %v9236_v15  ;;  %6108 = vmatprep.subr.bf16.mxu0 %v7704_v34  ;;  %v7719_v15 = vcombine.low %v3270_v43, %v3274_v18  ;;  %v3319_v34 = vld [vmem:[#allocation4 + $0xa58] sm:$0xff]  ;;  %v7768_v11 = vcombine.high %v3318_v45, %v3322_v57  ;;  %v7767_v43 = vcombine.low %v3318_v45, %v3322_v57 }
 0x389   :  { %6280 = vmatprep.subr.bf16.mxu1 %v7706_v4  ;;  %v7761_v4 = vcombine.low %v3311_v53, %v3315_v12  ;;  %v7770_v8 = vcombine.high %v3319_v34, %v3323_v58  ;;  %v7769_v18 = vcombine.low %v3319_v34, %v3323_v58 }
 0x38a   :  { %6109 = vmatpush1.bf16.msra.mxu0 %v7703_v37  ;;  %v3326_v37 = vld [vmem:[#allocation4 + $0xa90] sm:$0xff] }
 0x38b   :  { %6281 = vmatpush1.bf16.msra.mxu1 %v7705_v5  ;;  %6110 = vmatprep.subr.bf16.mxu0 %v7712_v16  ;;  %v3330_v5 = vld [vmem:[#allocation4 + $0xab0] sm:$0xff]  ;;  %v3327_v16 = vld [vmem:[#allocation4 + $0xa98] sm:$0xff] }
 0x38c   :  { %6282 = vmatprep.subr.bf16.mxu1 %v7714_v10  ;;  %v3331_v10 = vld [vmem:[#allocation4 + $0xab8] sm:$0xff]  ;;  %v7776_v35 = vcombine.high %v3326_v37, %v3330_v5  ;;  %v7775_v3 = vcombine.low %v3326_v37, %v3330_v5 }
 0x38d   :  { %v7778_v42 = vcombine.high %v3327_v16, %v3331_v10  ;;  %v7777_v40 = vcombine.low %v3327_v16, %v3331_v10 }
 0x38e   :  { %6111 = vmatpush1.bf16.msra.mxu0 %v7711_v25  ;;  %v3334_v25 = vld [vmem:[#allocation4 + $0xad0] sm:$0xff] }
 0x38f   :  { %6283 = vmatpush1.bf16.msra.mxu1 %v7713_v52  ;;  %6112 = vmatprep.subr.bf16.mxu0 %v7720_v56  ;;  %v3338_v52 = vld [vmem:[#allocation4 + $0xaf0] sm:$0xff]  ;;  %v3335_v56 = vld [vmem:[#allocation4 + $0xad8] sm:$0xff] }
 0x390   :  { %6284 = vmatprep.subr.bf16.mxu1 %v7722_v41  ;;  %v3339_v41 = vld [vmem:[#allocation4 + $0xaf8] sm:$0xff]  ;;  %v7784_v49 = vcombine.high %v3334_v25, %v3338_v52  ;;  %v7783_v26 = vcombine.low %v3334_v25, %v3338_v52 }
 0x391   :  { %v7786_v61 = vcombine.high %v3335_v56, %v3339_v41  ;;  %v7785_v30 = vcombine.low %v3335_v56, %v3339_v41 }
 0x392   :  { %6113 = vmatpush1.bf16.msra.mxu0 %v7719_v15  ;;  %v3342_v15 = vld [vmem:[#allocation4 + $0xb10] sm:$0xff] }
 0x393   :  { %6285 = vmatpush1.bf16.msra.mxu1 %v7721_v32  ;;  %6114 = vmatprep.subr.bf16.mxu0 %v7728_v20  ;;  %v3346_v32 = vld [vmem:[#allocation4 + $0xb30] sm:$0xff]  ;;  %v3343_v20 = vld [vmem:[#allocation4 + $0xb18] sm:$0xff] }
 0x394   :  { %6286 = vmatprep.subr.bf16.mxu1 %v7730_v21  ;;  %v3347_v21 = vld [vmem:[#allocation4 + $0xb38] sm:$0xff]  ;;  %v7792_v48 = vcombine.high %v3342_v15, %v3346_v32  ;;  %v7791_v0 = vcombine.low %v3342_v15, %v3346_v32 }
 0x395   :  { %v7794_v54 = vcombine.high %v3343_v20, %v3347_v21  ;;  %v7793_v22 = vcombine.low %v3343_v20, %v3347_v21  ;;  %v3406_v21 = vld [vmem:[#allocation4 + $0xd10] sm:$0xff] }
 0x396   :  { %6115 = vmatpush1.bf16.msra.mxu0 %v7727_v47  ;;  %v3350_v47 = vld [vmem:[#allocation4 + $0xb50] sm:$0xff] }
 0x397   :  { %6287 = vmatpush1.bf16.msra.mxu1 %v7729_v14  ;;  %6116 = vmatprep.subr.bf16.mxu0 %v7736_v28  ;;  %v3354_v14 = vld [vmem:[#allocation4 + $0xb70] sm:$0xff]  ;;  %v3351_v28 = vld [vmem:[#allocation4 + $0xb58] sm:$0xff] }
 0x398   :  { %6288 = vmatprep.subr.bf16.mxu1 %v7738_v33  ;;  %v3355_v33 = vld [vmem:[#allocation4 + $0xb78] sm:$0xff]  ;;  %v7800_v19 = vcombine.high %v3350_v47, %v3354_v14  ;;  %v7799_v13 = vcombine.low %v3350_v47, %v3354_v14 }
 0x399   :  { %v7802_v60 = vcombine.high %v3351_v28, %v3355_v33  ;;  %v7801_v39 = vcombine.low %v3351_v28, %v3355_v33  ;;  %v3414_v28 = vld [vmem:[#allocation4 + $0xd50] sm:$0xff] }
 0x39a   :  { %6117 = vmatpush1.bf16.msra.mxu0 %v7735_v38  ;;  %v3358_v38 = vld [vmem:[#allocation4 + $0xb90] sm:$0xff] }
 0x39b   :  { %6289 = vmatpush1.bf16.msra.mxu1 %v7737_v55  ;;  %6118 = vmatprep.subr.bf16.mxu0 %v7744_v62  ;;  %v3362_v55 = vld [vmem:[#allocation4 + $0xbb0] sm:$0xff]  ;;  %v3359_v62 = vld [vmem:[#allocation4 + $0xb98] sm:$0xff] }
 0x39c   :  { %6290 = vmatprep.subr.bf16.mxu1 %v7746_v23  ;;  %v3363_v23 = vld [vmem:[#allocation4 + $0xbb8] sm:$0xff]  ;;  %v7808_v1 = vcombine.high %v3358_v38, %v3362_v55  ;;  %v7807_v29 = vcombine.low %v3358_v38, %v3362_v55  ;;  %v3418_v33 = vld [vmem:[#allocation4 + $0xd70] sm:$0xff] }
 0x39d   :  { %v7810_v46 = vcombine.high %v3359_v62, %v3363_v23  ;;  %v7809_v59 = vcombine.low %v3359_v62, %v3363_v23  ;;  %v7864_v38 = vcombine.high %v3414_v28, %v3418_v33  ;;  %v3422_v62 = vld [vmem:[#allocation4 + $0xd90] sm:$0xff] }
 0x39e   :  { %6119 = vmatpush1.bf16.msra.mxu0 %v7743_v2  ;;  %v3366_v2 = vld [vmem:[#allocation4 + $0xbd0] sm:$0xff] }
 0x39f   :  { %6291 = vmatpush1.bf16.msra.mxu1 %v7745_v7  ;;  %6120 = vmatprep.subr.bf16.mxu0 %v7752_v9  ;;  %v3370_v7 = vld [vmem:[#allocation4 + $0xbf0] sm:$0xff]  ;;  %v3367_v9 = vld [vmem:[#allocation4 + $0xbd8] sm:$0xff] }
 0x3a0   :  { %6292 = vmatprep.subr.bf16.mxu1 %v7754_v50  ;;  %v3371_v50 = vld [vmem:[#allocation4 + $0xbf8] sm:$0xff]  ;;  %v7816_v53 = vcombine.high %v3366_v2, %v3370_v7  ;;  %v7815_v45 = vcombine.low %v3366_v2, %v3370_v7  ;;  %v3426_v23 = vld [vmem:[#allocation4 + $0xdb0] sm:$0xff] }
 0x3a1   :  { %v7818_v12 = vcombine.high %v3367_v9, %v3371_v50  ;;  %v7817_v57 = vcombine.low %v3367_v9, %v3371_v50  ;;  %v7872_v2 = vcombine.high %v3422_v62, %v3426_v23  ;;  %v3430_v50 = vld [vmem:[#allocation4 + $0xdd0] sm:$0xff] }
 0x3a2   :  { %6121 = vmatpush1.bf16.msra.mxu0 %v7751_v51  ;;  %v3374_v51 = vld [vmem:[#allocation4 + $0xc10] sm:$0xff] }
 0x3a3   :  { %6293 = vmatpush1.bf16.msra.mxu1 %v7753_v63  ;;  %6122 = vmatprep.subr.bf16.mxu0 %v7760_v17  ;;  %v3378_v63 = vld [vmem:[#allocation4 + $0xc30] sm:$0xff]  ;;  %v3375_v17 = vld [vmem:[#allocation4 + $0xc18] sm:$0xff] }
 0x3a4   :  { %6294 = vmatprep.subr.bf16.mxu1 %v7762_v6  ;;  %v3379_v6 = vld [vmem:[#allocation4 + $0xc38] sm:$0xff]  ;;  %v7824_v34 = vcombine.high %v3374_v51, %v3378_v63  ;;  %v7823_v37 = vcombine.low %v3374_v51, %v3378_v63 }
 0x3a5   :  { %v7826_v58 = vcombine.high %v3375_v17, %v3379_v6  ;;  %v7825_v5 = vcombine.low %v3375_v17, %v3379_v6  ;;  %v3435_v51 = vld [vmem:[#allocation4 + $0xdf8] sm:$0xff] }
 0x3a6   :  { %6123 = vmatpush1.bf16.msra.mxu0 %v7759_v31  ;;  %v3382_v31 = vld [vmem:[#allocation4 + $0xc50] sm:$0xff] }
 0x3a7   :  { %6295 = vmatpush1.bf16.msra.mxu1 %v7761_v4  ;;  %6124 = vmatprep.subr.bf16.mxu0 %v7768_v11  ;;  %v3386_v4 = vld [vmem:[#allocation4 + $0xc70] sm:$0xff]  ;;  %v3383_v11 = vld [vmem:[#allocation4 + $0xc58] sm:$0xff] }
 0x3a8   :  { %6296 = vmatprep.subr.bf16.mxu1 %v7770_v8  ;;  %v3387_v8 = vld [vmem:[#allocation4 + $0xc78] sm:$0xff]  ;;  %v7832_v16 = vcombine.high %v3382_v31, %v3386_v4  ;;  %v7831_v25 = vcombine.low %v3382_v31, %v3386_v4 }
 0x3a9   :  { %v7834_v10 = vcombine.high %v3383_v11, %v3387_v8  ;;  %v7833_v52 = vcombine.low %v3383_v11, %v3387_v8 }
 0x3aa   :  { %6125 = vmatpush1.bf16.msra.mxu0 %v7767_v43  ;;  %v3390_v43 = vld [vmem:[#allocation4 + $0xc90] sm:$0xff] }
 0x3ab   :  { %6297 = vmatpush1.bf16.msra.mxu1 %v7769_v18  ;;  %6126 = vmatprep.subr.bf16.mxu0 %v7776_v35  ;;  %v3394_v18 = vld [vmem:[#allocation4 + $0xcb0] sm:$0xff]  ;;  %v3391_v35 = vld [vmem:[#allocation4 + $0xc98] sm:$0xff] }
 0x3ac   :  { %6298 = vmatprep.subr.bf16.mxu1 %v7778_v42  ;;  %v3395_v42 = vld [vmem:[#allocation4 + $0xcb8] sm:$0xff]  ;;  %v7840_v56 = vcombine.high %v3390_v43, %v3394_v18  ;;  %v7839_v15 = vcombine.low %v3390_v43, %v3394_v18  ;;  %v8666_v43 = vld [vmem:[#allocation6 + $0x40] sm:$0xff]  }
 0x3ad   :  { %v7842_v41 = vcombine.high %v3391_v35, %v3395_v42  ;;  %v8667_v18 = vld [vmem:[#allocation6] sm:$0xff]  }
 0x3ae   :  { %6127 = vmatpush1.bf16.msra.mxu0 %v7775_v3  ;;  %v3398_v3 = vld [vmem:[#allocation4 + $0xcd0] sm:$0xff] }
 0x3af   :  { %6299 = vmatpush1.bf16.msra.mxu1 %v7777_v40  ;;  %6128 = vmatprep.subr.bf16.mxu0 %v7784_v49  ;;  %v3402_v40 = vld [vmem:[#allocation4 + $0xcf0] sm:$0xff]  ;;  %v3399_v49 = vld [vmem:[#allocation4 + $0xcd8] sm:$0xff] }
 0x3b0   :  { %6300 = vmatprep.subr.bf16.mxu1 %v7786_v61  ;;  %v3403_v61 = vld [vmem:[#allocation4 + $0xcf8] sm:$0xff]  ;;  %v7848_v32 = vcombine.high %v3398_v3, %v3402_v40 }
 0x3b1   :  { %v7850_v20 = vcombine.high %v3399_v49, %v3403_v61  ;;  %v7849_v47 = vcombine.low %v3399_v49, %v3403_v61  ;;  %v8676_v49 = vld [vmem:[#allocation6 + $0x68] sm:$0xff]  }
 0x3b2   :  { %6129 = vmatpush1.bf16.msra.mxu0 %v7783_v26  ;;  %v3410_v26 = vld [vmem:[#allocation4 + $0xd30] sm:$0xff]  ;;  %v8677_v61 = vld [vmem:[#allocation6 + $0x28] sm:$0xff]  }
 0x3b3   :  { %6301 = vmatpush1.bf16.msra.mxu1 %v7785_v30  ;;  %6130 = vmatprep.subr.bf16.mxu0 %v7792_v48  ;;  %v3407_v30 = vld [vmem:[#allocation4 + $0xd18] sm:$0xff]  ;;  %v7856_v14 = vcombine.high %v3406_v21, %v3410_v26 }
 0x3b4   :  { %6302 = vmatprep.subr.bf16.mxu1 %v7794_v54  ;;  %v3411_v48 = vld [vmem:[#allocation4 + $0xd38] sm:$0xff]  ;;  %v7847_v54 = vcombine.low %v3398_v3, %v3402_v40  ;;  %v8674_v3 = vld [vmem:[#allocation6 + $0x60] sm:$0xff]  }
 0x3b5   :  { %v8675_v40 = vld [vmem:[#allocation6 + $0x20] sm:$0xff]  }
 0x3b6   :  { %6131 = vmatpush1.bf16.msra.mxu0 %v7791_v0  ;;  %v3415_v0 = vld [vmem:[#allocation4 + $0xd58] sm:$0xff] }
 0x3b7   :  { %6303 = vmatpush1.bf16.msra.mxu1 %v7793_v22  ;;  %6132 = vmatprep.subr.bf16.mxu0 %v7800_v19  ;;  %v3419_v22 = vld [vmem:[#allocation4 + $0xd78] sm:$0xff]  ;;  %v7855_v19 = vcombine.low %v3406_v21, %v3410_v26  ;;  %v8823_v21 = vmov 0.0   ;;  %v8683_v26 = vld [vmem:[#allocation6 + $0x88] sm:$0xff]  }
 0x3b8   :  { %6304 = vmatprep.subr.bf16.mxu1 %v7802_v60  ;;  %v7857_v60 = vcombine.low %v3407_v30, %v3411_v48  ;;  %v7866_v55 = vcombine.high %v3415_v0, %v3419_v22 }
 0x3ba   :  { %6133 = vmatpush1.bf16.msra.mxu0 %v7799_v13  ;;  %v3423_v13 = vld [vmem:[#allocation4 + $0xd98] sm:$0xff] }
 0x3bb   :  { %6305 = vmatpush1.bf16.msra.mxu1 %v7801_v39  ;;  %6134 = vmatprep.subr.bf16.mxu0 %v7808_v1  ;;  %v3427_v39 = vld [vmem:[#allocation4 + $0xdb8] sm:$0xff]  ;;  %v7863_v1 = vcombine.low %v3414_v28, %v3418_v33 }
 0x3bc   :  { %6306 = vmatprep.subr.bf16.mxu1 %v7810_v46  ;;  %v7865_v46 = vcombine.low %v3415_v0, %v3419_v22  ;;  %v7874_v9 = vcombine.high %v3423_v13, %v3427_v39  ;;  %v7873_v31 = vcombine.low %v3423_v13, %v3427_v39  ;;  %v9398_v0 = vsub.s32 0, %v9062_v24 }
 0x3be   :  { %6135 = vmatpush1.bf16.msra.mxu0 %v7807_v29  ;;  %v3434_v29 = vld [vmem:[#allocation4 + $0xdf0] sm:$0xff] }
 0x3bf   :  { %6307 = vmatpush1.bf16.msra.mxu1 %v7809_v59  ;;  %6136 = vmatprep.subr.bf16.mxu0 %v7816_v53  ;;  %v7880_v4 = vcombine.high %v3430_v50, %v3434_v29 }
 0x3c0   :  { %6308 = vmatprep.subr.bf16.mxu1 %v7818_v12  ;;  %v3431_v12 = vld [vmem:[#allocation4 + $0xdd8] sm:$0xff] }
 0x3c2   :  { %6137 = vmatpush1.bf16.msra.mxu0 %v7815_v45  ;;  %v7871_v45 = vcombine.low %v3422_v62, %v3426_v23 }
 0x3c3   :  { %6309 = vmatpush1.bf16.msra.mxu1 %v7817_v57  ;;  %6149 = vmatprep.subr.bf16.mxu0 %v7824_v34 }
 0x3c4   :  { %6321 = vmatprep.subr.bf16.mxu1 %v7826_v58 }
 0x3c5   :  { %6139 = vmatmul.mubr.bf16.vlgmr.msra.gmra.mrb[32].mxu0 %v9238_v44 }
 0x3c6   :  { %6311 = vmatmul.mubr.bf16.vlgmr.msra.gmra.mrb[32].mxu1 %v9238_v44  ;;  %6150 = vmatpush1.bf16.msra.mxu0 %v7823_v37  ;;  %v7841_v44 = vcombine.low %v3391_v35, %v3395_v42  ;;  %v7882_v37 = vcombine.high %v3431_v12, %v3435_v51  ;;  %v8668_v35 = vld [vmem:[#allocation6 + $0x48] sm:$0xff]  }
 0x3c7   :  { %6322 = vmatpush1.bf16.msra.mxu1 %v7825_v5  ;;  %6151 = vmatprep.subr.bf16.mxu0 %v7832_v16  ;;  %v7879_v16 = vcombine.low %v3430_v50, %v3434_v29  ;;  %v8669_v42 = vld [vmem:[#allocation6 + $0x8] sm:$0xff]  }
 0x3c8   :  { %6323 = vmatprep.subr.bf16.mxu1 %v7834_v10  ;;  %6181 = vmatprep.mubr.bf16.mxu0 %v8822_v36  ;;  %v7881_v10 = vcombine.low %v3431_v12, %v3435_v51 }
 0x3c9   :  { %6353 = vmatprep.mubr.bf16.mxu1 %v8822_v36  ;;  %v7858_v36 = vcombine.high %v3407_v30, %v3411_v48  ;;  %v8684_v30 = vld [vmem:[#allocation6 + $0x90] sm:$0xff]   ;;  %v8685_v48 = vld [vmem:[#allocation6 + $0x98] sm:$0xff]  }
 0x3ca   :  { %6152 = vmatpush1.bf16.msra.mxu0 %v7831_v25  ;;  %v8670_v25 = vld [vmem:[#allocation6 + $0x50] sm:$0xff]  }
 0x3cb   :  { %6324 = vmatpush1.bf16.msra.mxu1 %v7833_v52  ;;  %6153 = vmatprep.subr.bf16.mxu0 %v7840_v56  ;;  %v8671_v52 = vld [vmem:[#allocation6 + $0x10] sm:$0xff]   ;;  %v8672_v56 = vld [vmem:[#allocation6 + $0x58] sm:$0xff]  }
 0x3cc   :  { %6325 = vmatprep.subr.bf16.mxu1 %v7842_v41  ;;  %v8673_v41 = vld [vmem:[#allocation6 + $0x18] sm:$0xff]  }
 0x3ce   :  { %6154 = vmatpush1.bf16.msra.mxu0 %v7839_v15  ;;  %v8679_v15 = vld [vmem:[#allocation6 + $0x30] sm:$0xff]  }
 0x3cf   :  { %6326 = vmatpush1.bf16.msra.mxu1 %v7841_v44  ;;  %6155 = vmatprep.subr.bf16.mxu0 %v7848_v32  ;;  %v8680_v44 = vld [vmem:[#allocation6 + $0x78] sm:$0xff]  }
 0x3d0   :  { %6327 = vmatprep.subr.bf16.mxu1 %v7850_v20  ;;  %v8681_v32 = vld [vmem:[#allocation6 + $0x38] sm:$0xff]   ;;  %v8682_v20 = vld [vmem:[#allocation6 + $0x80] sm:$0xff]  }
 0x3d2   :  { %6156 = vmatpush1.bf16.msra.mxu0 %v7847_v54  ;;  %v8686_v54 = vld [vmem:[#allocation6 + $0xa0] sm:$0xff]  }
 0x3d3   :  { %6328 = vmatpush1.bf16.msra.mxu1 %v7849_v47  ;;  %6157 = vmatprep.subr.bf16.mxu0 %v7856_v14  ;;  %v2987_v47 = vld [vmem:[#allocation7 + $0x7] sm:$0x3] }
 0x3d4   :  { %6329 = vmatprep.subr.bf16.mxu1 %v7858_v36  ;;  %v6380_v22 = vrot.slane %v2987_v47, %v9398_v0 }
 0x3d6   :  { %6158 = vmatpush1.bf16.msra.mxu0 %v7855_v19 }
 0x3d7   :  { %6330 = vmatpush1.bf16.msra.mxu1 %v7857_v60  ;;  %6159 = vmatprep.subr.bf16.mxu0 %v7864_v38 }
 0x3d8   :  { %v9268_v7 = vpop.f32.mrb[28].mxu0  ;;  %6331 = vmatprep.subr.bf16.mxu1 %v7866_v55  ;;  %v9399_v55 = vsub.s32 1, %v9062_v24 }
 0x3d9   :  { %v9270_v59 = vpop.f32.mrb[28].mxu1  ;;  %v9272_v53 = vpop.f32.mrb[29].mxu0 }
 0x3da   :  { %v6364_v63 = vmax.f32 %v9268_v7, %v9270_v59  ;;  %v9276_v17 = vpop.f32.mrb[29].mxu1  ;;  %v9278_v6 = vpop.f32.mrb[30].mxu0  ;;  %6160 = vmatpush1.bf16.msra.mxu0 %v7863_v1  ;;  %v6384_v62 = vrot.slane %v2987_v47, %v9399_v55 }
 0x3db   :  { %v6365_v57 = vmax.f32 %v9272_v53, %v9276_v17  ;;  %v9282_v34 = vpop.f32.mrb[30].mxu1  ;;  %6332 = vmatpush1.bf16.msra.mxu1 %v7865_v46  ;;  %v9284_v58 = vpop.f32.mrb[31].mxu0  ;;  %6161 = vmatprep.subr.bf16.mxu0 %v7872_v2  ;;  %v8687_v17 = vld [vmem:[#allocation6 + $0xa8] sm:$0xff]  }
 0x3dc   :  { %v6366_v11 = vmax.f32 %v9278_v6, %v9282_v34  ;;  %v9288_v8 = vpop.f32.mrb[31].mxu1  ;;  %6333 = vmatprep.subr.bf16.mxu1 %v7874_v9  ;;  %v8688_v6 = vld [vmem:[#allocation6 + $0xb0] sm:$0xff]   ;;  %v8691_v34 = vld [vmem:[#allocation6 + $0x100] sm:$0xff]  }
 0x3dd   :  { %v6367_v5 = vmax.f32 %v9284_v58, %v9288_v8  ;;  %v8693_v58 = vld [vmem:[#allocation6 + $0x108] sm:$0xff]   ;;  %v8697_v8 = vld [vmem:[#allocation6 + $0x118] sm:$0xff]  }
 0x3de   :  { %6162 = vmatpush1.bf16.msra.mxu0 %v7871_v45 }
 0x3df   :  { %6334 = vmatpush1.bf16.msra.mxu1 %v7873_v31  ;;  %6163 = vmatprep.subr.bf16.mxu0 %v7880_v4 }
 0x3e0   :  { %6335 = vmatprep.subr.bf16.mxu1 %v7882_v37  ;;  %v8699_v37 = vld [vmem:[#allocation6 + $0x120] sm:$0xff]  }
 0x3e2   :  { %6164 = vmatpush1.bf16.msra.mxu0 %v7879_v16  ;;  %v7883_v16 = vld [vmem:[#allocation7 + $0x9] ss:$0 sm:$0xff] }
 0x3e3   :  { %6336 = vmatpush1.bf16.msra.mxu1 %v7881_v10  ;;  %7935 = vmatprep.subr.bf16.mxu0 %v8666_v43 }
 0x3e4   :  { %7993 = vmatprep.subr.bf16.mxu1 %v8823_v21 }
 0x3e5   :  { %6182 = vmatmul.mubr.bf16.vlgmr.msra.gmra.mrb[32].mxu0 %v9240_v27 }
 0x3e6   :  { %6354 = vmatmul.mubr.bf16.vlgmr.msra.gmra.mrb[32].mxu1 %v9240_v27  ;;  %7936 = vmatpush3.bf16.msra.mxu0 %v8667_v18  ;;  %v8678_v27 = vld [vmem:[#allocation6 + $0x70] sm:$0xff]  }
 0x3e7   :  { %7937 = vmatprep.subr.bf16.mxu0 %v8668_v35  ;;  %7994 = vmatpush3.bf16.msra.mxu1 %v8682_v20  ;;  %v8702_v20 = vld [vmem:[#allocation6 + $0xf0] sm:$0xff]  }
 0x3e8   :  { %7995 = vmatprep.subr.bf16.mxu1 %v8823_v21  ;;  %8009 = vmatprep.mubr.msk.bf16.mxu1 %vm8824_vm2, %v8823_v21 }
 0x3ea   :  { %7938 = vmatpush3.bf16.msra.mxu0 %v8669_v42 }
 0x3eb   :  { %7939 = vmatprep.subr.bf16.mxu0 %v8670_v25  ;;  %7996 = vmatpush3.bf16.msra.mxu1 %v8683_v26  ;;  %v8703_v26 = vld [vmem:[#allocation6 + $0x130] sm:$0xff]  }
 0x3ec   :  { %7997 = vmatprep.subr.bf16.mxu1 %v8823_v21 }
 0x3ee   :  { %7940 = vmatpush3.bf16.msra.mxu0 %v8671_v52 }
 0x3ef   :  { %7941 = vmatprep.subr.bf16.mxu0 %v8672_v56  ;;  %7998 = vmatpush3.bf16.msra.mxu1 %v8684_v30  ;;  %v8704_v30 = vld [vmem:[#allocation6 + $0xf8] sm:$0xff]  }
 0x3f0   :  { %7999 = vmatprep.subr.bf16.mxu1 %v8823_v21 }
 0x3f2   :  { %7942 = vmatpush3.bf16.msra.mxu0 %v8673_v41 }
 0x3f3   :  { %7943 = vmatprep.subr.bf16.mxu0 %v8674_v3  ;;  %8000 = vmatpush3.bf16.msra.mxu1 %v8685_v48  ;;  %v8690_v3 = vld [vmem:[#allocation6 + $0xc0] sm:$0xff]   ;;  %v8705_v48 = vld [vmem:[#allocation6 + $0x138] sm:$0xff]  }
 0x3f4   :  { %8001 = vmatprep.subr.bf16.mxu1 %v8823_v21 }
 0x3f6   :  { %7944 = vmatpush3.bf16.msra.mxu0 %v8675_v40 }
 0x3f7   :  { %7945 = vmatprep.subr.bf16.mxu0 %v8676_v49  ;;  %8002 = vmatpush3.bf16.msra.mxu1 %v8686_v54  ;;  %v8692_v49 = vld [vmem:[#allocation6 + $0xc8] sm:$0xff]  }
 0x3f8   :  { %8003 = vmatprep.subr.bf16.mxu1 %v8823_v21  ;;  %v7900_v54 = vld [vmem:[#allocation7 + $0xa] ss:$0 sm:$0xff] }
 0x3fa   :  { %7946 = vmatpush3.bf16.msra.mxu0 %v8677_v61  ;;  %v8694_v61 = vld [vmem:[#allocation6 + $0xd0] sm:$0xff]  }
 0x3fb   :  { %7947 = vmatprep.subr.bf16.mxu0 %v8678_v27  ;;  %8004 = vmatpush3.bf16.msra.mxu1 %v8687_v17  ;;  %v8696_v27 = vld [vmem:[#allocation6 + $0xd8] sm:$0xff]   ;;  %v7926_v17 = vld [vmem:[#allocation7 + $0xc] ss:$0 sm:$0xff] }
 0x3fc   :  { %8005 = vmatprep.subr.bf16.mxu1 %v8823_v21 }
 0x3fe   :  { %7948 = vmatpush3.bf16.msra.mxu0 %v8679_v15  ;;  %v8698_v15 = vld [vmem:[#allocation6 + $0xe0] sm:$0xff]  }
 0x3ff   :  { %7949 = vmatprep.subr.bf16.mxu0 %v8680_v44  ;;  %8006 = vmatpush3.bf16.msra.mxu1 %v8688_v6  ;;  %v8700_v44 = vld [vmem:[#allocation6 + $0xe8] sm:$0xff]  }
 0x400   :  { %8007 = vmatprep.subr.bf16.mxu1 %v8823_v21 }
 0x402   :  { %7950 = vmatpush3.bf16.msra.mxu0 %v8681_v32  ;;  %v8701_v32 = vld [vmem:[#allocation6 + $0x128] sm:$0xff]  }
 0x403   :  { %8013 = vmatprep.subr.bf16.mxu0 %v8823_v21 }
 0x4b8   :  { %v6183_v14 = vpop.f32.mrb[32].mxu0 }
 0x4b9   :  { %v6355_v36 = vpop.f32.mrb[32].mxu1  ;;  %v6185_v28 = vpop.f32.mrb[33].mxu0 }
 0x4ba   :  { %v6368_v33 = vmax.f32 %v6183_v14, %v6355_v36  ;;  %v6357_v19 = vpop.f32.mrb[33].mxu1  ;;  %v6187_v60 = vpop.f32.mrb[34].mxu0 }
 0x4bb   :  { %v6369_v38 = vmax.f32 %v6185_v28, %v6357_v19  ;;  %v6359_v23 = vpop.f32.mrb[34].mxu1  ;;  %v6189_v13 = vpop.f32.mrb[35].mxu0 }
 0x4bc   :  { %v6372_v39 = vmax.f32 %v6364_v63, %v6368_v33  ;;  %v6370_v1 = vmax.f32 %v6187_v60, %v6359_v23  ;;  %v6361_v46 = vpop.f32.mrb[35].mxu1  ;;  %v8708_v23 = vld [vmem:[#allocation6 + $0x150] sm:$0xff]  }
 0x4bd   :  { %v6373_v2 = vmax.f32 %v6365_v57, %v6369_v38  ;;  %v6371_v9 = vmax.f32 %v6189_v13, %v6361_v46  ;;  %v8689_v57 = vld [vmem:[#allocation6 + $0xb8] sm:$0xff]   ;;  %v8706_v38 = vld [vmem:[#allocation6 + $0x140] sm:$0xff]   ;;  %v8712_v46 = vld [vmem:[#allocation6 + $0x170] sm:$0xff]  }
 0x4be   :  { %v6387_v50 = vadd.f32 %v6380_v22, %v6372_v39  ;;  %v6374_v29 = vmax.f32 %v6366_v11, %v6370_v1  ;;  %8008 = vmatpush3.bf16.msra.mxu1 %v8689_v57  ;;  %v8695_v11 = vld [vmem:[#allocation6 + $0x110] sm:$0xff]   ;;  %v8709_v13 = vld [vmem:[#allocation6 + $0x158] sm:$0xff]   ;;  %v8710_v39 = vld [vmem:[#allocation6 + $0x160] sm:$0xff]  }
 0x4bf   :  { %v6388_v24 = vadd.f32 %v6384_v62, %v6373_v2  ;;  %v6375_v12 = vmax.f32 %v6367_v5, %v6371_v9  ;;  %8033 = vmatprep.subr.bf16.mxu1 %v8823_v21  ;;  %v8711_v1 = vld [vmem:[#allocation6 + $0x168] sm:$0xff]   ;;  %v8713_v2 = vld [vmem:[#allocation6 + $0x178] sm:$0xff]  }
 0x4c0   :  { %v6389_v51 = vadd.f32 %v6380_v22, %v6374_v29  ;;  %v6391_v59 = vmax.f32 %v6387_v50, 0.0 }
 0x4c1   :  { %v6390_v7 = vadd.f32 %v6384_v62, %v6375_v12  ;;  %v6392_v45 = vmax.f32 %v6388_v24, 0.0  ;;  %v8707_v62 = vld [vmem:[#allocation6 + $0x148] sm:$0xff]  }
 0x4c2   :  { %v6393_v63 = vmax.f32 %v6389_v51, 0.0  ;;  %v7925_v24 = vld [vmem:[#allocation7 + $0xb] ss:$0 sm:$0xff] }
 0x4c3   :  { %v6394_v31 = vmax.f32 %v6390_v7, 0.0 }
 0x4c4   :  { %v6395_v4 = vpack.c.bf16 %v6393_v63, %v6391_v59 }
 0x4c5   :  { %v6396_v53 = vpack.c.bf16 %v6394_v31, %v6392_v45 }
 0x4c7   :  { %6564 = vmatprep.mubr.bf16.mxu0 %v6396_v53 }
 0x4c8   :  { %6565 = vmatmul.mubr.bf16.vlgmr.msra.gmra.mrb[36].mxu0 %v6395_v4 }
 0x4c9   :  { %8029 = vmatprep.mubr.msk.bf16.mxu0 %vm8824_vm2, %v8823_v21  ;;  %8014 = vmatpush3.bf16.msra.mxu0 %v8691_v34 }
 0x4ca   :  { %8015 = vmatprep.subr.bf16.mxu0 %v8823_v21 }
 0x4cd   :  { %8016 = vmatpush3.bf16.msra.mxu0 %v8693_v58 }
 0x4ce   :  { %8017 = vmatprep.subr.bf16.mxu0 %v8823_v21 }
 0x4d1   :  { %8018 = vmatpush3.bf16.msra.mxu0 %v8695_v11 }
 0x4d2   :  { %8019 = vmatprep.subr.bf16.mxu0 %v8823_v21 }
 0x4d5   :  { %8020 = vmatpush3.bf16.msra.mxu0 %v8697_v8 }
 0x4d6   :  { %8021 = vmatprep.subr.bf16.mxu0 %v8823_v21 }
 0x4d9   :  { %8022 = vmatpush3.bf16.msra.mxu0 %v8699_v37 }
 0x4da   :  { %8023 = vmatprep.subr.bf16.mxu0 %v8823_v21 }
 0x4dd   :  { %8024 = vmatpush3.bf16.msra.mxu0 %v8701_v32 }
 0x4de   :  { %8025 = vmatprep.subr.bf16.mxu0 %v8823_v21 }
 0x4e1   :  { %8026 = vmatpush3.bf16.msra.mxu0 %v8703_v26 }
 0x4e2   :  { %8027 = vmatprep.subr.bf16.mxu0 %v8823_v21 }
 0x4e5   :  { %8028 = vmatpush3.bf16.msra.mxu0 %v8705_v48 }
 0x4e6   :  { %8053 = vmatprep.subr.bf16.mxu0 %v8823_v21 }
 0x59b   :  { %v7951_v5 = vpop.f32.mrb[36].mxu0 }
 0x59c   :  { %v7952_v10 = vpop.f32.mrb[37].mxu0 }
 0x59d   :  { %v7953_v43 = vadd.f32 %v7952_v10, %v7951_v5  ;;  %v7954_v18 = vpop.f32.mrb[38].mxu0 }
 0x59e   :  { %v7955_v35 = vpop.f32.mrb[39].mxu0 }
 0x59f   :  { %v6567_v42 = vadd.f32 %v7953_v43, %v7883_v16  ;;  %v7956_v25 = vadd.f32 %v7955_v35, %v7954_v18 }
 0x5a1   :  { %v6570_v52 = vadd.f32 %v7956_v25, %v7883_v16  ;;  %v6573_v56 = vmax.f32 %v6567_v42, 0.0 }
 0x5a3   :  { %v6574_v41 = vmax.f32 %v6570_v52, 0.0 }
 0x5a5   :  { %v6575_v40 = vpack.c.bf16 %v6574_v41, %v6573_v56 }
 0x5a7   :  { %8010 = vmatmul.mubr.bf16.vlgmr.msra.gmra.mrb[36].mxu1 %v6575_v40 }
 0x5a8   :  { %8034 = vmatpush3.bf16.msra.mxu1 %v8690_v3  ;;  %8049 = vmatprep.mubr.msk.bf16.mxu1 %vm8824_vm2, %v8823_v21 }
 0x5a9   :  { %8035 = vmatprep.subr.bf16.mxu1 %v8823_v21 }
 0x5ac   :  { %8036 = vmatpush3.bf16.msra.mxu1 %v8692_v49 }
 0x5ad   :  { %8037 = vmatprep.subr.bf16.mxu1 %v8823_v21 }
 0x5b0   :  { %8038 = vmatpush3.bf16.msra.mxu1 %v8694_v61 }
 0x5b1   :  { %8039 = vmatprep.subr.bf16.mxu1 %v8823_v21 }
 0x5b4   :  { %8040 = vmatpush3.bf16.msra.mxu1 %v8696_v27 }
 0x5b5   :  { %8041 = vmatprep.subr.bf16.mxu1 %v8823_v21 }
 0x5b8   :  { %8042 = vmatpush3.bf16.msra.mxu1 %v8698_v15 }
 0x5b9   :  { %8043 = vmatprep.subr.bf16.mxu1 %v8823_v21 }
 0x5bc   :  { %8044 = vmatpush3.bf16.msra.mxu1 %v8700_v44 }
 0x5bd   :  { %8045 = vmatprep.subr.bf16.mxu1 %v8823_v21 }
 0x5c0   :  { %8046 = vmatpush3.bf16.msra.mxu1 %v8702_v20 }
 0x5c1   :  { %8047 = vmatprep.subr.bf16.mxu1 %v8823_v21 }
 0x5c4   :  { %8048 = vmatpush3.bf16.msra.mxu1 %v8704_v30 }
 0x67a   :  { %v6681_v47 = vpop.f32.mrb[36].mxu1 }
 0x67b   :  { %v6682_v14 = vadd.f32 %v7900_v54, %v6681_v47  ;;  %v8011_v36 = vpop.f32.mrb[37].mxu1 }
 0x67c   :  { %v6684_v28 = vpop.f32.mrb[38].mxu1 }
 0x67d   :  { %v6688_v33 = vmax.f32 %v6682_v14, 0.0  ;;  %v6685_v0 = vadd.f32 %v7900_v54, %v6684_v28  ;;  %v8012_v22 = vpop.f32.mrb[39].mxu1 }
 0x67f   :  { %6690 = vst [vmem:[%s9364_s5] sm:$0xff] %v6688_v33  ;;  %v6689_v19 = vmax.f32 %v6685_v0, 0.0 }
 0x681   :  { %6691 = vst [vmem:[%s9364_s5 + $0x8] sm:$0xff] %v6689_v19  ;;  %v6692_v60 = vpack.c.bf16 %v6689_v19, %v6688_v33 }
 0x683   :  { %v6726_v55 = vrot.slane %v6692_v60, 4  ;;  %8050 = vmatmul.mubr.bf16.vlgmr.msra.gmra.mrb[40].mxu1 %v6692_v60 }
 0x685   :  { %8030 = vmatmul.mubr.bf16.vlgmr.msra.gmra.mrb[40].mxu0 %v6726_v55 }
 0x686   :  { %8054 = vmatpush3.bf16.msra.mxu0 %v8706_v38  ;;  %8069 = vmatprep.mubr.msk.bf16.mxu0 %vm8824_vm2, %v8823_v21 }
 0x687   :  { %8055 = vmatprep.subr.bf16.mxu0 %v8823_v21 }
 0x68a   :  { %8056 = vmatpush3.bf16.msra.mxu0 %v8707_v62 }
 0x68b   :  { %8057 = vmatprep.subr.bf16.mxu0 %v8823_v21 }
 0x68e   :  { %8058 = vmatpush3.bf16.msra.mxu0 %v8708_v23 }
 0x68f   :  { %8059 = vmatprep.subr.bf16.mxu0 %v8823_v21 }
 0x692   :  { %8060 = vmatpush3.bf16.msra.mxu0 %v8709_v13 }
 0x693   :  { %8061 = vmatprep.subr.bf16.mxu0 %v8823_v21 }
 0x696   :  { %8062 = vmatpush3.bf16.msra.mxu0 %v8710_v39 }
 0x697   :  { %8063 = vmatprep.subr.bf16.mxu0 %v8823_v21 }
 0x69a   :  { %8064 = vmatpush3.bf16.msra.mxu0 %v8711_v1 }
 0x69b   :  { %8065 = vmatprep.subr.bf16.mxu0 %v8823_v21 }
 0x69e   :  { %8066 = vmatpush3.bf16.msra.mxu0 %v8712_v46 }
 0x69f   :  { %8067 = vmatprep.subr.bf16.mxu0 %v8823_v21 }
 0x6a2   :  { %8068 = vmatpush3.bf16.msra.mxu0 %v8713_v2 }
 0x756   :  { %v6898_v9 = vpop.f32.mrb[40].mxu1 }
 0x757   :  { %v8051_v50 = vpop.f32.mrb[41].mxu1 }
 0x758   :  { %v6810_v29 = vpop.f32.mrb[40].mxu0  ;;  %v6901_v12 = vpop.f32.mrb[42].mxu1 }
 0x759   :  { %v6899_v51 = vadd.f32 %v6898_v9, %v6810_v29  ;;  %v8031_v7 = vpop.f32.mrb[41].mxu0  ;;  %v8052_v59 = vpop.f32.mrb[43].mxu1 }
 0x75a   :  { %v6813_v63 = vpop.f32.mrb[42].mxu0 }
 0x75b   :  { %v6911_v45 = vadd.f32 %v7925_v24, %v6899_v51  ;;  %v8032_v31 = vpop.f32.mrb[43].mxu0 }
 0x75d   :  { %v6912_v4 = vmax.f32 %v6911_v45, 0.0 }
 0x75f   :  { %v6913_v53 = vpack.c.bf16 %v6912_v4, %v6912_v4 }
 0x761   :  { %8070 = vmatmul.mubr.bf16.vlgmr.msra.gmra.mrb[44].mxu0 %v6913_v53 }
 0x834   :  { %v7019_v6 = vpop.f32.mrb[44].mxu0 }
 0x835   :  { %v7020_v57 = vadd.f32 %v7926_v17, %v7019_v6  ;;  %v8071_v21 = vpop.f32.mrb[45].mxu0 }
 0x836   :  { %v7022_v34 = vpop.f32.mrb[46].mxu0 }
 0x837   :  { %v7025_v58 = vsub.f32 0.0, %v7020_v57  ;;  %v8072_v11 = vpop.f32.mrb[47].mxu0 }
 0x839   :  { %v7026_v8 = vmul.f32 1.442695, %v7025_v58 }
 0x83b   :  { %8714 = vpow2.f32 %v7026_v8 }
 0x845   :  { %v8715_v37 = vpop.eup %8714 }
 0x846   :  { %v7028_v5 = vadd.f32 1.0, %v8715_v37 }
 0x848   :  { %8716 = vrcp.f32 %v7028_v5 }
 0x852   :  { %v8717_v16 = vpop.eup %8716 }
 0x853   :  { %7031 = vst [vmem:[%s9365_s6] sm:$0xff] %v8717_v16 }
 0x854   :  { %7040 = vsyncpa [#allocation3], 1 }
 0x855   :  { %7041 = vsyncpa [#allocation5], 1 }
 0x856   :  { %7042 = vsyncpa [#allocation8], 1 }

</bundles_post_ra>
